<compile_context>
chip_gen: v7x
topology: tpu7x:2x2x1
jax: 0.10.0
libtpu: 0.0.40
codegen_flags: <defaults>
</compile_context>

<pallas_src>
import math

import jax
import jax.numpy as jnp
from jax.experimental import pallas as pl
from jax.experimental.pallas import tpu as pltpu

LANES = 128                     # padded channel width (n_hidden 80 -> 128)
# (kernel, stride) of the 7 conv blocks of SIG_Extract_2
CONV_LAYERS = ((10, 5), (3, 2), (3, 2), (3, 2), (3, 2), (2, 2), (2, 2))
BN_EPS = 1e-5
GN_EPS = 1e-5


def _round_up8(n):
    return (n + 7) // 8 * 8


# ------------------------------ fused kernel --------------------------------

def _make_kernel(conv_cfg):
    """Build the fused whole-network kernel (closure over the static config)."""
    n_layers = len(conv_cfg)

    def kernel(p1_ref, cw_ref, bnsh_ref, gn_ref,
               sew1_ref, seb1_ref, sew2_ref, seb2_ref,
               fcw_ref, fcb_ref, o_ref, scr0, scr1):
        f32 = jnp.float32
        bf16 = jnp.bfloat16

        def se_block(x, li, t_valid):
            # Squeeze (mean over time as sum * 1/T), excite (two 1x1 convs), re-scale.
            pooled = jnp.sum(x, axis=0, keepdims=True) * (1.0 / t_valid)       # (1, C) f32
            h = jnp.dot(pooled.astype(bf16), sew1_ref[li],
                        preferred_element_type=f32)
            h = jnp.maximum(h + seb1_ref[li:li + 1, :], 0.0)                   # ReLU (f32)
            s = jnp.dot(h.astype(bf16), sew2_ref[li],
                        preferred_element_type=f32)
            s = jax.nn.sigmoid(s + seb2_ref[li:li + 1, :])
            return x * s                                                       # channel attention

        # --- layer 0: im2col matmul (patches built on host) + BN + GroupNorm + GELU + SE
        p1 = p1_ref[0]                                                         # (T1, 128) bf16
        t1 = p1.shape[0]
        x = jnp.dot(p1, cw_ref[0, 0:LANES, :], preferred_element_type=f32)     # (T1, C) f32
        x = x + bnsh_ref[0:1, :]                                               # folded eval BN
        # Fp32GroupNorm(80, 80): per-channel stats over time, ONE pass (sum + sumsq).
        inv_t = 1.0 / float(t1)
        s1 = jnp.sum(x, axis=0, keepdims=True)
        s2 = jnp.sum(x * x, axis=0, keepdims=True)
        mu = s1 * inv_t
        var = s2 * inv_t - mu * mu
        x = (x - mu) * jax.lax.rsqrt(var + GN_EPS)
        x = x * gn_ref[0:1, :] + gn_ref[1:2, :]
        # TODO(synk): nn.GELU() is the exact erf form; the tanh approximation is used
        # since erf has no guaranteed Mosaic lowering (max abs deviation ~1e-3).
        x = jax.nn.gelu(x, approximate=True)
        x = se_block(x, 0, float(t1))
        scr0[0:t1, :] = x                                                      # stage in VMEM (f32)

        # --- layers 1..6: strided tap reads at output resolution, ONE K-stacked matmul each
        bufs = (scr0, scr1)
        cur = 0
        t_in = t1
        for li in range(1, n_layers):
            k, stride = conv_cfg[li]
            t_out = (t_in - k) // stride + 1
            src = bufs[cur]
            # tap j of a stride-s conv reads input rows j, j+s, ... directly at
            # output resolution -- strided sublane reads, no gathers, no sel matmul.
            slices = [src[pl.ds(j, t_out, stride=stride), :] for j in range(k)]
            lhs = jnp.concatenate(slices, axis=-1).astype(bf16)                # (t_out, k*128)
            y = jnp.dot(lhs, cw_ref[li, 0:k * LANES, :],
                        preferred_element_type=f32)                           # (t_out, 128)
            y = y + bnsh_ref[li:li + 1, :]                                     # folded eval BN
            y = jax.nn.gelu(y, approximate=True)
            x = se_block(y, li, float(t_out))
            if li < n_layers - 1:                                              # last layer feeds FC directly
                bufs[1 - cur][0:t_out, :] = x
                cur = 1 - cur
            t_in = t_out

        # --- FC head (output lanes padded to 128; host slices the 39 real classes)
        y = jnp.dot(x.astype(bf16), fcw_ref[...], preferred_element_type=f32)
        y = y + fcb_ref[...]
        o_ref[...] = y[None, :, :]

    return kernel


# ------------------------------ JAX wrapper ---------------------------------

def sig_extract_2_forward(signals, packed, *, n_classes=39):
    """signals: padded (B, seq_len, 1) float32. Returns (B, n_classes, T_out)."""
    # TODO(synk): torch.nn.utils.rnn.pad_packed_sequence has no Pallas equivalent;
    # the kernel consumes the already-padded (B, seq_len, mel_dim=1) signal directly.
    B, T0, in_d = signals.shape
    assert in_d == 1, "SIG_Extract_2 first conv has in_channels=1"
    x = signals[:, :, 0]

    t = T0
    t_lens = []
    for (k, s) in CONV_LAYERS:
        t = (t - k) // s + 1                     # Conv1d, padding=0 (PyTorch default)
        t_lens.append(t)
    T1, T_out = t_lens[0], t_lens[-1]

    # host-side im2col of the raw waveform for layer 0 only (lane-padded input prep)
    k1, s1 = CONV_LAYERS[0]
    idx = jnp.arange(T1)[:, None] * s1 + jnp.arange(k1)[None, :]
    patches = x[:, idx]                                           # (B, T1, k1)
    patches = jnp.pad(patches, ((0, 0), (0, 0), (0, LANES - k1))).astype(jnp.bfloat16)

    n_layers = len(CONV_LAYERS)
    kdim = packed["conv_w"].shape[1]                              # K-stacked weight depth (384)

    out = pl.pallas_call(
        _make_kernel(CONV_LAYERS),
        out_shape=jax.ShapeDtypeStruct((B, T_out, LANES), jnp.float32),
        grid=(B,),
        in_specs=[
            pl.BlockSpec((1, T1, LANES), lambda b: (b, 0, 0)),             # layer-0 patches (bf16)
            pl.BlockSpec((n_layers, kdim, LANES), lambda b: (0, 0, 0)),    # K-stacked conv taps (bf16, BN scale folded)
            pl.BlockSpec((n_layers, LANES), lambda b: (0, 0)),             # BN shift rows (f32)
            pl.BlockSpec((2, LANES), lambda b: (0, 0)),                    # GroupNorm gamma/beta (f32)
            pl.BlockSpec((n_layers, LANES, LANES), lambda b: (0, 0, 0)),   # SE conv1 weights (bf16)
            pl.BlockSpec((n_layers, LANES), lambda b: (0, 0)),             # SE conv1 bias (f32)
            pl.BlockSpec((n_layers, LANES, LANES), lambda b: (0, 0, 0)),   # SE conv2 weights (bf16)
            pl.BlockSpec((n_layers, LANES), lambda b: (0, 0)),             # SE conv2 bias (f32)
            pl.BlockSpec((LANES, LANES), lambda b: (0, 0)),                # FC weight (bf16)
            pl.BlockSpec((1, LANES), lambda b: (0, 0)),                    # FC bias (f32)
        ],
        out_specs=pl.BlockSpec((1, T_out, LANES), lambda b: (b, 0, 0)),
        scratch_shapes=[
            pltpu.VMEM((_round_up8(T1), LANES), jnp.float32),              # activations of layers 0,2,4
            pltpu.VMEM((_round_up8(t_lens[1]), LANES), jnp.float32),       # activations of layers 1,3,5
        ],
        compiler_params=pltpu.CompilerParams(
            dimension_semantics=("parallel",)),                            # 2 TCs on v7x
    )(patches, packed["conv_w"], packed["bn_shift"], packed["gn"],
      packed["se_w1"], packed["se_b1"], packed["se_w2"], packed["se_b2"],
      packed["fc_w"], packed["fc_b"])

    return out[:, :, :n_classes].transpose(0, 2, 1)                        # (B, n_classes, T_out)


# ----------------------------- parameter setup ------------------------------

def init_params(key, n_hidden=80, n_classes=39, reduction=16):
    """Raw parameters in PyTorch layouts (Conv1d weight = (C_out, C_in, k), etc.)."""
    cmid = n_hidden // reduction
    layers = []
    in_d = 1
    for (k, s) in CONV_LAYERS:
        key, k1, k2, k3, k4, k5 = jax.random.split(key, 6)
        fan_in = in_d * k
        layers.append(dict(
            conv_w=jax.random.normal(k1, (n_hidden, in_d, k), jnp.float32)
                   * math.sqrt(2.0 / fan_in),                              # kaiming_normal_
            # BatchNorm1d applied in eval mode with a fresh module's stats/affine
            bn_gamma=jnp.ones((n_hidden,), jnp.float32),
            bn_beta=jnp.zeros((n_hidden,), jnp.float32),
            bn_rmean=jnp.zeros((n_hidden,), jnp.float32),
            bn_rvar=jnp.ones((n_hidden,), jnp.float32),
            # SEBlock: two 1x1 Conv1d layers with bias
            se_w1=jax.random.normal(k2, (cmid, n_hidden, 1), jnp.float32) / math.sqrt(n_hidden),
            se_b1=jax.random.normal(k3, (cmid,), jnp.float32) * 0.05,
            se_w2=jax.random.normal(k4, (n_hidden, cmid, 1), jnp.float32) / math.sqrt(cmid),
            se_b2=jax.random.normal(k5, (n_hidden,), jnp.float32) * 0.05,
        ))
        in_d = n_hidden
    # Fp32GroupNorm(80, 80, affine=True) on layer 0 only (PyTorch init: weight=1, bias=0)
    layers[0]["gn_gamma"] = jnp.ones((n_hidden,), jnp.float32)
    layers[0]["gn_beta"] = jnp.zeros((n_hidden,), jnp.float32)
    key, kf1, kf2 = jax.random.split(key, 3)
    fc_w = jax.random.normal(kf1, (n_classes, n_hidden), jnp.float32) / math.sqrt(n_hidden)
    fc_b = jax.random.normal(kf2, (n_classes,), jnp.float32) * 0.05
    return layers, (fc_w, fc_b)


def pack_params(layers, fc_w, fc_b):
    """Fold eval-mode BN into conv weights, stack taps along K, pad to LANES, cast to bf16."""
    n_hidden = layers[0]["conv_w"].shape[0]
    n_classes = fc_w.shape[0]
    max_k = max(k for (k, _) in CONV_LAYERS[1:])            # 3
    kdim = max_k * LANES                                    # 384 (layer 0 uses first 128)
    conv_mats, bn_shifts = [], []
    se_w1, se_b1, se_w2, se_b2 = [], [], [], []
    for i, L in enumerate(layers):
        w = L["conv_w"]                                     # (C_out, C_in, k)
        c_out, c_in, k = w.shape
        scale = L["bn_gamma"] / jnp.sqrt(L["bn_rvar"] + BN_EPS)
        shift = L["bn_beta"] - L["bn_rmean"] * scale
        wk = jnp.zeros((kdim, LANES), jnp.float32)          # exact-zero padding (kept zero in bf16)
        if i == 0:                                          # layer 0: one im2col matrix (C_in == 1)
            wm = w.reshape(c_out, c_in * k).T * scale[None, :]            # (k, C_out)
            wk = wk.at[:c_in * k, :c_out].set(wm)
        else:                                               # taps stacked along K -> single matmul
            for j in range(k):
                wj = w[:, :, j].T * scale[None, :]                        # (C_in, C_out)
                wk = wk.at[j * LANES:j * LANES + c_in, :c_out].set(wj)
        conv_mats.append(wk)
        bn_shifts.append(jnp.pad(shift, (0, LANES - c_out)))
        cmid = L["se_w1"].shape[0]
        se_w1.append(jnp.pad(L["se_w1"][:, :, 0].T, ((0, LANES - c_out), (0, LANES - cmid))))
        se_b1.append(jnp.pad(L["se_b1"], (0, LANES - cmid)))
        se_w2.append(jnp.pad(L["se_w2"][:, :, 0].T, ((0, LANES - cmid), (0, LANES - c_out))))
        se_b2.append(jnp.pad(L["se_b2"], (0, LANES - c_out)))
    return dict(
        conv_w=jnp.stack(conv_mats).astype(jnp.bfloat16),    # (7, 384, 128) bf16
        bn_shift=jnp.stack(bn_shifts),                       # (7, 128) f32
        gn=jnp.stack([jnp.pad(layers[0]["gn_gamma"], (0, LANES - n_hidden)),
                      jnp.pad(layers[0]["gn_beta"], (0, LANES - n_hidden))]),
        se_w1=jnp.stack(se_w1).astype(jnp.bfloat16),
        se_b1=jnp.stack(se_b1),
        se_w2=jnp.stack(se_w2).astype(jnp.bfloat16),
        se_b2=jnp.stack(se_b2),
        fc_w=jnp.pad(fc_w.T, ((0, LANES - n_hidden), (0, LANES - n_classes))).astype(jnp.bfloat16),
        fc_b=jnp.pad(fc_b, (0, LANES - n_classes))[None, :],
    )


# --------------------------------- driver -----------------------------------

if __name__ == "__main__":
    key = jax.random.PRNGKey(0)
    k_in, k_par = jax.random.split(key)
    B, T0 = 2, 1600
    # padded (batch, seq_len, mel_dim=1) signals (what pad_packed_sequence would return)
    signals = jax.random.normal(k_in, (B, T0, 1), jnp.float32)
    layers, (fc_w, fc_b) = init_params(k_par, n_hidden=80, n_classes=39)
    packed = pack_params(layers, fc_w, fc_b)

    fwd = jax.jit(sig_extract_2_forward, static_argnames=("n_classes",))
    y = jax.block_until_ready(fwd(signals, packed, n_classes=39))

    # time axis: 1600 -> 319 -> 159 -> 79 -> 39 -> 19 -> 9 -> 4
    assert y.shape == (B, 39, 4), y.shape
    assert bool(jnp.all(jnp.isfinite(y)))
    print("KERNEL_OK")
</pallas_src>

<mosaic_0001>
module attributes {stable_mosaic.version = 11 : i64} {
  func.func @kernel(%arg0: i32, %arg1: memref<1x319x128xbf16, #tpu.memory_space<vmem>>, %arg2: memref<7x384x128xbf16, #tpu.memory_space<vmem>>, %arg3: memref<7x128xf32, #tpu.memory_space<vmem>>, %arg4: memref<2x128xf32, #tpu.memory_space<vmem>>, %arg5: memref<7x128x128xbf16, #tpu.memory_space<vmem>>, %arg6: memref<7x128xf32, #tpu.memory_space<vmem>>, %arg7: memref<7x128x128xbf16, #tpu.memory_space<vmem>>, %arg8: memref<7x128xf32, #tpu.memory_space<vmem>>, %arg9: memref<128x128xbf16, #tpu.memory_space<vmem>>, %arg10: memref<1x128xf32, #tpu.memory_space<vmem>>, %arg11: memref<1x4x128xf32, #tpu.memory_space<vmem>>, %arg12: memref<320x128xf32, #tpu.memory_space<vmem>>, %arg13: memref<160x128xf32, #tpu.memory_space<vmem>>) attributes {dimension_semantics = [#tpu.dimension_semantics<parallel>], iteration_bounds = array<i64: 2>, scalar_prefetch = 0 : i64, scratch_operands = 2 : i64, tpu.core_type = #tpu.core_type<tc>, window_params = [{transform_indices = @transform_0, window_bounds = array<i64: 1, 319, 128>}, {pipeline_mode = #tpu.pipeline_mode<synchronous>, transform_indices = @transform_1, window_bounds = array<i64: 7, 384, 128>}, {pipeline_mode = #tpu.pipeline_mode<synchronous>, transform_indices = @transform_2, window_bounds = array<i64: 7, 128>}, {pipeline_mode = #tpu.pipeline_mode<synchronous>, transform_indices = @transform_3, window_bounds = array<i64: 2, 128>}, {pipeline_mode = #tpu.pipeline_mode<synchronous>, transform_indices = @transform_4, window_bounds = array<i64: 7, 128, 128>}, {pipeline_mode = #tpu.pipeline_mode<synchronous>, transform_indices = @transform_5, window_bounds = array<i64: 7, 128>}, {pipeline_mode = #tpu.pipeline_mode<synchronous>, transform_indices = @transform_6, window_bounds = array<i64: 7, 128, 128>}, {pipeline_mode = #tpu.pipeline_mode<synchronous>, transform_indices = @transform_7, window_bounds = array<i64: 7, 128>}, {pipeline_mode = #tpu.pipeline_mode<synchronous>, transform_indices = @transform_8, window_bounds = array<i64: 128, 128>}, {pipeline_mode = #tpu.pipeline_mode<synchronous>, transform_indices = @transform_9, window_bounds = array<i64: 1, 128>}, {transform_indices = @transform_10, window_bounds = array<i64: 1, 4, 128>}]} {
    %c0 = arith.constant 0 : index
    %c0_0 = arith.constant 0 : index
    %c0_1 = arith.constant 0 : index
    %0 = vector.load %arg1[%c0, %c0_0, %c0_1] : memref<1x319x128xbf16, #tpu.memory_space<vmem>>, vector<1x319x128xbf16>
    %1 = vector.shape_cast %0 : vector<1x319x128xbf16> to vector<319x128xbf16>
    %c0_2 = arith.constant 0 : index
    %c0_3 = arith.constant 0 : index
    %c0_4 = arith.constant 0 : index
    %2 = vector.load %arg2[%c0_2, %c0_3, %c0_4] : memref<7x384x128xbf16, #tpu.memory_space<vmem>>, vector<1x128x128xbf16>
    %3 = vector.shape_cast %2 : vector<1x128x128xbf16> to vector<128x128xbf16>
    %cst = arith.constant dense<0.000000e+00> : vector<319x128xf32>
    %4 = tpu.matmul %1, %3, %cst {dimension_numbers = #tpu.dot_dimension_numbers<[1], [0], [0], [1], [0, 0, 1, 1], [], []>} : vector<319x128xbf16>, vector<128x128xbf16>, vector<319x128xf32> -> vector<319x128xf32>
    %c0_5 = arith.constant 0 : index
    %c0_6 = arith.constant 0 : index
    %5 = vector.load %arg3[%c0_5, %c0_6] : memref<7x128xf32, #tpu.memory_space<vmem>>, vector<1x128xf32>
    %6 = vector.broadcast %5 : vector<1x128xf32> to vector<319x128xf32>
    %7 = arith.addf %4, %6 : vector<319x128xf32>
    %cst_7 = arith.constant dense<0.000000e+00> : vector<128xf32>
    %8 = vector.multi_reduction <add>, %7, %cst_7 [0] : vector<319x128xf32> to vector<128xf32>
    %9 = vector.shape_cast %8 : vector<128xf32> to vector<1x128xf32>
    %10 = arith.mulf %7, %7 : vector<319x128xf32>
    %cst_8 = arith.constant dense<0.000000e+00> : vector<128xf32>
    %11 = vector.multi_reduction <add>, %10, %cst_8 [0] : vector<319x128xf32> to vector<128xf32>
    %12 = vector.shape_cast %11 : vector<128xf32> to vector<1x128xf32>
    %cst_9 = arith.constant 0.00313479616 : f32
    %13 = vector.broadcast %cst_9 : f32 to vector<1x128xf32>
    %14 = arith.mulf %9, %13 : vector<1x128xf32>
    %cst_10 = arith.constant 0.00313479616 : f32
    %15 = vector.broadcast %cst_10 : f32 to vector<1x128xf32>
    %16 = arith.mulf %12, %15 : vector<1x128xf32>
    %17 = arith.mulf %14, %14 : vector<1x128xf32>
    %18 = arith.subf %16, %17 : vector<1x128xf32>
    %19 = vector.broadcast %14 : vector<1x128xf32> to vector<319x128xf32>
    %20 = arith.subf %7, %19 : vector<319x128xf32>
    %cst_11 = arith.constant 9.99999974E-6 : f32
    %21 = vector.broadcast %cst_11 : f32 to vector<1x128xf32>
    %22 = arith.addf %18, %21 : vector<1x128xf32>
    %23 = math.rsqrt %22 : vector<1x128xf32>
    %24 = vector.broadcast %23 : vector<1x128xf32> to vector<319x128xf32>
    %25 = arith.mulf %20, %24 : vector<319x128xf32>
    %c0_12 = arith.constant 0 : index
    %c0_13 = arith.constant 0 : index
    %26 = vector.load %arg4[%c0_12, %c0_13] : memref<2x128xf32, #tpu.memory_space<vmem>>, vector<1x128xf32>
    %27 = vector.broadcast %26 : vector<1x128xf32> to vector<319x128xf32>
    %28 = arith.mulf %25, %27 : vector<319x128xf32>
    %c1 = arith.constant 1 : index
    %c0_14 = arith.constant 0 : index
    %29 = vector.load %arg4[%c1, %c0_14] : memref<2x128xf32, #tpu.memory_space<vmem>>, vector<1x128xf32>
    %30 = vector.broadcast %29 : vector<1x128xf32> to vector<319x128xf32>
    %31 = arith.addf %28, %30 : vector<319x128xf32>
    %32 = arith.mulf %31, %31 : vector<319x128xf32>
    %33 = arith.mulf %31, %32 : vector<319x128xf32>
    %cst_15 = arith.constant 4.471500e-02 : f32
    %34 = vector.broadcast %cst_15 : f32 to vector<319x128xf32>
    %35 = arith.mulf %34, %33 : vector<319x128xf32>
    %36 = arith.addf %31, %35 : vector<319x128xf32>
    %cst_16 = arith.constant 0.797884583 : f32
    %37 = vector.broadcast %cst_16 : f32 to vector<319x128xf32>
    %38 = arith.mulf %37, %36 : vector<319x128xf32>
    %39 = math.tanh %38 : vector<319x128xf32>
    %cst_17 = arith.constant 1.000000e+00 : f32
    %40 = vector.broadcast %cst_17 : f32 to vector<319x128xf32>
    %41 = arith.addf %40, %39 : vector<319x128xf32>
    %cst_18 = arith.constant 5.000000e-01 : f32
    %42 = vector.broadcast %cst_18 : f32 to vector<319x128xf32>
    %43 = arith.mulf %42, %41 : vector<319x128xf32>
    %44 = arith.mulf %31, %43 : vector<319x128xf32>
    %cst_19 = arith.constant dense<0.000000e+00> : vector<128xf32>
    %45 = vector.multi_reduction <add>, %44, %cst_19 [0] : vector<319x128xf32> to vector<128xf32>
    %46 = vector.shape_cast %45 : vector<128xf32> to vector<1x128xf32>
    %cst_20 = arith.constant 0.00313479616 : f32
    %47 = vector.broadcast %cst_20 : f32 to vector<1x128xf32>
    %48 = arith.mulf %46, %47 : vector<1x128xf32>
    %49 = arith.truncf %48 : vector<1x128xf32> to vector<1x128xbf16>
    %c0_21 = arith.constant 0 : index
    %c0_22 = arith.constant 0 : index
    %c0_23 = arith.constant 0 : index
    %50 = vector.load %arg5[%c0_21, %c0_22, %c0_23] : memref<7x128x128xbf16, #tpu.memory_space<vmem>>, vector<1x128x128xbf16>
    %51 = vector.shape_cast %50 : vector<1x128x128xbf16> to vector<128x128xbf16>
    %cst_24 = arith.constant dense<0.000000e+00> : vector<1x128xf32>
    %52 = tpu.matmul %49, %51, %cst_24 {dimension_numbers = #tpu.dot_dimension_numbers<[1], [0], [0], [1], [0, 0, 1, 1], [], []>} : vector<1x128xbf16>, vector<128x128xbf16>, vector<1x128xf32> -> vector<1x128xf32>
    %c0_25 = arith.constant 0 : index
    %c0_26 = arith.constant 0 : index
    %53 = vector.load %arg6[%c0_25, %c0_26] : memref<7x128xf32, #tpu.memory_space<vmem>>, vector<1x128xf32>
    %54 = arith.addf %52, %53 : vector<1x128xf32>
    %cst_27 = arith.constant 0.000000e+00 : f32
    %55 = vector.broadcast %cst_27 : f32 to vector<1x128xf32>
    %56 = arith.maximumf %54, %55 : vector<1x128xf32>
    %57 = arith.truncf %56 : vector<1x128xf32> to vector<1x128xbf16>
    %c0_28 = arith.constant 0 : index
    %c0_29 = arith.constant 0 : index
    %c0_30 = arith.constant 0 : index
    %58 = vector.load %arg7[%c0_28, %c0_29, %c0_30] : memref<7x128x128xbf16, #tpu.memory_space<vmem>>, vector<1x128x128xbf16>
    %59 = vector.shape_cast %58 : vector<1x128x128xbf16> to vector<128x128xbf16>
    %cst_31 = arith.constant dense<0.000000e+00> : vector<1x128xf32>
    %60 = tpu.matmul %57, %59, %cst_31 {dimension_numbers = #tpu.dot_dimension_numbers<[1], [0], [0], [1], [0, 0, 1, 1], [], []>} : vector<1x128xbf16>, vector<128x128xbf16>, vector<1x128xf32> -> vector<1x128xf32>
    %c0_32 = arith.constant 0 : index
    %c0_33 = arith.constant 0 : index
    %61 = vector.load %arg8[%c0_32, %c0_33] : memref<7x128xf32, #tpu.memory_space<vmem>>, vector<1x128xf32>
    %62 = arith.addf %60, %61 : vector<1x128xf32>
    %63 = arith.negf %62 : vector<1x128xf32>
    %64 = math.exp %63 : vector<1x128xf32>
    %cst_34 = arith.constant 1.000000e+00 : f32
    %65 = vector.broadcast %cst_34 : f32 to vector<1x128xf32>
    %66 = arith.addf %65, %64 : vector<1x128xf32>
    %67 = arith.divf %65, %66 : vector<1x128xf32>
    %68 = vector.broadcast %67 : vector<1x128xf32> to vector<319x128xf32>
    %69 = arith.mulf %44, %68 : vector<319x128xf32>
    %c0_35 = arith.constant 0 : index
    %c0_36 = arith.constant 0 : index
    %70 = vector.load %arg12[%c0_35, %c0_36] : memref<320x128xf32, #tpu.memory_space<vmem>>, vector<319x128xf32>
    tpu.vector_store %arg12[%c0_35, %c0_36], %69 {strides = array<i32>} : memref<320x128xf32, #tpu.memory_space<vmem>>, vector<319x128xf32>,
    %c0_37 = arith.constant 0 : index
    %c0_38 = arith.constant 0 : index
    %71 = tpu.strided_load %arg12[%c0_37, %c0_38] {strides = array<i32: 2, 1>} : memref<320x128xf32, #tpu.memory_space<vmem>>, vector<159x128xf32>
    %c1_39 = arith.constant 1 : index
    %c0_40 = arith.constant 0 : index
    %72 = tpu.strided_load %arg12[%c1_39, %c0_40] {strides = array<i32: 2, 1>} : memref<320x128xf32, #tpu.memory_space<vmem>>, vector<159x128xf32>
    %c2 = arith.constant 2 : index
    %c0_41 = arith.constant 0 : index
    %73 = tpu.strided_load %arg12[%c2, %c0_41] {strides = array<i32: 2, 1>} : memref<320x128xf32, #tpu.memory_space<vmem>>, vector<159x128xf32>
    %74 = tpu.concatenate %71, %72, %73 in 1 : vector<159x128xf32>, vector<159x128xf32>, vector<159x128xf32> -> vector<159x384xf32>
    %75 = arith.truncf %74 : vector<159x384xf32> to vector<159x384xbf16>
    %c1_42 = arith.constant 1 : index
    %c0_43 = arith.constant 0 : index
    %c0_44 = arith.constant 0 : index
    %76 = vector.load %arg2[%c1_42, %c0_43, %c0_44] : memref<7x384x128xbf16, #tpu.memory_space<vmem>>, vector<1x384x128xbf16>
    %77 = vector.shape_cast %76 : vector<1x384x128xbf16> to vector<384x128xbf16>
    %cst_45 = arith.constant dense<0.000000e+00> : vector<159x128xf32>
    %78 = tpu.matmul %75, %77, %cst_45 {dimension_numbers = #tpu.dot_dimension_numbers<[1], [0], [0], [1], [0, 0, 1, 1], [], []>} : vector<159x384xbf16>, vector<384x128xbf16>, vector<159x128xf32> -> vector<159x128xf32>
    %c1_46 = arith.constant 1 : index
    %c0_47 = arith.constant 0 : index
    %79 = vector.load %arg3[%c1_46, %c0_47] : memref<7x128xf32, #tpu.memory_space<vmem>>, vector<1x128xf32>
    %80 = vector.broadcast %79 : vector<1x128xf32> to vector<159x128xf32>
    %81 = arith.addf %78, %80 : vector<159x128xf32>
    %82 = arith.mulf %81, %81 : vector<159x128xf32>
    %83 = arith.mulf %81, %82 : vector<159x128xf32>
    %cst_48 = arith.constant 4.471500e-02 : f32
    %84 = vector.broadcast %cst_48 : f32 to vector<159x128xf32>
    %85 = arith.mulf %84, %83 : vector<159x128xf32>
    %86 = arith.addf %81, %85 : vector<159x128xf32>
    %cst_49 = arith.constant 0.797884583 : f32
    %87 = vector.broadcast %cst_49 : f32 to vector<159x128xf32>
    %88 = arith.mulf %87, %86 : vector<159x128xf32>
    %89 = math.tanh %88 : vector<159x128xf32>
    %cst_50 = arith.constant 1.000000e+00 : f32
    %90 = vector.broadcast %cst_50 : f32 to vector<159x128xf32>
    %91 = arith.addf %90, %89 : vector<159x128xf32>
    %cst_51 = arith.constant 5.000000e-01 : f32
    %92 = vector.broadcast %cst_51 : f32 to vector<159x128xf32>
    %93 = arith.mulf %92, %91 : vector<159x128xf32>
    %94 = arith.mulf %81, %93 : vector<159x128xf32>
    %cst_52 = arith.constant dense<0.000000e+00> : vector<128xf32>
    %95 = vector.multi_reduction <add>, %94, %cst_52 [0] : vector<159x128xf32> to vector<128xf32>
    %96 = vector.shape_cast %95 : vector<128xf32> to vector<1x128xf32>
    %cst_53 = arith.constant 0.00628930796 : f32
    %97 = vector.broadcast %cst_53 : f32 to vector<1x128xf32>
    %98 = arith.mulf %96, %97 : vector<1x128xf32>
    %99 = arith.truncf %98 : vector<1x128xf32> to vector<1x128xbf16>
    %c1_54 = arith.constant 1 : index
    %c0_55 = arith.constant 0 : index
    %c0_56 = arith.constant 0 : index
    %100 = vector.load %arg5[%c1_54, %c0_55, %c0_56] : memref<7x128x128xbf16, #tpu.memory_space<vmem>>, vector<1x128x128xbf16>
    %101 = vector.shape_cast %100 : vector<1x128x128xbf16> to vector<128x128xbf16>
    %cst_57 = arith.constant dense<0.000000e+00> : vector<1x128xf32>
    %102 = tpu.matmul %99, %101, %cst_57 {dimension_numbers = #tpu.dot_dimension_numbers<[1], [0], [0], [1], [0, 0, 1, 1], [], []>} : vector<1x128xbf16>, vector<128x128xbf16>, vector<1x128xf32> -> vector<1x128xf32>
    %c1_58 = arith.constant 1 : index
    %c0_59 = arith.constant 0 : index
    %103 = vector.load %arg6[%c1_58, %c0_59] : memref<7x128xf32, #tpu.memory_space<vmem>>, vector<1x128xf32>
    %104 = arith.addf %102, %103 : vector<1x128xf32>
    %cst_60 = arith.constant 0.000000e+00 : f32
    %105 = vector.broadcast %cst_60 : f32 to vector<1x128xf32>
    %106 = arith.maximumf %104, %105 : vector<1x128xf32>
    %107 = arith.truncf %106 : vector<1x128xf32> to vector<1x128xbf16>
    %c1_61 = arith.constant 1 : index
    %c0_62 = arith.constant 0 : index
    %c0_63 = arith.constant 0 : index
    %108 = vector.load %arg7[%c1_61, %c0_62, %c0_63] : memref<7x128x128xbf16, #tpu.memory_space<vmem>>, vector<1x128x128xbf16>
    %109 = vector.shape_cast %108 : vector<1x128x128xbf16> to vector<128x128xbf16>
    %cst_64 = arith.constant dense<0.000000e+00> : vector<1x128xf32>
    %110 = tpu.matmul %107, %109, %cst_64 {dimension_numbers = #tpu.dot_dimension_numbers<[1], [0], [0], [1], [0, 0, 1, 1], [], []>} : vector<1x128xbf16>, vector<128x128xbf16>, vector<1x128xf32> -> vector<1x128xf32>
    %c1_65 = arith.constant 1 : index
    %c0_66 = arith.constant 0 : index
    %111 = vector.load %arg8[%c1_65, %c0_66] : memref<7x128xf32, #tpu.memory_space<vmem>>, vector<1x128xf32>
    %112 = arith.addf %110, %111 : vector<1x128xf32>
    %113 = arith.negf %112 : vector<1x128xf32>
    %114 = math.exp %113 : vector<1x128xf32>
    %cst_67 = arith.constant 1.000000e+00 : f32
    %115 = vector.broadcast %cst_67 : f32 to vector<1x128xf32>
    %116 = arith.addf %115, %114 : vector<1x128xf32>
    %117 = arith.divf %115, %116 : vector<1x128xf32>
    %118 = vector.broadcast %117 : vector<1x128xf32> to vector<159x128xf32>
    %119 = arith.mulf %94, %118 : vector<159x128xf32>
    %c0_68 = arith.constant 0 : index
    %c0_69 = arith.constant 0 : index
    %120 = vector.load %arg13[%c0_68, %c0_69] : memref<160x128xf32, #tpu.memory_space<vmem>>, vector<159x128xf32>
    tpu.vector_store %arg13[%c0_68, %c0_69], %119 {strides = array<i32>} : memref<160x128xf32, #tpu.memory_space<vmem>>, vector<159x128xf32>,
    %c0_70 = arith.constant 0 : index
    %c0_71 = arith.constant 0 : index
    %121 = tpu.strided_load %arg13[%c0_70, %c0_71] {strides = array<i32: 2, 1>} : memref<160x128xf32, #tpu.memory_space<vmem>>, vector<79x128xf32>
    %c1_72 = arith.constant 1 : index
    %c0_73 = arith.constant 0 : index
    %122 = tpu.strided_load %arg13[%c1_72, %c0_73] {strides = array<i32: 2, 1>} : memref<160x128xf32, #tpu.memory_space<vmem>>, vector<79x128xf32>
    %c2_74 = arith.constant 2 : index
    %c0_75 = arith.constant 0 : index
    %123 = tpu.strided_load %arg13[%c2_74, %c0_75] {strides = array<i32: 2, 1>} : memref<160x128xf32, #tpu.memory_space<vmem>>, vector<79x128xf32>
    %124 = tpu.concatenate %121, %122, %123 in 1 : vector<79x128xf32>, vector<79x128xf32>, vector<79x128xf32> -> vector<79x384xf32>
    %125 = arith.truncf %124 : vector<79x384xf32> to vector<79x384xbf16>
    %c2_76 = arith.constant 2 : index
    %c0_77 = arith.constant 0 : index
    %c0_78 = arith.constant 0 : index
    %126 = vector.load %arg2[%c2_76, %c0_77, %c0_78] : memref<7x384x128xbf16, #tpu.memory_space<vmem>>, vector<1x384x128xbf16>
    %127 = vector.shape_cast %126 : vector<1x384x128xbf16> to vector<384x128xbf16>
    %cst_79 = arith.constant dense<0.000000e+00> : vector<79x128xf32>
    %128 = tpu.matmul %125, %127, %cst_79 {dimension_numbers = #tpu.dot_dimension_numbers<[1], [0], [0], [1], [0, 0, 1, 1], [], []>} : vector<79x384xbf16>, vector<384x128xbf16>, vector<79x128xf32> -> vector<79x128xf32>
    %c2_80 = arith.constant 2 : index
    %c0_81 = arith.constant 0 : index
    %129 = vector.load %arg3[%c2_80, %c0_81] : memref<7x128xf32, #tpu.memory_space<vmem>>, vector<1x128xf32>
    %130 = vector.broadcast %129 : vector<1x128xf32> to vector<79x128xf32>
    %131 = arith.addf %128, %130 : vector<79x128xf32>
    %132 = arith.mulf %131, %131 : vector<79x128xf32>
    %133 = arith.mulf %131, %132 : vector<79x128xf32>
    %cst_82 = arith.constant 4.471500e-02 : f32
    %134 = vector.broadcast %cst_82 : f32 to vector<79x128xf32>
    %135 = arith.mulf %134, %133 : vector<79x128xf32>
    %136 = arith.addf %131, %135 : vector<79x128xf32>
    %cst_83 = arith.constant 0.797884583 : f32
    %137 = vector.broadcast %cst_83 : f32 to vector<79x128xf32>
    %138 = arith.mulf %137, %136 : vector<79x128xf32>
    %139 = math.tanh %138 : vector<79x128xf32>
    %cst_84 = arith.constant 1.000000e+00 : f32
    %140 = vector.broadcast %cst_84 : f32 to vector<79x128xf32>
    %141 = arith.addf %140, %139 : vector<79x128xf32>
    %cst_85 = arith.constant 5.000000e-01 : f32
    %142 = vector.broadcast %cst_85 : f32 to vector<79x128xf32>
    %143 = arith.mulf %142, %141 : vector<79x128xf32>
    %144 = arith.mulf %131, %143 : vector<79x128xf32>
    %cst_86 = arith.constant dense<0.000000e+00> : vector<128xf32>
    %145 = vector.multi_reduction <add>, %144, %cst_86 [0] : vector<79x128xf32> to vector<128xf32>
    %146 = vector.shape_cast %145 : vector<128xf32> to vector<1x128xf32>
    %cst_87 = arith.constant 0.0126582282 : f32
    %147 = vector.broadcast %cst_87 : f32 to vector<1x128xf32>
    %148 = arith.mulf %146, %147 : vector<1x128xf32>
    %149 = arith.truncf %148 : vector<1x128xf32> to vector<1x128xbf16>
    %c2_88 = arith.constant 2 : index
    %c0_89 = arith.constant 0 : index
    %c0_90 = arith.constant 0 : index
    %150 = vector.load %arg5[%c2_88, %c0_89, %c0_90] : memref<7x128x128xbf16, #tpu.memory_space<vmem>>, vector<1x128x128xbf16>
    %151 = vector.shape_cast %150 : vector<1x128x128xbf16> to vector<128x128xbf16>
    %cst_91 = arith.constant dense<0.000000e+00> : vector<1x128xf32>
    %152 = tpu.matmul %149, %151, %cst_91 {dimension_numbers = #tpu.dot_dimension_numbers<[1], [0], [0], [1], [0, 0, 1, 1], [], []>} : vector<1x128xbf16>, vector<128x128xbf16>, vector<1x128xf32> -> vector<1x128xf32>
    %c2_92 = arith.constant 2 : index
    %c0_93 = arith.constant 0 : index
    %153 = vector.load %arg6[%c2_92, %c0_93] : memref<7x128xf32, #tpu.memory_space<vmem>>, vector<1x128xf32>
    %154 = arith.addf %152, %153 : vector<1x128xf32>
    %cst_94 = arith.constant 0.000000e+00 : f32
    %155 = vector.broadcast %cst_94 : f32 to vector<1x128xf32>
    %156 = arith.maximumf %154, %155 : vector<1x128xf32>
    %157 = arith.truncf %156 : vector<1x128xf32> to vector<1x128xbf16>
    %c2_95 = arith.constant 2 : index
    %c0_96 = arith.constant 0 : index
    %c0_97 = arith.constant 0 : index
    %158 = vector.load %arg7[%c2_95, %c0_96, %c0_97] : memref<7x128x128xbf16, #tpu.memory_space<vmem>>, vector<1x128x128xbf16>
    %159 = vector.shape_cast %158 : vector<1x128x128xbf16> to vector<128x128xbf16>
    %cst_98 = arith.constant dense<0.000000e+00> : vector<1x128xf32>
    %160 = tpu.matmul %157, %159, %cst_98 {dimension_numbers = #tpu.dot_dimension_numbers<[1], [0], [0], [1], [0, 0, 1, 1], [], []>} : vector<1x128xbf16>, vector<128x128xbf16>, vector<1x128xf32> -> vector<1x128xf32>
    %c2_99 = arith.constant 2 : index
    %c0_100 = arith.constant 0 : index
    %161 = vector.load %arg8[%c2_99, %c0_100] : memref<7x128xf32, #tpu.memory_space<vmem>>, vector<1x128xf32>
    %162 = arith.addf %160, %161 : vector<1x128xf32>
    %163 = arith.negf %162 : vector<1x128xf32>
    %164 = math.exp %163 : vector<1x128xf32>
    %cst_101 = arith.constant 1.000000e+00 : f32
    %165 = vector.broadcast %cst_101 : f32 to vector<1x128xf32>
    %166 = arith.addf %165, %164 : vector<1x128xf32>
    %167 = arith.divf %165, %166 : vector<1x128xf32>
    %168 = vector.broadcast %167 : vector<1x128xf32> to vector<79x128xf32>
    %169 = arith.mulf %144, %168 : vector<79x128xf32>
    %c0_102 = arith.constant 0 : index
    %c0_103 = arith.constant 0 : index
    %170 = vector.load %arg12[%c0_102, %c0_103] : memref<320x128xf32, #tpu.memory_space<vmem>>, vector<79x128xf32>
    tpu.vector_store %arg12[%c0_102, %c0_103], %169 {strides = array<i32>} : memref<320x128xf32, #tpu.memory_space<vmem>>, vector<79x128xf32>,
    %c0_104 = arith.constant 0 : index
    %c0_105 = arith.constant 0 : index
    %171 = tpu.strided_load %arg12[%c0_104, %c0_105] {strides = array<i32: 2, 1>} : memref<320x128xf32, #tpu.memory_space<vmem>>, vector<39x128xf32>
    %c1_106 = arith.constant 1 : index
    %c0_107 = arith.constant 0 : index
    %172 = tpu.strided_load %arg12[%c1_106, %c0_107] {strides = array<i32: 2, 1>} : memref<320x128xf32, #tpu.memory_space<vmem>>, vector<39x128xf32>
    %c2_108 = arith.constant 2 : index
    %c0_109 = arith.constant 0 : index
    %173 = tpu.strided_load %arg12[%c2_108, %c0_109] {strides = array<i32: 2, 1>} : memref<320x128xf32, #tpu.memory_space<vmem>>, vector<39x128xf32>
    %174 = tpu.concatenate %171, %172, %173 in 1 : vector<39x128xf32>, vector<39x128xf32>, vector<39x128xf32> -> vector<39x384xf32>
    %175 = arith.truncf %174 : vector<39x384xf32> to vector<39x384xbf16>
    %c3 = arith.constant 3 : index
    %c0_110 = arith.constant 0 : index
    %c0_111 = arith.constant 0 : index
    %176 = vector.load %arg2[%c3, %c0_110, %c0_111] : memref<7x384x128xbf16, #tpu.memory_space<vmem>>, vector<1x384x128xbf16>
    %177 = vector.shape_cast %176 : vector<1x384x128xbf16> to vector<384x128xbf16>
    %cst_112 = arith.constant dense<0.000000e+00> : vector<39x128xf32>
    %178 = tpu.matmul %175, %177, %cst_112 {dimension_numbers = #tpu.dot_dimension_numbers<[1], [0], [0], [1], [0, 0, 1, 1], [], []>} : vector<39x384xbf16>, vector<384x128xbf16>, vector<39x128xf32> -> vector<39x128xf32>
    %c3_113 = arith.constant 3 : index
    %c0_114 = arith.constant 0 : index
    %179 = vector.load %arg3[%c3_113, %c0_114] : memref<7x128xf32, #tpu.memory_space<vmem>>, vector<1x128xf32>
    %180 = vector.broadcast %179 : vector<1x128xf32> to vector<39x128xf32>
    %181 = arith.addf %178, %180 : vector<39x128xf32>
    %182 = arith.mulf %181, %181 : vector<39x128xf32>
    %183 = arith.mulf %181, %182 : vector<39x128xf32>
    %cst_115 = arith.constant 4.471500e-02 : f32
    %184 = vector.broadcast %cst_115 : f32 to vector<39x128xf32>
    %185 = arith.mulf %184, %183 : vector<39x128xf32>
    %186 = arith.addf %181, %185 : vector<39x128xf32>
    %cst_116 = arith.constant 0.797884583 : f32
    %187 = vector.broadcast %cst_116 : f32 to vector<39x128xf32>
    %188 = arith.mulf %187, %186 : vector<39x128xf32>
    %189 = math.tanh %188 : vector<39x128xf32>
    %cst_117 = arith.constant 1.000000e+00 : f32
    %190 = vector.broadcast %cst_117 : f32 to vector<39x128xf32>
    %191 = arith.addf %190, %189 : vector<39x128xf32>
    %cst_118 = arith.constant 5.000000e-01 : f32
    %192 = vector.broadcast %cst_118 : f32 to vector<39x128xf32>
    %193 = arith.mulf %192, %191 : vector<39x128xf32>
    %194 = arith.mulf %181, %193 : vector<39x128xf32>
    %cst_119 = arith.constant dense<0.000000e+00> : vector<128xf32>
    %195 = vector.multi_reduction <add>, %194, %cst_119 [0] : vector<39x128xf32> to vector<128xf32>
    %196 = vector.shape_cast %195 : vector<128xf32> to vector<1x128xf32>
    %cst_120 = arith.constant 0.025641026 : f32
    %197 = vector.broadcast %cst_120 : f32 to vector<1x128xf32>
    %198 = arith.mulf %196, %197 : vector<1x128xf32>
    %199 = arith.truncf %198 : vector<1x128xf32> to vector<1x128xbf16>
    %c3_121 = arith.constant 3 : index
    %c0_122 = arith.constant 0 : index
    %c0_123 = arith.constant 0 : index
    %200 = vector.load %arg5[%c3_121, %c0_122, %c0_123] : memref<7x128x128xbf16, #tpu.memory_space<vmem>>, vector<1x128x128xbf16>
    %201 = vector.shape_cast %200 : vector<1x128x128xbf16> to vector<128x128xbf16>
    %cst_124 = arith.constant dense<0.000000e+00> : vector<1x128xf32>
    %202 = tpu.matmul %199, %201, %cst_124 {dimension_numbers = #tpu.dot_dimension_numbers<[1], [0], [0], [1], [0, 0, 1, 1], [], []>} : vector<1x128xbf16>, vector<128x128xbf16>, vector<1x128xf32> -> vector<1x128xf32>
    %c3_125 = arith.constant 3 : index
    %c0_126 = arith.constant 0 : index
    %203 = vector.load %arg6[%c3_125, %c0_126] : memref<7x128xf32, #tpu.memory_space<vmem>>, vector<1x128xf32>
    %204 = arith.addf %202, %203 : vector<1x128xf32>
    %cst_127 = arith.constant 0.000000e+00 : f32
    %205 = vector.broadcast %cst_127 : f32 to vector<1x128xf32>
    %206 = arith.maximumf %204, %205 : vector<1x128xf32>
    %207 = arith.truncf %206 : vector<1x128xf32> to vector<1x128xbf16>
    %c3_128 = arith.constant 3 : index
    %c0_129 = arith.constant 0 : index
    %c0_130 = arith.constant 0 : index
    %208 = vector.load %arg7[%c3_128, %c0_129, %c0_130] : memref<7x128x128xbf16, #tpu.memory_space<vmem>>, vector<1x128x128xbf16>
    %209 = vector.shape_cast %208 : vector<1x128x128xbf16> to vector<128x128xbf16>
    %cst_131 = arith.constant dense<0.000000e+00> : vector<1x128xf32>
    %210 = tpu.matmul %207, %209, %cst_131 {dimension_numbers = #tpu.dot_dimension_numbers<[1], [0], [0], [1], [0, 0, 1, 1], [], []>} : vector<1x128xbf16>, vector<128x128xbf16>, vector<1x128xf32> -> vector<1x128xf32>
    %c3_132 = arith.constant 3 : index
    %c0_133 = arith.constant 0 : index
    %211 = vector.load %arg8[%c3_132, %c0_133] : memref<7x128xf32, #tpu.memory_space<vmem>>, vector<1x128xf32>
    %212 = arith.addf %210, %211 : vector<1x128xf32>
    %213 = arith.negf %212 : vector<1x128xf32>
    %214 = math.exp %213 : vector<1x128xf32>
    %cst_134 = arith.constant 1.000000e+00 : f32
    %215 = vector.broadcast %cst_134 : f32 to vector<1x128xf32>
    %216 = arith.addf %215, %214 : vector<1x128xf32>
    %217 = arith.divf %215, %216 : vector<1x128xf32>
    %218 = vector.broadcast %217 : vector<1x128xf32> to vector<39x128xf32>
    %219 = arith.mulf %194, %218 : vector<39x128xf32>
    %c0_135 = arith.constant 0 : index
    %c0_136 = arith.constant 0 : index
    %220 = vector.load %arg13[%c0_135, %c0_136] : memref<160x128xf32, #tpu.memory_space<vmem>>, vector<39x128xf32>
    tpu.vector_store %arg13[%c0_135, %c0_136], %219 {strides = array<i32>} : memref<160x128xf32, #tpu.memory_space<vmem>>, vector<39x128xf32>,
    %c0_137 = arith.constant 0 : index
    %c0_138 = arith.constant 0 : index
    %221 = tpu.strided_load %arg13[%c0_137, %c0_138] {strides = array<i32: 2, 1>} : memref<160x128xf32, #tpu.memory_space<vmem>>, vector<19x128xf32>
    %c1_139 = arith.constant 1 : index
    %c0_140 = arith.constant 0 : index
    %222 = tpu.strided_load %arg13[%c1_139, %c0_140] {strides = array<i32: 2, 1>} : memref<160x128xf32, #tpu.memory_space<vmem>>, vector<19x128xf32>
    %c2_141 = arith.constant 2 : index
    %c0_142 = arith.constant 0 : index
    %223 = tpu.strided_load %arg13[%c2_141, %c0_142] {strides = array<i32: 2, 1>} : memref<160x128xf32, #tpu.memory_space<vmem>>, vector<19x128xf32>
    %224 = tpu.concatenate %221, %222, %223 in 1 : vector<19x128xf32>, vector<19x128xf32>, vector<19x128xf32> -> vector<19x384xf32>
    %225 = arith.truncf %224 : vector<19x384xf32> to vector<19x384xbf16>
    %c4 = arith.constant 4 : index
    %c0_143 = arith.constant 0 : index
    %c0_144 = arith.constant 0 : index
    %226 = vector.load %arg2[%c4, %c0_143, %c0_144] : memref<7x384x128xbf16, #tpu.memory_space<vmem>>, vector<1x384x128xbf16>
    %227 = vector.shape_cast %226 : vector<1x384x128xbf16> to vector<384x128xbf16>
    %cst_145 = arith.constant dense<0.000000e+00> : vector<19x128xf32>
    %228 = tpu.matmul %225, %227, %cst_145 {dimension_numbers = #tpu.dot_dimension_numbers<[1], [0], [0], [1], [0, 0, 1, 1], [], []>} : vector<19x384xbf16>, vector<384x128xbf16>, vector<19x128xf32> -> vector<19x128xf32>
    %c4_146 = arith.constant 4 : index
    %c0_147 = arith.constant 0 : index
    %229 = vector.load %arg3[%c4_146, %c0_147] : memref<7x128xf32, #tpu.memory_space<vmem>>, vector<1x128xf32>
    %230 = vector.broadcast %229 : vector<1x128xf32> to vector<19x128xf32>
    %231 = arith.addf %228, %230 : vector<19x128xf32>
    %232 = arith.mulf %231, %231 : vector<19x128xf32>
    %233 = arith.mulf %231, %232 : vector<19x128xf32>
    %cst_148 = arith.constant 4.471500e-02 : f32
    %234 = vector.broadcast %cst_148 : f32 to vector<19x128xf32>
    %235 = arith.mulf %234, %233 : vector<19x128xf32>
    %236 = arith.addf %231, %235 : vector<19x128xf32>
    %cst_149 = arith.constant 0.797884583 : f32
    %237 = vector.broadcast %cst_149 : f32 to vector<19x128xf32>
    %238 = arith.mulf %237, %236 : vector<19x128xf32>
    %239 = math.tanh %238 : vector<19x128xf32>
    %cst_150 = arith.constant 1.000000e+00 : f32
    %240 = vector.broadcast %cst_150 : f32 to vector<19x128xf32>
    %241 = arith.addf %240, %239 : vector<19x128xf32>
    %cst_151 = arith.constant 5.000000e-01 : f32
    %242 = vector.broadcast %cst_151 : f32 to vector<19x128xf32>
    %243 = arith.mulf %242, %241 : vector<19x128xf32>
    %244 = arith.mulf %231, %243 : vector<19x128xf32>
    %cst_152 = arith.constant dense<0.000000e+00> : vector<128xf32>
    %245 = vector.multi_reduction <add>, %244, %cst_152 [0] : vector<19x128xf32> to vector<128xf32>
    %246 = vector.shape_cast %245 : vector<128xf32> to vector<1x128xf32>
    %cst_153 = arith.constant 0.0526315793 : f32
    %247 = vector.broadcast %cst_153 : f32 to vector<1x128xf32>
    %248 = arith.mulf %246, %247 : vector<1x128xf32>
    %249 = arith.truncf %248 : vector<1x128xf32> to vector<1x128xbf16>
    %c4_154 = arith.constant 4 : index
    %c0_155 = arith.constant 0 : index
    %c0_156 = arith.constant 0 : index
    %250 = vector.load %arg5[%c4_154, %c0_155, %c0_156] : memref<7x128x128xbf16, #tpu.memory_space<vmem>>, vector<1x128x128xbf16>
    %251 = vector.shape_cast %250 : vector<1x128x128xbf16> to vector<128x128xbf16>
    %cst_157 = arith.constant dense<0.000000e+00> : vector<1x128xf32>
    %252 = tpu.matmul %249, %251, %cst_157 {dimension_numbers = #tpu.dot_dimension_numbers<[1], [0], [0], [1], [0, 0, 1, 1], [], []>} : vector<1x128xbf16>, vector<128x128xbf16>, vector<1x128xf32> -> vector<1x128xf32>
    %c4_158 = arith.constant 4 : index
    %c0_159 = arith.constant 0 : index
    %253 = vector.load %arg6[%c4_158, %c0_159] : memref<7x128xf32, #tpu.memory_space<vmem>>, vector<1x128xf32>
    %254 = arith.addf %252, %253 : vector<1x128xf32>
    %cst_160 = arith.constant 0.000000e+00 : f32
    %255 = vector.broadcast %cst_160 : f32 to vector<1x128xf32>
    %256 = arith.maximumf %254, %255 : vector<1x128xf32>
    %257 = arith.truncf %256 : vector<1x128xf32> to vector<1x128xbf16>
    %c4_161 = arith.constant 4 : index
    %c0_162 = arith.constant 0 : index
    %c0_163 = arith.constant 0 : index
    %258 = vector.load %arg7[%c4_161, %c0_162, %c0_163] : memref<7x128x128xbf16, #tpu.memory_space<vmem>>, vector<1x128x128xbf16>
    %259 = vector.shape_cast %258 : vector<1x128x128xbf16> to vector<128x128xbf16>
    %cst_164 = arith.constant dense<0.000000e+00> : vector<1x128xf32>
    %260 = tpu.matmul %257, %259, %cst_164 {dimension_numbers = #tpu.dot_dimension_numbers<[1], [0], [0], [1], [0, 0, 1, 1], [], []>} : vector<1x128xbf16>, vector<128x128xbf16>, vector<1x128xf32> -> vector<1x128xf32>
    %c4_165 = arith.constant 4 : index
    %c0_166 = arith.constant 0 : index
    %261 = vector.load %arg8[%c4_165, %c0_166] : memref<7x128xf32, #tpu.memory_space<vmem>>, vector<1x128xf32>
    %262 = arith.addf %260, %261 : vector<1x128xf32>
    %263 = arith.negf %262 : vector<1x128xf32>
    %264 = math.exp %263 : vector<1x128xf32>
    %cst_167 = arith.constant 1.000000e+00 : f32
    %265 = vector.broadcast %cst_167 : f32 to vector<1x128xf32>
    %266 = arith.addf %265, %264 : vector<1x128xf32>
    %267 = arith.divf %265, %266 : vector<1x128xf32>
    %268 = vector.broadcast %267 : vector<1x128xf32> to vector<19x128xf32>
    %269 = arith.mulf %244, %268 : vector<19x128xf32>
    %c0_168 = arith.constant 0 : index
    %c0_169 = arith.constant 0 : index
    %270 = vector.load %arg12[%c0_168, %c0_169] : memref<320x128xf32, #tpu.memory_space<vmem>>, vector<19x128xf32>
    tpu.vector_store %arg12[%c0_168, %c0_169], %269 {strides = array<i32>} : memref<320x128xf32, #tpu.memory_space<vmem>>, vector<19x128xf32>,
    %c0_170 = arith.constant 0 : index
    %c0_171 = arith.constant 0 : index
    %271 = tpu.strided_load %arg12[%c0_170, %c0_171] {strides = array<i32: 2, 1>} : memref<320x128xf32, #tpu.memory_space<vmem>>, vector<9x128xf32>
    %c1_172 = arith.constant 1 : index
    %c0_173 = arith.constant 0 : index
    %272 = tpu.strided_load %arg12[%c1_172, %c0_173] {strides = array<i32: 2, 1>} : memref<320x128xf32, #tpu.memory_space<vmem>>, vector<9x128xf32>
    %273 = tpu.concatenate %271, %272 in 1 : vector<9x128xf32>, vector<9x128xf32> -> vector<9x256xf32>
    %274 = arith.truncf %273 : vector<9x256xf32> to vector<9x256xbf16>
    %c5 = arith.constant 5 : index
    %c0_174 = arith.constant 0 : index
    %c0_175 = arith.constant 0 : index
    %275 = vector.load %arg2[%c5, %c0_174, %c0_175] : memref<7x384x128xbf16, #tpu.memory_space<vmem>>, vector<1x256x128xbf16>
    %276 = vector.shape_cast %275 : vector<1x256x128xbf16> to vector<256x128xbf16>
    %cst_176 = arith.constant dense<0.000000e+00> : vector<9x128xf32>
    %277 = tpu.matmul %274, %276, %cst_176 {dimension_numbers = #tpu.dot_dimension_numbers<[1], [0], [0], [1], [0, 0, 1, 1], [], []>} : vector<9x256xbf16>, vector<256x128xbf16>, vector<9x128xf32> -> vector<9x128xf32>
    %c5_177 = arith.constant 5 : index
    %c0_178 = arith.constant 0 : index
    %278 = vector.load %arg3[%c5_177, %c0_178] : memref<7x128xf32, #tpu.memory_space<vmem>>, vector<1x128xf32>
    %279 = vector.broadcast %278 : vector<1x128xf32> to vector<9x128xf32>
    %280 = arith.addf %277, %279 : vector<9x128xf32>
    %281 = arith.mulf %280, %280 : vector<9x128xf32>
    %282 = arith.mulf %280, %281 : vector<9x128xf32>
    %cst_179 = arith.constant 4.471500e-02 : f32
    %283 = vector.broadcast %cst_179 : f32 to vector<9x128xf32>
    %284 = arith.mulf %283, %282 : vector<9x128xf32>
    %285 = arith.addf %280, %284 : vector<9x128xf32>
    %cst_180 = arith.constant 0.797884583 : f32
    %286 = vector.broadcast %cst_180 : f32 to vector<9x128xf32>
    %287 = arith.mulf %286, %285 : vector<9x128xf32>
    %288 = math.tanh %287 : vector<9x128xf32>
    %cst_181 = arith.constant 1.000000e+00 : f32
    %289 = vector.broadcast %cst_181 : f32 to vector<9x128xf32>
    %290 = arith.addf %289, %288 : vector<9x128xf32>
    %cst_182 = arith.constant 5.000000e-01 : f32
    %291 = vector.broadcast %cst_182 : f32 to vector<9x128xf32>
    %292 = arith.mulf %291, %290 : vector<9x128xf32>
    %293 = arith.mulf %280, %292 : vector<9x128xf32>
    %cst_183 = arith.constant dense<0.000000e+00> : vector<128xf32>
    %294 = vector.multi_reduction <add>, %293, %cst_183 [0] : vector<9x128xf32> to vector<128xf32>
    %295 = vector.shape_cast %294 : vector<128xf32> to vector<1x128xf32>
    %cst_184 = arith.constant 0.111111112 : f32
    %296 = vector.broadcast %cst_184 : f32 to vector<1x128xf32>
    %297 = arith.mulf %295, %296 : vector<1x128xf32>
    %298 = arith.truncf %297 : vector<1x128xf32> to vector<1x128xbf16>
    %c5_185 = arith.constant 5 : index
    %c0_186 = arith.constant 0 : index
    %c0_187 = arith.constant 0 : index
    %299 = vector.load %arg5[%c5_185, %c0_186, %c0_187] : memref<7x128x128xbf16, #tpu.memory_space<vmem>>, vector<1x128x128xbf16>
    %300 = vector.shape_cast %299 : vector<1x128x128xbf16> to vector<128x128xbf16>
    %cst_188 = arith.constant dense<0.000000e+00> : vector<1x128xf32>
    %301 = tpu.matmul %298, %300, %cst_188 {dimension_numbers = #tpu.dot_dimension_numbers<[1], [0], [0], [1], [0, 0, 1, 1], [], []>} : vector<1x128xbf16>, vector<128x128xbf16>, vector<1x128xf32> -> vector<1x128xf32>
    %c5_189 = arith.constant 5 : index
    %c0_190 = arith.constant 0 : index
    %302 = vector.load %arg6[%c5_189, %c0_190] : memref<7x128xf32, #tpu.memory_space<vmem>>, vector<1x128xf32>
    %303 = arith.addf %301, %302 : vector<1x128xf32>
    %cst_191 = arith.constant 0.000000e+00 : f32
    %304 = vector.broadcast %cst_191 : f32 to vector<1x128xf32>
    %305 = arith.maximumf %303, %304 : vector<1x128xf32>
    %306 = arith.truncf %305 : vector<1x128xf32> to vector<1x128xbf16>
    %c5_192 = arith.constant 5 : index
    %c0_193 = arith.constant 0 : index
    %c0_194 = arith.constant 0 : index
    %307 = vector.load %arg7[%c5_192, %c0_193, %c0_194] : memref<7x128x128xbf16, #tpu.memory_space<vmem>>, vector<1x128x128xbf16>
    %308 = vector.shape_cast %307 : vector<1x128x128xbf16> to vector<128x128xbf16>
    %cst_195 = arith.constant dense<0.000000e+00> : vector<1x128xf32>
    %309 = tpu.matmul %306, %308, %cst_195 {dimension_numbers = #tpu.dot_dimension_numbers<[1], [0], [0], [1], [0, 0, 1, 1], [], []>} : vector<1x128xbf16>, vector<128x128xbf16>, vector<1x128xf32> -> vector<1x128xf32>
    %c5_196 = arith.constant 5 : index
    %c0_197 = arith.constant 0 : index
    %310 = vector.load %arg8[%c5_196, %c0_197] : memref<7x128xf32, #tpu.memory_space<vmem>>, vector<1x128xf32>
    %311 = arith.addf %309, %310 : vector<1x128xf32>
    %312 = arith.negf %311 : vector<1x128xf32>
    %313 = math.exp %312 : vector<1x128xf32>
    %cst_198 = arith.constant 1.000000e+00 : f32
    %314 = vector.broadcast %cst_198 : f32 to vector<1x128xf32>
    %315 = arith.addf %314, %313 : vector<1x128xf32>
    %316 = arith.divf %314, %315 : vector<1x128xf32>
    %317 = vector.broadcast %316 : vector<1x128xf32> to vector<9x128xf32>
    %318 = arith.mulf %293, %317 : vector<9x128xf32>
    %c0_199 = arith.constant 0 : index
    %c0_200 = arith.constant 0 : index
    %319 = vector.load %arg13[%c0_199, %c0_200] : memref<160x128xf32, #tpu.memory_space<vmem>>, vector<9x128xf32>
    tpu.vector_store %arg13[%c0_199, %c0_200], %318 {strides = array<i32>} : memref<160x128xf32, #tpu.memory_space<vmem>>, vector<9x128xf32>,
    %c0_201 = arith.constant 0 : index
    %c0_202 = arith.constant 0 : index
    %320 = tpu.strided_load %arg13[%c0_201, %c0_202] {strides = array<i32: 2, 1>} : memref<160x128xf32, #tpu.memory_space<vmem>>, vector<4x128xf32>
    %c1_203 = arith.constant 1 : index
    %c0_204 = arith.constant 0 : index
    %321 = tpu.strided_load %arg13[%c1_203, %c0_204] {strides = array<i32: 2, 1>} : memref<160x128xf32, #tpu.memory_space<vmem>>, vector<4x128xf32>
    %322 = tpu.concatenate %320, %321 in 1 : vector<4x128xf32>, vector<4x128xf32> -> vector<4x256xf32>
    %323 = arith.truncf %322 : vector<4x256xf32> to vector<4x256xbf16>
    %c6 = arith.constant 6 : index
    %c0_205 = arith.constant 0 : index
    %c0_206 = arith.constant 0 : index
    %324 = vector.load %arg2[%c6, %c0_205, %c0_206] : memref<7x384x128xbf16, #tpu.memory_space<vmem>>, vector<1x256x128xbf16>
    %325 = vector.shape_cast %324 : vector<1x256x128xbf16> to vector<256x128xbf16>
    %cst_207 = arith.constant dense<0.000000e+00> : vector<4x128xf32>
    %326 = tpu.matmul %323, %325, %cst_207 {dimension_numbers = #tpu.dot_dimension_numbers<[1], [0], [0], [1], [0, 0, 1, 1], [], []>} : vector<4x256xbf16>, vector<256x128xbf16>, vector<4x128xf32> -> vector<4x128xf32>
    %c6_208 = arith.constant 6 : index
    %c0_209 = arith.constant 0 : index
    %327 = vector.load %arg3[%c6_208, %c0_209] : memref<7x128xf32, #tpu.memory_space<vmem>>, vector<1x128xf32>
    %328 = vector.broadcast %327 : vector<1x128xf32> to vector<4x128xf32>
    %329 = arith.addf %326, %328 : vector<4x128xf32>
    %330 = arith.mulf %329, %329 : vector<4x128xf32>
    %331 = arith.mulf %329, %330 : vector<4x128xf32>
    %cst_210 = arith.constant 4.471500e-02 : f32
    %332 = vector.broadcast %cst_210 : f32 to vector<4x128xf32>
    %333 = arith.mulf %332, %331 : vector<4x128xf32>
    %334 = arith.addf %329, %333 : vector<4x128xf32>
    %cst_211 = arith.constant 0.797884583 : f32
    %335 = vector.broadcast %cst_211 : f32 to vector<4x128xf32>
    %336 = arith.mulf %335, %334 : vector<4x128xf32>
    %337 = math.tanh %336 : vector<4x128xf32>
    %cst_212 = arith.constant 1.000000e+00 : f32
    %338 = vector.broadcast %cst_212 : f32 to vector<4x128xf32>
    %339 = arith.addf %338, %337 : vector<4x128xf32>
    %cst_213 = arith.constant 5.000000e-01 : f32
    %340 = vector.broadcast %cst_213 : f32 to vector<4x128xf32>
    %341 = arith.mulf %340, %339 : vector<4x128xf32>
    %342 = arith.mulf %329, %341 : vector<4x128xf32>
    %cst_214 = arith.constant dense<0.000000e+00> : vector<128xf32>
    %343 = vector.multi_reduction <add>, %342, %cst_214 [0] : vector<4x128xf32> to vector<128xf32>
    %344 = vector.shape_cast %343 : vector<128xf32> to vector<1x128xf32>
    %cst_215 = arith.constant 2.500000e-01 : f32
    %345 = vector.broadcast %cst_215 : f32 to vector<1x128xf32>
    %346 = arith.mulf %344, %345 : vector<1x128xf32>
    %347 = arith.truncf %346 : vector<1x128xf32> to vector<1x128xbf16>
    %c6_216 = arith.constant 6 : index
    %c0_217 = arith.constant 0 : index
    %c0_218 = arith.constant 0 : index
    %348 = vector.load %arg5[%c6_216, %c0_217, %c0_218] : memref<7x128x128xbf16, #tpu.memory_space<vmem>>, vector<1x128x128xbf16>
    %349 = vector.shape_cast %348 : vector<1x128x128xbf16> to vector<128x128xbf16>
    %cst_219 = arith.constant dense<0.000000e+00> : vector<1x128xf32>
    %350 = tpu.matmul %347, %349, %cst_219 {dimension_numbers = #tpu.dot_dimension_numbers<[1], [0], [0], [1], [0, 0, 1, 1], [], []>} : vector<1x128xbf16>, vector<128x128xbf16>, vector<1x128xf32> -> vector<1x128xf32>
    %c6_220 = arith.constant 6 : index
    %c0_221 = arith.constant 0 : index
    %351 = vector.load %arg6[%c6_220, %c0_221] : memref<7x128xf32, #tpu.memory_space<vmem>>, vector<1x128xf32>
    %352 = arith.addf %350, %351 : vector<1x128xf32>
    %cst_222 = arith.constant 0.000000e+00 : f32
    %353 = vector.broadcast %cst_222 : f32 to vector<1x128xf32>
    %354 = arith.maximumf %352, %353 : vector<1x128xf32>
    %355 = arith.truncf %354 : vector<1x128xf32> to vector<1x128xbf16>
    %c6_223 = arith.constant 6 : index
    %c0_224 = arith.constant 0 : index
    %c0_225 = arith.constant 0 : index
    %356 = vector.load %arg7[%c6_223, %c0_224, %c0_225] : memref<7x128x128xbf16, #tpu.memory_space<vmem>>, vector<1x128x128xbf16>
    %357 = vector.shape_cast %356 : vector<1x128x128xbf16> to vector<128x128xbf16>
    %cst_226 = arith.constant dense<0.000000e+00> : vector<1x128xf32>
    %358 = tpu.matmul %355, %357, %cst_226 {dimension_numbers = #tpu.dot_dimension_numbers<[1], [0], [0], [1], [0, 0, 1, 1], [], []>} : vector<1x128xbf16>, vector<128x128xbf16>, vector<1x128xf32> -> vector<1x128xf32>
    %c6_227 = arith.constant 6 : index
    %c0_228 = arith.constant 0 : index
    %359 = vector.load %arg8[%c6_227, %c0_228] : memref<7x128xf32, #tpu.memory_space<vmem>>, vector<1x128xf32>
    %360 = arith.addf %358, %359 : vector<1x128xf32>
    %361 = arith.negf %360 : vector<1x128xf32>
    %362 = math.exp %361 : vector<1x128xf32>
    %cst_229 = arith.constant 1.000000e+00 : f32
    %363 = vector.broadcast %cst_229 : f32 to vector<1x128xf32>
    %364 = arith.addf %363, %362 : vector<1x128xf32>
    %365 = arith.divf %363, %364 : vector<1x128xf32>
    %366 = vector.broadcast %365 : vector<1x128xf32> to vector<4x128xf32>
    %367 = arith.mulf %342, %366 : vector<4x128xf32>
    %368 = arith.truncf %367 : vector<4x128xf32> to vector<4x128xbf16>
    %c0_230 = arith.constant 0 : index
    %c0_231 = arith.constant 0 : index
    %369 = vector.load %arg9[%c0_230, %c0_231] : memref<128x128xbf16, #tpu.memory_space<vmem>>, vector<128x128xbf16>
    %cst_232 = arith.constant dense<0.000000e+00> : vector<4x128xf32>
    %370 = tpu.matmul %368, %369, %cst_232 {dimension_numbers = #tpu.dot_dimension_numbers<[1], [0], [0], [1], [0, 0, 1, 1], [], []>} : vector<4x128xbf16>, vector<128x128xbf16>, vector<4x128xf32> -> vector<4x128xf32>
    %c0_233 = arith.constant 0 : index
    %c0_234 = arith.constant 0 : index
    %371 = vector.load %arg10[%c0_233, %c0_234] : memref<1x128xf32, #tpu.memory_space<vmem>>, vector<1x128xf32>
    %372 = vector.broadcast %371 : vector<1x128xf32> to vector<4x128xf32>
    %373 = arith.addf %370, %372 : vector<4x128xf32>
    %374 = vector.shape_cast %373 : vector<4x128xf32> to vector<1x4x128xf32>
    %c0_235 = arith.constant 0 : index
    %c0_236 = arith.constant 0 : index
    %c0_237 = arith.constant 0 : index
    %375 = vector.load %arg11[%c0_235, %c0_236, %c0_237] : memref<1x4x128xf32, #tpu.memory_space<vmem>>, vector<1x4x128xf32>
    tpu.vector_store %arg11[%c0_235, %c0_236, %c0_237], %374 {strides = array<i32>} : memref<1x4x128xf32, #tpu.memory_space<vmem>>, vector<1x4x128xf32>,
    return
  }
  func.func @transform_0(%arg0: i32) -> (i32, i32, i32) {
    %c0_i32 = arith.constant 0 : i32
    %c0_i32_0 = arith.constant 0 : i32
    %c0_i32_1 = arith.constant 0 : i32
    return %arg0, %c0_i32, %c0_i32_0 : i32, i32, i32
  }
  func.func @transform_1(%arg0: i32) -> (i32, i32, i32) {
    %c0_i32 = arith.constant 0 : i32
    %c0_i32_0 = arith.constant 0 : i32
    %c0_i32_1 = arith.constant 0 : i32
    %c0_i32_2 = arith.constant 0 : i32
    return %c0_i32, %c0_i32_0, %c0_i32_1 : i32, i32, i32
  }
  func.func @transform_2(%arg0: i32) -> (i32, i32) {
    %c0_i32 = arith.constant 0 : i32
    %c0_i32_0 = arith.constant 0 : i32
    %c0_i32_1 = arith.constant 0 : i32
    return %c0_i32, %c0_i32_0 : i32, i32
  }
  func.func @transform_3(%arg0: i32) -> (i32, i32) {
    %c0_i32 = arith.constant 0 : i32
    %c0_i32_0 = arith.constant 0 : i32
    %c0_i32_1 = arith.constant 0 : i32
    return %c0_i32, %c0_i32_0 : i32, i32
  }
  func.func @transform_4(%arg0: i32) -> (i32, i32, i32) {
    %c0_i32 = arith.constant 0 : i32
    %c0_i32_0 = arith.constant 0 : i32
    %c0_i32_1 = arith.constant 0 : i32
    %c0_i32_2 = arith.constant 0 : i32
    return %c0_i32, %c0_i32_0, %c0_i32_1 : i32, i32, i32
  }
  func.func @transform_5(%arg0: i32) -> (i32, i32) {
    %c0_i32 = arith.constant 0 : i32
    %c0_i32_0 = arith.constant 0 : i32
    %c0_i32_1 = arith.constant 0 : i32
    return %c0_i32, %c0_i32_0 : i32, i32
  }
  func.func @transform_6(%arg0: i32) -> (i32, i32, i32) {
    %c0_i32 = arith.constant 0 : i32
    %c0_i32_0 = arith.constant 0 : i32
    %c0_i32_1 = arith.constant 0 : i32
    %c0_i32_2 = arith.constant 0 : i32
    return %c0_i32, %c0_i32_0, %c0_i32_1 : i32, i32, i32
  }
  func.func @transform_7(%arg0: i32) -> (i32, i32) {
    %c0_i32 = arith.constant 0 : i32
    %c0_i32_0 = arith.constant 0 : i32
    %c0_i32_1 = arith.constant 0 : i32
    return %c0_i32, %c0_i32_0 : i32, i32
  }
  func.func @transform_8(%arg0: i32) -> (i32, i32) {
    %c0_i32 = arith.constant 0 : i32
    %c0_i32_0 = arith.constant 0 : i32
    %c0_i32_1 = arith.constant 0 : i32
    return %c0_i32, %c0_i32_0 : i32, i32
  }
  func.func @transform_9(%arg0: i32) -> (i32, i32) {
    %c0_i32 = arith.constant 0 : i32
    %c0_i32_0 = arith.constant 0 : i32
    %c0_i32_1 = arith.constant 0 : i32
    return %c0_i32, %c0_i32_0 : i32, i32
  }
  func.func @transform_10(%arg0: i32) -> (i32, i32, i32) {
    %c0_i32 = arith.constant 0 : i32
    %c0_i32_0 = arith.constant 0 : i32
    %c0_i32_1 = arith.constant 0 : i32
    return %arg0, %c0_i32, %c0_i32_0 : i32, i32, i32
  }
}

</mosaic_0001>

<bundles_post_ra>
// kernel: sig_extract_2_forward.1
= control target key start
LH: loop header
LB: loop body
LE: loop exit
PB: predicated region body
PF: predicated region fallthrough
CT: control target
= control target key end

     0   :  { %s8066_s13 = smov 0   ;;  %s10683_s0 = inlined_call_operand.vmem [shape: bf16[2,319,128], index: 0, kind: input, shape index: {}]   ;;  %s10684_s1 = inlined_call_operand.vmem [shape: bf16[7,384,128], index: 1, kind: input, shape index: {}]   ;;  %s10685_s2 = inlined_call_operand.vmem [shape: f32[7,128], index: 2, kind: input, shape index: {}]   ;;  %s10686_s3 = inlined_call_operand.vmem [shape: f32[2,128], index: 3, kind: input, shape index: {}]   ;;  %s10687_s4 = inlined_call_operand.vmem [shape: bf16[7,128,128], index: 4, kind: input, shape index: {}]   ;;  %s10688_s5 = inlined_call_operand.vmem [shape: f32[7,128], index: 5, kind: input, shape index: {}]   ;;  %s10689_s6 = inlined_call_operand.vmem [shape: bf16[7,128,128], index: 6, kind: input, shape index: {}]   ;;  %s10690_s7 = inlined_call_operand.vmem [shape: f32[7,128], index: 7, kind: input, shape index: {}]   ;;  %s10691_s8 = inlined_call_operand.vmem [shape: bf16[128,128], index: 8, kind: input, shape index: {}]   ;;  %s10692_s9 = inlined_call_operand.vmem [shape: f32[1,128], index: 9, kind: input, shape index: {}]   ;;  %s10693_s10 = inlined_call_operand.vmem [shape: f32[2,4,128], index: 10, kind: output, shape index: {}]  }
   0x1 LB: > { %s5853_s14 = sadd.s32 4294967295, %s8007_s13   ;;  %p5857_p0 = scmp.ge.s32.totalorder %s8007_s13, 1  ;;  %s8007_s13 = sphi %s8066_s13, %s20_s13  }
   0x2   : > { %p312_p1 = scmp.lt.s32.totalorder %s8007_s13, 3 }
   0x4   : > { %p313_p2 = pnand %p5857_p0, %p312_p1 }
   0x6   : > { %316 = sbr.rel (%p313_p2) target bundleno = 5786 (0x169a), region = 60 }
   0xd   : > { %v7533_v0 = vld [vmem:[%s10684_s1] sm:$0xff]   ;;  %p349_p3 = scmp.lt.s32.totalorder %s5853_s14, 1  ;;  %v7534_v1 = vld [vmem:[%s10684_s1 + $0x8] sm:$0xff]   ;;  %v7535_v2 = vld [vmem:[%s10684_s1 + $0x10] sm:$0xff]   ;;  %vm819_vm0 = vcmask 1046528   ;;  %vm8010_vm1 = vmmov 0  }
   0xe   : > { %7046 = vmatprep.subr.bf16.mxu0 %v7533_v0  ;;  %v7536_v3 = vld [vmem:[%s10684_s1 + $0x18] sm:$0xff]   ;;  %v7537_v5 = vld [vmem:[%s10684_s1 + $0x20] sm:$0xff]   ;;  %v7538_v6 = vld [vmem:[%s10684_s1 + $0x28] sm:$0xff]   ;;  %vm4586_vm2 = vcmask 1042432   ;;  %vm5026_vm3 = vcmask 1040384   ;;  %vm5452_vm4 = vcmask 1043456  }
   0xf   : > { %s10858_s14 = smov (!%p349_p3, %s5853_s14), 1  ;;  %7047 = vmatpush3.bf16.msra.mxu0 %v7533_v0  ;;  %v7539_v7 = vld [vmem:[%s10684_s1 + $0x30] sm:$0xff]   ;;  %v7540_v8 = vld [vmem:[%s10684_s1 + $0x38] sm:$0xff]   ;;  %v8129_v28 = vld [vmem:[%s10685_s2] ss:$0 sm:$0xff] }
  0x10   : > { %7048 = vmatprep.subr.bf16.mxu0 %v7534_v1  ;;  %s7522_s21 = smul.u32 160, %s10858_s14  ;;  %s5859_s19 = sshll.u32 %s10858_s14, 2 }
  0x12   : > { %s8089_s24 = scalar_lea.vmem %s10683_s0, %s7522_s21 }
  0x13   : > { %7049 = vmatpush3.bf16.msra.mxu0 %v7534_v1  ;;  %v7541_v4 = vld [vmem:[%s8089_s24] sm:$0xff]   ;;  %v7542_v9 = vld [vmem:[%s8089_s24 + $0x8] sm:$0xff]   ;;  %v7543_v10 = vld [vmem:[%s8089_s24 + $0x10] sm:$0xff]  }
  0x14   : > { %7050 = vmatprep.subr.bf16.mxu0 %v7535_v2  ;;  %7062 = vmatprep.mubr.bf16.mxu0 %v7541_v4  ;;  %v7544_v11 = vld [vmem:[%s8089_s24 + $0x18] sm:$0xff]   ;;  %v7545_v12 = vld [vmem:[%s8089_s24 + $0x20] sm:$0xff]   ;;  %v7546_v13 = vld [vmem:[%s8089_s24 + $0x28] sm:$0xff]  }
  0x15   : > { %v7547_v14 = vld [vmem:[%s8089_s24 + $0x30] sm:$0xff]   ;;  %v7548_v15 = vld [vmem:[%s8089_s24 + $0x38] sm:$0xff]   ;;  %v7549_v16 = vld [vmem:[%s8089_s24 + $0x40] sm:$0xff]  }
  0x16   : > { %v7550_v17 = vld [vmem:[%s8089_s24 + $0x48] sm:$0xff]   ;;  %v7551_v18 = vld [vmem:[%s8089_s24 + $0x50] sm:$0xff]   ;;  %v7552_v19 = vld [vmem:[%s8089_s24 + $0x58] sm:$0xff]  }
  0x17   : > { %7051 = vmatpush3.bf16.msra.mxu0 %v7535_v2  ;;  %v7553_v20 = vld [vmem:[%s8089_s24 + $0x60] sm:$0xff]   ;;  %v7554_v21 = vld [vmem:[%s8089_s24 + $0x68] sm:$0xff]   ;;  %v7555_v22 = vld [vmem:[%s8089_s24 + $0x70] sm:$0xff]  }
  0x18   : > { %7052 = vmatprep.subr.bf16.mxu0 %v7536_v3  ;;  %v7556_v23 = vld [vmem:[%s8089_s24 + $0x78] sm:$0xff]   ;;  %v7557_v24 = vld [vmem:[%s8089_s24 + $0x80] sm:$0xff]   ;;  %v7558_v25 = vld [vmem:[%s8089_s24 + $0x88] sm:$0xff]  }
  0x19   : > { %v7559_v26 = vld [vmem:[%s8089_s24 + $0x90] sm:$0xff]   ;;  %v7560_v27 = vld [vmem:[%s8089_s24 + $0x98] sm:$0xff]   ;;  %s357_s24 = scalar_lea.vmem %s10693_s10, %s5859_s19 }
  0x1b   : > { %7053 = vmatpush3.bf16.msra.mxu0 %v7536_v3 }
  0x1c   : > { %7054 = vmatprep.subr.bf16.mxu0 %v7537_v5 }
  0x1f   : > { %7055 = vmatpush3.bf16.msra.mxu0 %v7537_v5 }
  0x20   : > { %7056 = vmatprep.subr.bf16.mxu0 %v7538_v6 }
  0x23   : > { %7057 = vmatpush3.bf16.msra.mxu0 %v7538_v6 }
  0x24   : > { %7058 = vmatprep.subr.bf16.mxu0 %v7539_v7 }
  0x27   : > { %7059 = vmatpush3.bf16.msra.mxu0 %v7539_v7 }
  0x28   : > { %7060 = vmatprep.subr.bf16.mxu0 %v7540_v8 }
  0x2b   : > { %7061 = vmatpush3.bf16.msra.mxu0 %v7540_v8 }
  0x2e   : > { %7063 = vmatmul.mubr.bf16.vlgmr.msra.gmra.mrb[0].mxu0 %v7542_v9 }
  0x2f   : > { %7066 = vmatprep.mubr.bf16.mxu0 %v7543_v10 }
  0x36   : > { %7067 = vmatmul.mubr.bf16.gmra.mrb[4].mxu0 %v7544_v11 }
  0x37   : > { %7070 = vmatprep.mubr.bf16.mxu0 %v7545_v12 }
  0x3e   : > { %7071 = vmatmul.mubr.bf16.gmra.mrb[8].mxu0 %v7546_v13 }
  0x3f   : > { %7074 = vmatprep.mubr.bf16.mxu0 %v7547_v14 }
  0x46   : > { %7075 = vmatmul.mubr.bf16.gmra.mrb[12].mxu0 %v7548_v15 }
  0x47   : > { %7078 = vmatprep.mubr.bf16.mxu0 %v7549_v16 }
  0x4e   : > { %7079 = vmatmul.mubr.bf16.gmra.mrb[16].mxu0 %v7550_v17 }
  0x4f   : > { %7082 = vmatprep.mubr.bf16.mxu0 %v7551_v18 }
  0x56   : > { %7083 = vmatmul.mubr.bf16.gmra.mrb[20].mxu0 %v7552_v19 }
  0x57   : > { %7086 = vmatprep.mubr.bf16.mxu0 %v7553_v20 }
  0x5e   : > { %7087 = vmatmul.mubr.bf16.gmra.mrb[24].mxu0 %v7554_v21 }
  0x5f   : > { %7090 = vmatprep.mubr.bf16.mxu0 %v7555_v22 }
  0x66   : > { %7091 = vmatmul.mubr.bf16.gmra.mrb[28].mxu0 %v7556_v23 }
  0x67   : > { %7094 = vmatprep.mubr.bf16.mxu0 %v7557_v24 }
  0x6e   : > { %7095 = vmatmul.mubr.bf16.gmra.mrb[32].mxu0 %v7558_v25 }
  0x6f   : > { %7098 = vmatprep.mubr.bf16.mxu0 %v7559_v26 }
  0x76   : > { %7099 = vmatmul.mubr.bf16.gmra.mrb[36].mxu0 %v7560_v27 }
 0x101   : > { %v7064_v29 = vpop.f32.mrb[0].mxu0 }
 0x102   : > { %v622_v30 = vpop.f32.mrb[1].mxu0  ;;  %v8135_v34 = vadd.f32 %v7064_v29, %v8129_v28 }
 0x103   : > { %v8132_v31 = vadd.f32 %v8129_v28, %v622_v30  ;;  %v7065_v32 = vpop.f32.mrb[2].mxu0 }
 0x104   : > { %v625_v33 = vpop.f32.mrb[3].mxu0  ;;  %v8143_v37 = vadd.f32 %v7065_v32, %v8129_v28  ;;  %v830_v40 = vmul.f32 %v8135_v34, %v8135_v34 }
 0x105   : > { %v8138_v35 = vadd.f32 %v8129_v28, %v625_v33  ;;  %v828_v36 = vmul.f32 %v8132_v31, %v8132_v31 }
 0x106   : > { %v831_v45 = vmul.f32 %v8143_v37, %v8143_v37 }
 0x107   : > { %v781_v38 = vadd.f32 %v8138_v35, %v8132_v31  ;;  %v829_v39 = vmul.f32 %v8138_v35, %v8138_v35 }
 0x109   : > { %v782_v41 = vadd.f32 %v781_v38, %v8135_v34  ;;  %v868_v42 = vadd.f32 %v829_v39, %v828_v36  ;;  %v7068_v43 = vpop.f32.mrb[4].mxu0 }
 0x10a   : > { %v638_v44 = vpop.f32.mrb[5].mxu0  ;;  %v8159_v50 = vadd.f32 %v7068_v43, %v8129_v28 }
 0x10b   : > { %v869_v46 = vadd.f32 %v868_v42, %v830_v40  ;;  %v8155_v47 = vadd.f32 %v8129_v28, %v638_v44  ;;  %v783_v48 = vadd.f32 %v782_v41, %v8143_v37  ;;  %v7069_v49 = vpop.f32.mrb[6].mxu0 }
 0x10c   : > { %v641_v51 = vpop.f32.mrb[7].mxu0  ;;  %v8168_v57 = vadd.f32 %v7069_v49, %v8129_v28  ;;  %v834_v60 = vmul.f32 %v8159_v50, %v8159_v50 }
 0x10d   : > { %v784_v52 = vadd.f32 %v783_v48, %v8155_v47  ;;  %v832_v53 = vmul.f32 %v8155_v47, %v8155_v47  ;;  %v870_v54 = vadd.f32 %v869_v46, %v831_v45  ;;  %v8165_v55 = vadd.f32 %v8129_v28, %v641_v51 }
 0x10e   : > { %v835_v1 = vmul.f32 %v8168_v57, %v8168_v57 }
 0x10f   : > { %v871_v56 = vadd.f32 %v870_v54, %v832_v53  ;;  %v785_v58 = vadd.f32 %v784_v52, %v8165_v55  ;;  %v833_v59 = vmul.f32 %v8165_v55, %v8165_v55 }
 0x111   : > { %v786_v61 = vadd.f32 %v785_v58, %v8159_v50  ;;  %v872_v62 = vadd.f32 %v871_v56, %v833_v59  ;;  %v7072_v63 = vpop.f32.mrb[8].mxu0 }
 0x112   : > { %v654_v0 = vpop.f32.mrb[9].mxu0  ;;  %v8183_v6 = vadd.f32 %v7072_v63, %v8129_v28 }
 0x113   : > { %v873_v2 = vadd.f32 %v872_v62, %v834_v60  ;;  %v8179_v3 = vadd.f32 %v8129_v28, %v654_v0  ;;  %v787_v4 = vadd.f32 %v786_v61, %v8168_v57  ;;  %v7073_v5 = vpop.f32.mrb[10].mxu0 }
 0x114   : > { %v657_v7 = vpop.f32.mrb[11].mxu0  ;;  %v8192_v13 = vadd.f32 %v7073_v5, %v8129_v28  ;;  %v838_v16 = vmul.f32 %v8183_v6, %v8183_v6 }
 0x115   : > { %v788_v8 = vadd.f32 %v787_v4, %v8179_v3  ;;  %v836_v9 = vmul.f32 %v8179_v3, %v8179_v3  ;;  %v874_v10 = vadd.f32 %v873_v2, %v835_v1  ;;  %v8189_v11 = vadd.f32 %v8129_v28, %v657_v7 }
 0x116   : > { %v839_v21 = vmul.f32 %v8192_v13, %v8192_v13 }
 0x117   : > { %v875_v12 = vadd.f32 %v874_v10, %v836_v9  ;;  %v789_v14 = vadd.f32 %v788_v8, %v8189_v11  ;;  %v837_v15 = vmul.f32 %v8189_v11, %v8189_v11 }
 0x119   : > { %v790_v17 = vadd.f32 %v789_v14, %v8183_v6  ;;  %v876_v18 = vadd.f32 %v875_v12, %v837_v15  ;;  %v7076_v19 = vpop.f32.mrb[12].mxu0 }
 0x11a   : > { %v670_v20 = vpop.f32.mrb[13].mxu0  ;;  %v8207_v26 = vadd.f32 %v7076_v19, %v8129_v28 }
 0x11b   : > { %v877_v22 = vadd.f32 %v876_v18, %v838_v16  ;;  %v8203_v23 = vadd.f32 %v8129_v28, %v670_v20  ;;  %v791_v24 = vadd.f32 %v790_v17, %v8192_v13  ;;  %v7077_v25 = vpop.f32.mrb[14].mxu0 }
 0x11c   : > { %v673_v27 = vpop.f32.mrb[15].mxu0  ;;  %v8216_v38 = vadd.f32 %v7077_v25, %v8129_v28  ;;  %v842_v41 = vmul.f32 %v8207_v26, %v8207_v26 }
 0x11d   : > { %v792_v29 = vadd.f32 %v791_v24, %v8203_v23  ;;  %v840_v30 = vmul.f32 %v8203_v23, %v8203_v23  ;;  %v878_v32 = vadd.f32 %v877_v22, %v839_v21  ;;  %v8213_v33 = vadd.f32 %v8129_v28, %v673_v27 }
 0x11e   : > { %v843_v46 = vmul.f32 %v8216_v38, %v8216_v38 }
 0x11f   : > { %v879_v36 = vadd.f32 %v878_v32, %v840_v30  ;;  %v793_v39 = vadd.f32 %v792_v29, %v8213_v33  ;;  %v841_v40 = vmul.f32 %v8213_v33, %v8213_v33 }
 0x121   : > { %v794_v42 = vadd.f32 %v793_v39, %v8207_v26  ;;  %v880_v43 = vadd.f32 %v879_v36, %v841_v40  ;;  %v7080_v44 = vpop.f32.mrb[16].mxu0 }
 0x122   : > { %v686_v45 = vpop.f32.mrb[17].mxu0  ;;  %v8231_v53 = vadd.f32 %v7080_v44, %v8129_v28 }
 0x123   : > { %v881_v48 = vadd.f32 %v880_v43, %v842_v41  ;;  %v8227_v49 = vadd.f32 %v8129_v28, %v686_v45  ;;  %v795_v51 = vadd.f32 %v794_v42, %v8216_v38  ;;  %v7081_v52 = vpop.f32.mrb[18].mxu0 }
 0x124   : > { %v689_v54 = vpop.f32.mrb[19].mxu0  ;;  %v8240_v62 = vadd.f32 %v7081_v52, %v8129_v28  ;;  %v846_v1 = vmul.f32 %v8231_v53, %v8231_v53 }
 0x125   : > { %v796_v56 = vadd.f32 %v795_v51, %v8227_v49  ;;  %v844_v58 = vmul.f32 %v8227_v49, %v8227_v49  ;;  %v882_v59 = vadd.f32 %v881_v48, %v843_v46  ;;  %v8237_v60 = vadd.f32 %v8129_v28, %v689_v54 }
 0x126   : > { %v847_v8 = vmul.f32 %v8240_v62, %v8240_v62 }
 0x127   : > { %v883_v61 = vadd.f32 %v882_v59, %v844_v58  ;;  %v797_v63 = vadd.f32 %v796_v56, %v8237_v60  ;;  %v845_v0 = vmul.f32 %v8237_v60, %v8237_v60 }
 0x129   : > { %v798_v2 = vadd.f32 %v797_v63, %v8231_v53  ;;  %v884_v4 = vadd.f32 %v883_v61, %v845_v0  ;;  %v7084_v5 = vpop.f32.mrb[20].mxu0 }
 0x12a   : > { %v702_v7 = vpop.f32.mrb[21].mxu0  ;;  %v8255_v15 = vadd.f32 %v7084_v5, %v8129_v28 }
 0x12b   : > { %v885_v9 = vadd.f32 %v884_v4, %v846_v1  ;;  %v8251_v10 = vadd.f32 %v8129_v28, %v702_v7  ;;  %v799_v12 = vadd.f32 %v798_v2, %v8240_v62  ;;  %v7085_v14 = vpop.f32.mrb[22].mxu0 }
 0x12c   : > { %v705_v16 = vpop.f32.mrb[23].mxu0  ;;  %v8264_v22 = vadd.f32 %v7085_v14, %v8129_v28  ;;  %v850_v27 = vmul.f32 %v8255_v15, %v8255_v15 }
 0x12d   : > { %v800_v17 = vadd.f32 %v799_v12, %v8251_v10  ;;  %v848_v18 = vmul.f32 %v8251_v10, %v8251_v10  ;;  %v886_v19 = vadd.f32 %v885_v9, %v847_v8  ;;  %v8261_v20 = vadd.f32 %v8129_v28, %v705_v16 }
 0x12e   : > { %v851_v39 = vmul.f32 %v8264_v22, %v8264_v22 }
 0x12f   : > { %v887_v21 = vadd.f32 %v886_v19, %v848_v18  ;;  %v801_v24 = vadd.f32 %v800_v17, %v8261_v20  ;;  %v849_v25 = vmul.f32 %v8261_v20, %v8261_v20 }
 0x131   : > { %v802_v29 = vadd.f32 %v801_v24, %v8255_v15  ;;  %v888_v30 = vadd.f32 %v887_v21, %v849_v25  ;;  %v7088_v32 = vpop.f32.mrb[24].mxu0 }
 0x132   : > { %v718_v36 = vpop.f32.mrb[25].mxu0  ;;  %v8279_v44 = vadd.f32 %v7088_v32, %v8129_v28 }
 0x133   : > { %v889_v40 = vadd.f32 %v888_v30, %v850_v27  ;;  %v8275_v41 = vadd.f32 %v8129_v28, %v718_v36  ;;  %v803_v42 = vadd.f32 %v802_v29, %v8264_v22  ;;  %v7089_v43 = vpop.f32.mrb[26].mxu0 }
 0x134   : > { %v721_v45 = vpop.f32.mrb[27].mxu0  ;;  %v8288_v56 = vadd.f32 %v7089_v43, %v8129_v28  ;;  %v854_v61 = vmul.f32 %v8279_v44, %v8279_v44 }
 0x135   : > { %v804_v46 = vadd.f32 %v803_v42, %v8275_v41  ;;  %v852_v48 = vmul.f32 %v8275_v41, %v8275_v41  ;;  %v890_v51 = vadd.f32 %v889_v40, %v851_v39  ;;  %v8285_v52 = vadd.f32 %v8129_v28, %v721_v45 }
 0x136   : > { %v855_v4 = vmul.f32 %v8288_v56, %v8288_v56 }
 0x137   : > { %v891_v54 = vadd.f32 %v890_v51, %v852_v48  ;;  %v805_v58 = vadd.f32 %v804_v46, %v8285_v52  ;;  %v853_v59 = vmul.f32 %v8285_v52, %v8285_v52 }
 0x139   : > { %v806_v63 = vadd.f32 %v805_v58, %v8279_v44  ;;  %v892_v0 = vadd.f32 %v891_v54, %v853_v59  ;;  %v7092_v1 = vpop.f32.mrb[28].mxu0 }
 0x13a   : > { %v734_v2 = vpop.f32.mrb[29].mxu0  ;;  %v8303_v12 = vadd.f32 %v7092_v1, %v8129_v28 }
 0x13b   : > { %v893_v5 = vadd.f32 %v892_v0, %v854_v61  ;;  %v8299_v7 = vadd.f32 %v8129_v28, %v734_v2  ;;  %v807_v8 = vadd.f32 %v806_v63, %v8288_v56  ;;  %v7093_v9 = vpop.f32.mrb[30].mxu0 }
 0x13c   : > { %v737_v14 = vpop.f32.mrb[31].mxu0  ;;  %v8312_v24 = vadd.f32 %v7093_v9, %v8129_v28  ;;  %v858_v29 = vmul.f32 %v8303_v12, %v8303_v12 }
 0x13d   : > { %v808_v16 = vadd.f32 %v807_v8, %v8299_v7  ;;  %v856_v17 = vmul.f32 %v8299_v7, %v8299_v7  ;;  %v894_v18 = vadd.f32 %v893_v5, %v855_v4  ;;  %v8309_v19 = vadd.f32 %v8129_v28, %v737_v14 }
 0x13e   : > { %v859_v40 = vmul.f32 %v8312_v24, %v8312_v24 }
 0x13f   : > { %v895_v21 = vadd.f32 %v894_v18, %v856_v17  ;;  %v809_v25 = vadd.f32 %v808_v16, %v8309_v19  ;;  %v857_v27 = vmul.f32 %v8309_v19, %v8309_v19 }
 0x141   : > { %v810_v30 = vadd.f32 %v809_v25, %v8303_v12  ;;  %v896_v32 = vadd.f32 %v895_v21, %v857_v27  ;;  %v7096_v36 = vpop.f32.mrb[32].mxu0 }
 0x142   : > { %v750_v39 = vpop.f32.mrb[33].mxu0  ;;  %v8327_v48 = vadd.f32 %v7096_v36, %v8129_v28 }
 0x143   : > { %v897_v42 = vadd.f32 %v896_v32, %v858_v29  ;;  %v8323_v43 = vadd.f32 %v8129_v28, %v750_v39  ;;  %v811_v45 = vadd.f32 %v810_v30, %v8312_v24  ;;  %v7097_v46 = vpop.f32.mrb[34].mxu0 }
 0x144   : > { %v753_v51 = vpop.f32.mrb[35].mxu0  ;;  %v8336_v0 = vadd.f32 %v7097_v46, %v8129_v28  ;;  %v862_v4 = vmul.f32 %v8327_v48, %v8327_v48 }
 0x145   : > { %v812_v54 = vadd.f32 %v811_v45, %v8323_v43  ;;  %v860_v58 = vmul.f32 %v8323_v43, %v8323_v43  ;;  %v898_v59 = vadd.f32 %v897_v42, %v859_v40  ;;  %v8333_v61 = vadd.f32 %v8129_v28, %v753_v51 }
 0x146   : > { %v863_v16 = vmul.f32 %v8336_v0, %v8336_v0 }
 0x147   : > { %v899_v63 = vadd.f32 %v898_v59, %v860_v58  ;;  %v813_v1 = vadd.f32 %v812_v54, %v8333_v61  ;;  %v861_v2 = vmul.f32 %v8333_v61, %v8333_v61 }
 0x149   : > { %v814_v5 = vadd.f32 %v813_v1, %v8327_v48  ;;  %v900_v8 = vadd.f32 %v899_v63, %v861_v2  ;;  %v7100_v9 = vpop.f32.mrb[36].mxu0 }
 0x14a   : > { %v766_v14 = vpop.f32.mrb[37].mxu0  ;;  %v8351_v27 = vadd.f32 %v7100_v9, %v8129_v28 }
 0x14b   : > { %v901_v17 = vadd.f32 %v900_v8, %v862_v4  ;;  %v8347_v18 = vadd.f32 %v8129_v28, %v766_v14  ;;  %v815_v21 = vadd.f32 %v814_v5, %v8336_v0  ;;  %v7101_v25 = vpop.f32.mrb[38].mxu0 }
 0x14c   : > { %v8354_v29 = vadd.f32 %v7101_v25, %v8129_v28  ;;  %v769_v30 = vpop.f32.mrb[39].mxu0  ;;  %v866_v54 = vmul.f32 %v8351_v27, %v8351_v27 }
 0x14d   : > { %v816_v32 = vadd.f32 %v815_v21, %v8347_v18  ;;  %v864_v36 = vmul.f32 %v8347_v18, %v8347_v18  ;;  %v902_v39 = vadd.f32 %v901_v17, %v863_v16  ;;  %v8360_v40 = vadd.f32 %v8129_v28, %v769_v30 }
 0x14e   : > { %v867_v51 = vmul.f32 %v8354_v29, %v8354_v29  ;;  %v820_v28 = vsel %vm819_vm0, %v8354_v29, 0.0 }
 0x14f   : > { %v903_v42 = vadd.f32 %v902_v39, %v864_v36  ;;  %v817_v45 = vadd.f32 %v816_v32, %v8360_v40  ;;  %v865_v46 = vmul.f32 %v8360_v40, %v8360_v40 }
 0x150   : > { %v906_v2 = vsel %vm819_vm0, %v867_v51, 0.0 }
 0x151   : > { %v818_v58 = vadd.f32 %v817_v45, %v8351_v27  ;;  %v904_v59 = vadd.f32 %v903_v42, %v865_v46 }
 0x153   : > { %v821_v63 = vadd.f32 %v820_v28, %v818_v58  ;;  %v905_v1 = vadd.f32 %v904_v59, %v866_v54 }
 0x155   : > { %v822_v4 = vrot.slane %v821_v63, 4  ;;  %v907_v5 = vadd.f32 %v906_v2, %v905_v1 }
 0x157   : > { %v823_v8 = vadd.f32 %v822_v4, %v821_v63  ;;  %v908_v9 = vrot.slane %v907_v5, 4 }
 0x159   : > { %v824_v14 = vrot.slane %v823_v8, 2  ;;  %v909_v16 = vadd.f32 %v908_v9, %v907_v5 }
 0x15b   : > { %v825_v17 = vadd.f32 %v824_v14, %v823_v8  ;;  %v910_v21 = vrot.slane %v909_v16, 2 }
 0x15d   : > { %v826_v25 = vrot.slane %v825_v17, 1  ;;  %v911_v30 = vadd.f32 %v910_v21, %v909_v16 }
 0x15f   : > { %v827_v32 = vadd.f32 %v826_v25, %v825_v17  ;;  %v912_v36 = vrot.slane %v911_v30, 1  ;;  %v8465_v17 = vld [vmem:[%s10686_s3 + $0x1] ss:$0 sm:$0xff] }
 0x161   : > { %v913_v39 = vadd.f32 %v912_v36, %v911_v30  ;;  %v8373_v42 = vmul.f32 0.0031347962, %v827_v32 }
 0x163   : > { %v915_v45 = vmul.f32 0.0031347962, %v913_v39  ;;  %v916_v46 = vmul.f32 %v8373_v42, %v8373_v42  ;;  %v955_v51 = vsub.f32 %v8360_v40, %v8373_v42  ;;  %v938_v59 = vsub.f32 %v8251_v10, %v8373_v42 }
 0x164   : > { %v939_v28 = vsub.f32 %v8261_v20, %v8373_v42  ;;  %v940_v63 = vsub.f32 %v8255_v15, %v8373_v42  ;;  %v922_v32 = vsub.f32 %v8155_v47, %v8373_v42  ;;  %v923_v36 = vsub.f32 %v8165_v55, %v8373_v42 }
 0x165   : > { %v917_v54 = vsub.f32 %v915_v45, %v916_v46  ;;  %v918_v45 = vsub.f32 %v8132_v31, %v8373_v42  ;;  %v919_v46 = vsub.f32 %v8138_v35, %v8373_v42  ;;  %v924_v39 = vsub.f32 %v8159_v50, %v8373_v42 }
 0x166   : > { %v925_v31 = vsub.f32 %v8168_v57, %v8373_v42  ;;  %v926_v35 = vsub.f32 %v8179_v3, %v8373_v42  ;;  %v929_v47 = vsub.f32 %v8192_v13, %v8373_v42  ;;  %v930_v55 = vsub.f32 %v8203_v23, %v8373_v42 }
 0x167   : > { %v958_v58 = vadd.f32 1e-05, %v917_v54  ;;  %v920_v54 = vsub.f32 %v8135_v34, %v8373_v42  ;;  %v927_v34 = vsub.f32 %v8189_v11, %v8373_v42  ;;  %v931_v50 = vsub.f32 %v8213_v33, %v8373_v42 }
 0x168   : > { %v932_v57 = vsub.f32 %v8207_v26, %v8373_v42  ;;  %v933_v3 = vsub.f32 %v8216_v38, %v8373_v42  ;;  %v934_v11 = vsub.f32 %v8227_v49, %v8373_v42  ;;  %v935_v13 = vsub.f32 %v8237_v60, %v8373_v42 }
 0x169   : > { %7809 = vrsqrt.f32 %v958_v58  ;;  %v921_v58 = vsub.f32 %v8143_v37, %v8373_v42  ;;  %v928_v37 = vsub.f32 %v8183_v6, %v8373_v42  ;;  %v8452_v6 = vld [vmem:[%s10686_s3] ss:$0 sm:$0xff]  ;;  %v936_v23 = vsub.f32 %v8231_v53, %v8373_v42 }
 0x16a   : > { %v937_v26 = vsub.f32 %v8240_v62, %v8373_v42  ;;  %v10751_v10 = vsub.f32 %v8285_v52, %v8373_v42  ;;  %v10752_v20 = vsub.f32 %v8279_v44, %v8373_v42  ;;  %v10753_v15 = vsub.f32 %v8288_v56, %v8373_v42 }
 0x16b   : > { %v10756_v52 = vsub.f32 %v8303_v12, %v8373_v42  ;;  %v10757_v44 = vsub.f32 %v8312_v24, %v8373_v42  ;;  %v10758_v56 = vsub.f32 %v8323_v43, %v8373_v42  ;;  %v10761_v12 = vsub.f32 %v8336_v0, %v8373_v42 }
 0x16c   : > { %v10762_v24 = vsub.f32 %v8347_v18, %v8373_v42  ;;  %v10763_v43 = vsub.f32 %v8351_v27, %v8373_v42 }
 0x173   : > { %v7810_v30 = vpop.eup %7809 }
 0x174   : > { %v997_v33 = vmul.f32 %v7810_v30, %v955_v51  ;;  %v960_v38 = vmul.f32 %v7810_v30, %v918_v45  ;;  %v961_v25 = vmul.f32 %v7810_v30, %v919_v46  ;;  %v962_v21 = vmul.f32 %v7810_v30, %v920_v54 }
 0x175   : > { %v963_v16 = vmul.f32 %v7810_v30, %v921_v58  ;;  %v964_v49 = vmul.f32 %v7810_v30, %v922_v32  ;;  %v965_v14 = vmul.f32 %v7810_v30, %v923_v36  ;;  %v966_v9 = vmul.f32 %v7810_v30, %v924_v39 }
 0x176   : > { %v1042_v60 = vmul.f32 %v8452_v6, %v997_v33  ;;  %v967_v8 = vmul.f32 %v7810_v30, %v925_v31  ;;  %v968_v53 = vmul.f32 %v7810_v30, %v926_v35  ;;  %v969_v5 = vmul.f32 %v7810_v30, %v927_v34 }
 0x177   : > { %v970_v4 = vmul.f32 %v7810_v30, %v928_v37  ;;  %v971_v62 = vmul.f32 %v7810_v30, %v929_v47  ;;  %v972_v51 = vmul.f32 %v7810_v30, %v930_v55  ;;  %v973_v45 = vmul.f32 %v7810_v30, %v931_v50 }
 0x178   : > { %v8469_v46 = vadd.f32 %v8465_v17, %v1042_v60  ;;  %v974_v54 = vmul.f32 %v7810_v30, %v932_v57  ;;  %v975_v40 = vmul.f32 %v7810_v30, %v933_v3  ;;  %v976_v2 = vmul.f32 %v7810_v30, %v934_v11 }
 0x179   : > { %v977_v1 = vmul.f32 %v7810_v30, %v935_v13  ;;  %v978_v58 = vmul.f32 %v7810_v30, %v936_v23  ;;  %v979_v32 = vmul.f32 %v7810_v30, %v937_v26  ;;  %v980_v36 = vmul.f32 %v7810_v30, %v938_v59 }
 0x17a   : > { %10748 = vst [vmem:[#allocation4_spill] sm:$0xff] %v8469_v46  ;;  %v981_v39 = vmul.f32 %v7810_v30, %v939_v28  ;;  %v982_v31 = vmul.f32 %v7810_v30, %v940_v63  ;;  %v10749_v35 = vsub.f32 %v8264_v22, %v8373_v42  ;;  %v10750_v37 = vsub.f32 %v8275_v41, %v8373_v42 }
 0x17b   : > { %v985_v59 = vmul.f32 %v7810_v30, %v10751_v10  ;;  %v986_v28 = vmul.f32 %v7810_v30, %v10752_v20  ;;  %v987_v63 = vmul.f32 %v7810_v30, %v10753_v15  ;;  %v10754_v22 = vsub.f32 %v8299_v7, %v8373_v42 }
 0x17c   : > { %v983_v34 = vmul.f32 %v7810_v30, %v10749_v35  ;;  %v984_v47 = vmul.f32 %v7810_v30, %v10750_v37  ;;  %v10755_v41 = vsub.f32 %v8309_v19, %v8373_v42  ;;  %v990_v57 = vmul.f32 %v7810_v30, %v10756_v52 }
 0x17d   : > { %v988_v55 = vmul.f32 %v7810_v30, %v10754_v22  ;;  %v991_v3 = vmul.f32 %v7810_v30, %v10757_v44  ;;  %v992_v11 = vmul.f32 %v7810_v30, %v10758_v56  ;;  %v10759_v7 = vsub.f32 %v8333_v61, %v8373_v42 }
 0x17e   : > { %v989_v50 = vmul.f32 %v7810_v30, %v10755_v41  ;;  %v10760_v19 = vsub.f32 %v8327_v48, %v8373_v42  ;;  %v995_v26 = vmul.f32 %v7810_v30, %v10761_v12  ;;  %v996_v33 = vmul.f32 %v7810_v30, %v10762_v24 }
 0x17f   : > { %v993_v13 = vmul.f32 %v7810_v30, %v10759_v7  ;;  %v998_v60 = vmul.f32 %v7810_v30, %v10763_v43  ;;  %v10764_v61 = vsub.f32 %v8354_v29, %v8373_v42  ;;  %v1127_v41 = vmul.f32 %v8469_v46, %v8469_v46 }
 0x180   : > { %v994_v23 = vmul.f32 %v7810_v30, %v10760_v19  ;;  %v1040_v10 = vmul.f32 %v8452_v6, %v995_v26  ;;  %v1041_v0 = vmul.f32 %v8452_v6, %v996_v33  ;;  %v1006_v19 = vmul.f32 %v8452_v6, %v961_v25 }
 0x181   : > { %v999_v35 = vmul.f32 %v7810_v30, %v10764_v61  ;;  %v1038_v37 = vmul.f32 %v8452_v6, %v993_v13  ;;  %v1043_v20 = vmul.f32 %v8452_v6, %v998_v60  ;;  %v1167_v52 = vmul.f32 %v1127_v41, %v8469_v46 }
 0x182   : > { %v1039_v48 = vmul.f32 %v8452_v6, %v994_v23  ;;  %v8541_v29 = vadd.f32 %v8465_v17, %v1040_v10  ;;  %v8544_v42 = vadd.f32 %v8465_v17, %v1041_v0  ;;  %v1005_v13 = vmul.f32 %v8452_v6, %v960_v38 }
 0x183   : > { %v1044_v18 = vmul.f32 %v8452_v6, %v999_v35  ;;  %v8535_v15 = vadd.f32 %v8465_v17, %v1038_v37  ;;  %v8547_v30 = vadd.f32 %v8465_v17, %v1043_v20  ;;  %v1207_v44 = vmul.f32 0.044715, %v1167_v52 }
 0x184   : > { %v8538_v27 = vadd.f32 %v8465_v17, %v1039_v48  ;;  %10767 = vst [vmem:[#allocation7_spill] sm:$0xff] %v8541_v29  ;;  %10768 = vst [vmem:[#allocation8_spill] sm:$0xff] %v8544_v42  ;;  %v1007_v23 = vmul.f32 %v8452_v6, %v962_v21  ;;  %v1008_v12 = vmul.f32 %v8452_v6, %v963_v16 }
 0x185   : > { %10765 = vst [vmem:[#allocation5_spill] sm:$0xff] %v8535_v15  ;;  %10769 = vst [vmem:[#allocation9_spill] sm:$0xff] %v8547_v30  ;;  %v8550_v22 = vadd.f32 %v8465_v17, %v1044_v18  ;;  %v1247_v56 = vadd.f32 %v1207_v44, %v8469_v46  ;;  %v1009_v26 = vmul.f32 %v8452_v6, %v964_v49 }
 0x186   : > { %10766 = vst [vmem:[#allocation6_spill] sm:$0xff] %v8538_v27  ;;  %v1010_v24 = vmul.f32 %v8452_v6, %v965_v14  ;;  %v1011_v33 = vmul.f32 %v8452_v6, %v966_v9  ;;  %v1012_v43 = vmul.f32 %v8452_v6, %v967_v8  ;;  %v1013_v60 = vmul.f32 %v8452_v6, %v968_v53 }
 0x187   : > { %10770 = vst [vmem:[#allocation10_spill] sm:$0xff] %v8550_v22  ;;  %v1287_v7 = vmul.f32 0.7978846, %v1247_v56  ;;  %v1014_v61 = vmul.f32 %v8452_v6, %v969_v5  ;;  %v1015_v38 = vmul.f32 %v8452_v6, %v970_v4  ;;  %v1016_v25 = vmul.f32 %v8452_v6, %v971_v62 }
 0x188   : > { %v1017_v21 = vmul.f32 %v8452_v6, %v972_v51  ;;  %v1018_v16 = vmul.f32 %v8452_v6, %v973_v45  ;;  %v1019_v49 = vmul.f32 %v8452_v6, %v974_v54  ;;  %v1020_v14 = vmul.f32 %v8452_v6, %v975_v40 }
 0x189   : > { %7811 = vtanh.f32 %v1287_v7  ;;  %v1021_v9 = vmul.f32 %v8452_v6, %v976_v2  ;;  %v1022_v8 = vmul.f32 %v8452_v6, %v977_v1  ;;  %v1023_v53 = vmul.f32 %v8452_v6, %v978_v58 }
 0x18a   : > { %v1024_v5 = vmul.f32 %v8452_v6, %v979_v32  ;;  %v1025_v4 = vmul.f32 %v8452_v6, %v980_v36  ;;  %v1026_v62 = vmul.f32 %v8452_v6, %v981_v39  ;;  %v1027_v51 = vmul.f32 %v8452_v6, %v982_v31 }
 0x18b   : > { %v1028_v45 = vmul.f32 %v8452_v6, %v983_v34  ;;  %v1029_v54 = vmul.f32 %v8452_v6, %v984_v47  ;;  %v8582_v40 = vadd.f32 %v8465_v17, %v1005_v13  ;;  %v1030_v2 = vmul.f32 %v8452_v6, %v985_v59 }
 0x18c   : > { %v1031_v1 = vmul.f32 %v8452_v6, %v986_v28  ;;  %v1032_v58 = vmul.f32 %v8452_v6, %v987_v63  ;;  %v8588_v32 = vadd.f32 %v8465_v17, %v1006_v19  ;;  %v1033_v36 = vmul.f32 %v8452_v6, %v988_v55 }
 0x18d   : > { %10771 = vst [vmem:[#allocation11_spill] sm:$0xff] %v8582_v40  ;;  %v1034_v39 = vmul.f32 %v8452_v6, %v989_v50  ;;  %v1035_v31 = vmul.f32 %v8452_v6, %v990_v57  ;;  %v1036_v34 = vmul.f32 %v8452_v6, %v991_v3  ;;  %v1037_v47 = vmul.f32 %v8452_v6, %v992_v11 }
 0x18e   : > { %10772 = vst [vmem:[#allocation12_spill] sm:$0xff] %v8588_v32  ;;  %v8596_v35 = vadd.f32 %v8465_v17, %v1007_v23  ;;  %v8599_v59 = vadd.f32 %v8465_v17, %v1008_v12  ;;  %v8602_v28 = vadd.f32 %v8465_v17, %v1009_v26  ;;  %v8605_v63 = vadd.f32 %v8465_v17, %v1010_v24 }
 0x18f   : > { %v8608_v55 = vadd.f32 %v8465_v17, %v1011_v33  ;;  %v8611_v50 = vadd.f32 %v8465_v17, %v1012_v43  ;;  %v1090_v6 = vmul.f32 %v8582_v40, %v8582_v40  ;;  %v8616_v57 = vadd.f32 %v8465_v17, %v1013_v60 }
 0x190   : > { %10773 = vst [vmem:[#allocation13_spill] sm:$0xff] %v8596_v35  ;;  %10774 = vst [vmem:[#allocation14_spill] sm:$0xff] %v8599_v59  ;;  %v8619_v3 = vadd.f32 %v8465_v17, %v1014_v61  ;;  %v8622_v11 = vadd.f32 %v8465_v17, %v1015_v38  ;;  %v1091_v37 = vmul.f32 %v8588_v32, %v8588_v32 }
 0x191   : > { %10775 = vst [vmem:[#allocation15_spill] sm:$0xff] %v8602_v28  ;;  %10776 = vst [vmem:[#allocation16_spill] sm:$0xff] %v8605_v63  ;;  %v8627_v48 = vadd.f32 %v8465_v17, %v1016_v25  ;;  %v8630_v10 = vadd.f32 %v8465_v17, %v1017_v21  ;;  %v8633_v0 = vadd.f32 %v8465_v17, %v1018_v16 }
 0x192   : > { %10777 = vst [vmem:[#allocation17_spill] sm:$0xff] %v8608_v55  ;;  %10778 = vst [vmem:[#allocation18_spill] sm:$0xff] %v8611_v50  ;;  %v8636_v20 = vadd.f32 %v8465_v17, %v1019_v49  ;;  %v8639_v18 = vadd.f32 %v8465_v17, %v1020_v14  ;;  %v8642_v41 = vadd.f32 %v8465_v17, %v1021_v9 }
 0x193   : > { %10779 = vst [vmem:[#allocation19_spill] sm:$0xff] %v8616_v57  ;;  %v8645_v52 = vadd.f32 %v8465_v17, %v1022_v8  ;;  %v8648_v44 = vadd.f32 %v8465_v17, %v1023_v53  ;;  %v8650_v56 = vpop.eup %7811  ;;  %v8653_v7 = vadd.f32 %v8465_v17, %v1024_v5  ;;  %v8656_v13 = vadd.f32 %v8465_v17, %v1025_v4 }
 0x194   : > { %10780 = vst [vmem:[#allocation20_spill] sm:$0xff] %v8650_v56  ;;  %v8659_v19 = vadd.f32 %v8465_v17, %v1026_v62  ;;  %v1130_v23 = vmul.f32 %v1090_v6, %v8582_v40  ;;  %v8663_v12 = vadd.f32 %v8465_v17, %v1027_v51  ;;  %v8666_v26 = vadd.f32 %v8465_v17, %v1028_v45 }
 0x195   : > { %10781 = vst [vmem:[#allocation21_spill] sm:$0xff] %v8653_v7  ;;  %10782 = vst [vmem:[#allocation22_spill] sm:$0xff] %v8656_v13  ;;  %v1092_v24 = vmul.f32 %v8596_v35, %v8596_v35  ;;  %v1131_v33 = vmul.f32 %v1091_v37, %v8588_v32  ;;  %v8672_v43 = vadd.f32 %v8465_v17, %v1029_v54 }
 0x196   : > { %10783 = vst [vmem:[#allocation23_spill] sm:$0xff] %v8659_v19  ;;  %10784 = vst [vmem:[#allocation24_spill] sm:$0xff] %v8663_v12  ;;  %v8675_v60 = vadd.f32 %v8465_v17, %v1030_v2  ;;  %v8678_v61 = vadd.f32 %v8465_v17, %v1031_v1  ;;  %v8681_v38 = vadd.f32 %v8465_v17, %v1032_v58  ;;  %v1170_v53 = vmul.f32 0.044715, %v1130_v23 }
 0x197   : > { %10785 = vst [vmem:[#allocation25_spill] sm:$0xff] %v8666_v26  ;;  %v8684_v25 = vadd.f32 %v8465_v17, %v1033_v36  ;;  %v8687_v21 = vadd.f32 %v8465_v17, %v1034_v39  ;;  %v8690_v16 = vadd.f32 %v8465_v17, %v1035_v31  ;;  %v1093_v49 = vmul.f32 %v8599_v59, %v8599_v59 }
 0x198   : > { %10786 = vst [vmem:[#allocation26_spill] sm:$0xff] %v8675_v60  ;;  %10787 = vst [vmem:[#allocation27_spill] sm:$0xff] %v8678_v61  ;;  %v8695_v14 = vadd.f32 %v8465_v17, %v1036_v34  ;;  %v8698_v9 = vadd.f32 %v8465_v17, %v1037_v47  ;;  %v1094_v8 = vmul.f32 %v8602_v28, %v8602_v28  ;;  %v1171_v51 = vmul.f32 0.044715, %v1131_v33 }
 0x199   : > { %10788 = vst [vmem:[#allocation28_spill] sm:$0xff] %v8684_v25  ;;  %10789 = vst [vmem:[#allocation29_spill] sm:$0xff] %v8687_v21  ;;  %v1095_v5 = vmul.f32 %v8605_v63, %v8605_v63  ;;  %v1096_v4 = vmul.f32 %v8608_v55, %v8608_v55  ;;  %v1132_v62 = vmul.f32 %v1092_v24, %v8596_v35 }
 0x19a   : > { %10790 = vst [vmem:[#allocation30_spill] sm:$0xff] %v8690_v16  ;;  %10791 = vst [vmem:[#allocation31_spill] sm:$0xff] %v8695_v14  ;;  %v1097_v45 = vmul.f32 %v8611_v50, %v8611_v50  ;;  %v1098_v17 = vmul.f32 %v8616_v57, %v8616_v57  ;;  %v1099_v54 = vmul.f32 %v8619_v3, %v8619_v3 }
 0x19b   : > { %10792 = vst [vmem:[#allocation32_spill] sm:$0xff] %v8698_v9  ;;  %v1100_v2 = vmul.f32 %v8622_v11, %v8622_v11  ;;  %v8717_v1 = vmul.f32 %v8627_v48, %v8627_v48  ;;  %v8721_v58 = vmul.f32 %v8630_v10, %v8630_v10  ;;  %v8725_v36 = vmul.f32 %v8633_v0, %v8633_v0 }
 0x19c   : > { %v1133_v39 = vmul.f32 %v1093_v49, %v8599_v59  ;;  %v8730_v31 = vmul.f32 %v8636_v20, %v8636_v20  ;;  %v8734_v34 = vmul.f32 %v8639_v18, %v8639_v18  ;;  %v8738_v47 = vmul.f32 %v8642_v41, %v8642_v41 }
 0x19d   : > { %v1210_v6 = vadd.f32 %v1170_v53, %v8582_v40  ;;  %v8743_v37 = vmul.f32 %v8645_v52, %v8645_v52  ;;  %v1134_v23 = vmul.f32 %v1094_v8, %v8602_v28  ;;  %v1172_v24 = vmul.f32 0.044715, %v1132_v62 }
 0x19e   : > { %v1211_v33 = vadd.f32 %v1171_v51, %v8588_v32  ;;  %v8749_v49 = vmul.f32 %v8648_v44, %v8648_v44  ;;  %v8753_v46 = vmul.f32 %v8653_v7, %v8653_v7  ;;  %v8757_v53 = vmul.f32 %v8656_v13, %v8656_v13 }
 0x19f   : > { %v8761_v56 = vmul.f32 %v8659_v19, %v8659_v19  ;;  %v8765_v8 = vmul.f32 %v8663_v12, %v8663_v12  ;;  %v8769_v62 = vmul.f32 %v8666_v26, %v8666_v26  ;;  %v1135_v51 = vmul.f32 %v1095_v5, %v8605_v63 }
 0x1a0   : > { %10793 = vst [vmem:[#allocation33_spill] sm:$0xff] %v8757_v53  ;;  %v1173_v32 = vmul.f32 0.044715, %v1133_v39  ;;  %v8774_v40 = vmul.f32 %v8672_v43, %v8672_v43  ;;  %v8778_v53 = vmul.f32 %v8675_v60, %v8675_v60  ;;  %v1136_v12 = vmul.f32 %v1096_v4, %v8608_v55  ;;  %v7561_v39 = vld [vmem:[%s10687_s4] sm:$0xff]  }
 0x1a1   : > { %10794 = vst [vmem:[#allocation34_spill] sm:$0xff] %v8761_v56  ;;  %10795 = vst [vmem:[#allocation35_spill] sm:$0xff] %v8765_v8  ;;  %v8782_v56 = vmul.f32 %v8678_v61, %v8678_v61  ;;  %v1250_v8 = vmul.f32 0.7978846, %v1210_v6  ;;  %v1174_v26 = vmul.f32 0.044715, %v1134_v23  ;;  %v8799_v6 = vmul.f32 %v8687_v21, %v8687_v21 }
 0x1a2   : > { %10796 = vst [vmem:[#allocation36_spill] sm:$0xff] %v8769_v62  ;;  %10797 = vst [vmem:[#allocation37_spill] sm:$0xff] %v8774_v40  ;;  %v1212_v62 = vadd.f32 %v1172_v24, %v8596_v35  ;;  %v1251_v5 = vmul.f32 0.7978846, %v1211_v33  ;;  %v8791_v40 = vmul.f32 %v8681_v38, %v8681_v38  ;;  %v1137_v4 = vmul.f32 %v1097_v45, %v8611_v50 }
 0x1a3   : > { %10798 = vst [vmem:[#allocation38_spill] sm:$0xff] %v8778_v53  ;;  %v8795_v53 = vmul.f32 %v8684_v25, %v8684_v25  ;;  %v1175_v23 = vmul.f32 0.044715, %v1135_v51  ;;  %v1213_v24 = vadd.f32 %v1173_v32, %v8599_v59  ;;  %v8805_v33 = vmul.f32 %v8690_v16, %v8690_v16  ;;  %v7562_v59 = vld [vmem:[%s10687_s4 + $0x8] sm:$0xff]  }
 0x1a4   : > { %v8809_v35 = vmul.f32 %v8695_v14, %v8695_v14  ;;  %v1138_v25 = vmul.f32 %v1098_v17, %v8616_v57  ;;  %7813 = vtanh.f32 %v1250_v8  ;;  %v1176_v45 = vmul.f32 0.044715, %v1136_v12 }
 0x1a5   : > { %10799 = vst [vmem:[#allocation39_spill] sm:$0xff] %v8795_v53  ;;  %v10712_v53 = vmov 0.0   ;;  %v1214_v32 = vadd.f32 %v1174_v26, %v8602_v28  ;;  %v1252_v51 = vmul.f32 0.7978846, %v1212_v62  ;;  %7815 = vtanh.f32 %v1251_v5 }
 0x1a6   : > { %7102 = vmatprep.subr.bf16.mxu1 %v10712_v53  ;;  %7118 = vmatprep.mubr.msk.bf16.mxu1 %vm8010_vm1, %v10712_v53  ;;  %v8821_v17 = vmul.f32 %v8698_v9, %v8698_v9  ;;  %v8825_v8 = vmul.f32 %v8535_v15, %v8535_v15  ;;  %v8829_v12 = vmul.f32 %v8538_v27, %v8538_v27  ;;  %v1177_v5 = vmul.f32 0.044715, %v1137_v4 }
 0x1a7   : > { %7103 = vmatpush3.bf16.msra.mxu1 %v7561_v39  ;;  %v8833_v26 = vmul.f32 %v8541_v29, %v8541_v29  ;;  %v1139_v62 = vmul.f32 %v1099_v54, %v8619_v3  ;;  %v1215_v39 = vadd.f32 %v1175_v23, %v8605_v63  ;;  %v1253_v28 = vmul.f32 0.7978846, %v1213_v24  ;;  %v7563_v23 = vld [vmem:[%s10687_s4 + $0x10] sm:$0xff]  }
 0x1a8   : > { %7104 = vmatprep.subr.bf16.mxu1 %v10712_v53  ;;  %v8840_v15 = vmul.f32 %v8544_v42, %v8544_v42  ;;  %v8844_v27 = vmul.f32 %v8547_v30, %v8547_v30  ;;  %v8848_v29 = vmul.f32 %v8550_v22, %v8550_v22  ;;  %v1140_v53 = vmul.f32 %v1100_v2, %v8622_v11 }
 0x1a9   : > { %10800 = vst [vmem:[#allocation40_spill] sm:$0xff] %v8833_v26  ;;  %v1178_v26 = vmul.f32 0.044715, %v1138_v25  ;;  %v1216_v54 = vadd.f32 %v1176_v45, %v8608_v55  ;;  %v1254_v4 = vmul.f32 0.7978846, %v1214_v32  ;;  %7817 = vtanh.f32 %v1252_v51  ;;  %v10807_v55 = vld [vmem:[#allocation25_spill] sm:$0xff] }
 0x1aa   : > { %10801 = vst [vmem:[#allocation41_spill] sm:$0xff] %v8848_v29  ;;  %v1141_v24 = vmul.f32 %v8717_v1, %v8627_v48  ;;  %v1142_v63 = vmul.f32 %v8721_v58, %v8630_v10  ;;  %v1143_v29 = vmul.f32 %v8725_v36, %v8633_v0  ;;  %v1144_v25 = vmul.f32 %v8730_v31, %v8636_v20 }
 0x1ab   : > { %7105 = vmatpush3.bf16.msra.mxu1 %v7562_v59  ;;  %v10802_v2 = vmov 0.0   ;;  %v1179_v45 = vmul.f32 0.044715, %v1139_v62  ;;  %v1217_v59 = vadd.f32 %v1177_v5, %v8611_v50  ;;  %v1255_v32 = vmul.f32 0.7978846, %v1215_v39 }
 0x1ac   : > { %7106 = vmatprep.subr.bf16.mxu1 %v10802_v2  ;;  %7819 = vtanh.f32 %v1253_v28  ;;  %v1145_v51 = vmul.f32 %v8734_v34, %v8639_v18  ;;  %v8869_v1 = vmul.f32 %v8738_v47, %v8642_v41  ;;  %v8873_v58 = vmul.f32 %v8743_v37, %v8645_v52  ;;  %v7564_v28 = vld [vmem:[%s10687_s4 + $0x18] sm:$0xff]   ;;  %v10803_v37 = vld [vmem:[#allocation33_spill] sm:$0xff] }
 0x1ad   : > { %v8877_v36 = vmul.f32 %v8749_v49, %v8648_v44  ;;  %v1180_v31 = vmul.f32 0.044715, %v1140_v53  ;;  %v1218_v62 = vadd.f32 %v1178_v26, %v8616_v57  ;;  %v1256_v5 = vmul.f32 0.7978846, %v1216_v54  ;;  %v10804_v49 = vld [vmem:[#allocation34_spill] sm:$0xff]  ;;  %v10805_v26 = vld [vmem:[#allocation24_spill] sm:$0xff] }
 0x1ae   : > { %7821 = vtanh.f32 %v1254_v4  ;;  %v7814_v34 = vpop.eup %7813  ;;  %v8885_v47 = vmul.f32 %v8753_v46, %v8653_v7  ;;  %v8889_v39 = vmul.f32 %v10803_v37, %v8656_v13  ;;  %v8893_v53 = vmul.f32 %v10804_v49, %v8659_v19  ;;  %v10806_v54 = vld [vmem:[#allocation35_spill] sm:$0xff]  ;;  %v10808_v7 = vld [vmem:[#allocation36_spill] sm:$0xff]  ;;  %v10809_v13 = vld [vmem:[#allocation37_spill] sm:$0xff] }
 0x1af   : > { %7107 = vmatpush3.bf16.msra.mxu1 %v7563_v23  ;;  %v8897_v4 = vmul.f32 %v10806_v54, %v10805_v26  ;;  %v7816_v23 = vpop.eup %7815  ;;  %v1181_v57 = vmul.f32 0.044715, %v1141_v24  ;;  %v1219_v50 = vadd.f32 %v1179_v45, %v8619_v3  ;;  %v1257_v46 = vmul.f32 0.7978846, %v1217_v59  ;;  %v10810_v19 = vld [vmem:[#allocation38_spill] sm:$0xff] }
 0x1b0   : > { %7108 = vmatprep.subr.bf16.mxu1 %v10802_v2  ;;  %7823 = vtanh.f32 %v1255_v32  ;;  %v8903_v37 = vmul.f32 %v10808_v7, %v10807_v55  ;;  %v8907_v49 = vmul.f32 %v10809_v13, %v8672_v43  ;;  %v8911_v54 = vmul.f32 %v10810_v19, %v8675_v60  ;;  %v7565_v7 = vld [vmem:[%s10687_s4 + $0x20] sm:$0xff]   ;;  %v10812_v32 = vld [vmem:[#allocation39_spill] sm:$0xff] }
 0x1b1   : > { %v8915_v26 = vmul.f32 %v8782_v56, %v8678_v61  ;;  %v1182_v24 = vmul.f32 0.044715, %v1142_v63  ;;  %v1220_v45 = vadd.f32 %v1180_v31, %v8622_v11  ;;  %v1258_v59 = vmul.f32 0.7978846, %v1218_v62  ;;  %v10811_v19 = vld [vmem:[#allocation28_spill] sm:$0xff] }
 0x1b2   : > { %7825 = vtanh.f32 %v1256_v5  ;;  %v8923_v13 = vmul.f32 %v8791_v40, %v8681_v38  ;;  %v8927_v60 = vmul.f32 %v10812_v32, %v10811_v19  ;;  %v1330_v56 = vadd.f32 1.0, %v7814_v34 }
 0x1b3   : > { %7109 = vmatpush3.bf16.msra.mxu1 %v7564_v28  ;;  %v1331_v61 = vadd.f32 1.0, %v7816_v23  ;;  %v7818_v63 = vpop.eup %7817  ;;  %v1183_v31 = vmul.f32 0.044715, %v1143_v29  ;;  %v1221_v62 = vadd.f32 %v1181_v57, %v8627_v48  ;;  %v1259_v5 = vmul.f32 0.7978846, %v1219_v50 }
 0x1b4   : > { %7110 = vmatprep.subr.bf16.mxu1 %v10802_v2  ;;  %7827 = vtanh.f32 %v1257_v46  ;;  %v8933_v28 = vmul.f32 %v8799_v6, %v8687_v21  ;;  %v8937_v40 = vmul.f32 %v8805_v33, %v8690_v16  ;;  %v8941_v34 = vmul.f32 %v8809_v35, %v8695_v14  ;;  %v7566_v6 = vld [vmem:[%s10687_s4 + $0x28] sm:$0xff]  }
 0x1b5   : > { %v8945_v23 = vmul.f32 %v8821_v17, %v8698_v9  ;;  %v1184_v57 = vmul.f32 0.044715, %v1144_v25  ;;  %v1222_v50 = vadd.f32 %v1182_v24, %v8630_v10  ;;  %v1260_v46 = vmul.f32 0.7978846, %v1220_v45  ;;  %v10814_v33 = vld [vmem:[#allocation5_spill] sm:$0xff]  ;;  %v10816_v9 = vld [vmem:[#allocation7_spill] sm:$0xff] }
 0x1b6   : > { %v7820_v29 = vpop.eup %7819  ;;  %7829 = vtanh.f32 %v1258_v59  ;;  %v8953_v32 = vmul.f32 %v8825_v8, %v10814_v33  ;;  %v1332_v35 = vadd.f32 1.0, %v7818_v63  ;;  %v1370_v14 = vmul.f32 0.5, %v1330_v56  ;;  %v10815_v59 = vld [vmem:[#allocation6_spill] sm:$0xff] }
 0x1b7   : > { %10813 = vst [vmem:[#allocation33_spill] sm:$0xff] %v8945_v23  ;;  %7111 = vmatpush3.bf16.msra.mxu1 %v7565_v7  ;;  %v1371_v16 = vmul.f32 0.5, %v1331_v61  ;;  %v1185_v25 = vmul.f32 0.044715, %v1145_v51  ;;  %v1223_v24 = vadd.f32 %v1183_v31, %v8633_v0  ;;  %v1261_v45 = vmul.f32 0.7978846, %v1221_v62 }
 0x1b8   : > { %7112 = vmatprep.subr.bf16.mxu1 %v10802_v2  ;;  %v7822_v17 = vpop.eup %7821  ;;  %7831 = vtanh.f32 %v1259_v5  ;;  %v8959_v7 = vmul.f32 %v8829_v12, %v10815_v59  ;;  %v10817_v23 = vld [vmem:[#allocation40_spill] sm:$0xff]  ;;  %v8967_v8 = vmul.f32 %v8840_v15, %v8544_v42  ;;  %v1333_v61 = vadd.f32 1.0, %v7820_v29  ;;  %v7567_v12 = vld [vmem:[%s10687_s4 + $0x30] sm:$0xff]  }
 0x1b9   : > { %v8963_v21 = vmul.f32 %v10817_v23, %v10816_v9  ;;  %v1186_v51 = vmul.f32 0.044715, %v8869_v1  ;;  %v1224_v63 = vadd.f32 %v1184_v57, %v8636_v20  ;;  %v1262_v31 = vmul.f32 0.7978846, %v1222_v50  ;;  %v10818_v23 = vld [vmem:[#allocation11_spill] sm:$0xff]  ;;  %v10820_v15 = vld [vmem:[#allocation12_spill] sm:$0xff] }
 0x1ba   : > { %v7824_v56 = vpop.eup %7823  ;;  %7833 = vtanh.f32 %v1260_v46  ;;  %v1334_v62 = vadd.f32 1.0, %v7822_v17  ;;  %v1372_v5 = vmul.f32 0.5, %v1332_v35  ;;  %v8975_v9 = vmul.f32 %v1370_v14, %v10818_v23 }
 0x1bb   : > { %7113 = vmatpush3.bf16.msra.mxu1 %v7566_v6  ;;  %v8978_v42 = vmul.f32 %v1371_v16, %v10820_v15  ;;  %v1187_v29 = vmul.f32 0.044715, %v8873_v58  ;;  %v1225_v57 = vadd.f32 %v1185_v25, %v8639_v18  ;;  %v1263_v50 = vmul.f32 0.7978846, %v1223_v24  ;;  %v10822_v6 = vld [vmem:[#allocation41_spill] sm:$0xff]  ;;  %v7568_v25 = vld [vmem:[%s10687_s4 + $0x38] sm:$0xff]  }
 0x1bc   : > { %10819 = vst [vmem:[#allocation34_spill] sm:$0xff] %v8975_v9  ;;  %7114 = vmatprep.subr.bf16.mxu1 %v10802_v2  ;;  %v7826_v1 = vpop.eup %7825  ;;  %7835 = vtanh.f32 %v1261_v45  ;;  %v8985_v46 = vmul.f32 %v8844_v27, %v8547_v30  ;;  %v8989_v14 = vmul.f32 %v10822_v6, %v8550_v22  ;;  %v1335_v35 = vadd.f32 1.0, %v7824_v56  ;;  %v10823_v45 = vld [vmem:[#allocation13_spill] sm:$0xff]  ;;  %v10825_v6 = vld [vmem:[#allocation14_spill] sm:$0xff] }
 0x1bd   : > { %10821 = vst [vmem:[#allocation35_spill] sm:$0xff] %v8978_v42  ;;  %v1373_v16 = vmul.f32 0.5, %v1333_v61  ;;  %v1188_v23 = vmul.f32 0.044715, %v8877_v36  ;;  %v1226_v15 = vadd.f32 %v1186_v51, %v8642_v41  ;;  %v1264_v58 = vmul.f32 0.7978846, %v1224_v63 }
 0x1be   : > { %v7828_v17 = vpop.eup %7827  ;;  %7837 = vtanh.f32 %v1262_v31  ;;  %v1336_v27 = vadd.f32 1.0, %v7826_v1  ;;  %v1374_v24 = vmul.f32 0.5, %v1334_v62  ;;  %v8997_v30 = vmul.f32 %v1372_v5, %v10823_v45 }
 0x1bf   : > { %7115 = vmatpush3.bf16.msra.mxu1 %v7567_v12  ;;  %v1450_v61 = vadd.f32 %v8978_v42, %v8975_v9  ;;  %v1189_v56 = vmul.f32 0.044715, %v8885_v47  ;;  %v1227_v51 = vadd.f32 %v1187_v29, %v8645_v52  ;;  %v1265_v63 = vmul.f32 0.7978846, %v1225_v57  ;;  %v10827_v29 = vld [vmem:[#allocation15_spill] sm:$0xff] }
 0x1c0   : > { %10824 = vst [vmem:[#allocation25_spill] sm:$0xff] %v8997_v30  ;;  %7116 = vmatprep.subr.bf16.mxu1 %v10802_v2  ;;  %v7830_v36 = vpop.eup %7829  ;;  %7839 = vtanh.f32 %v1263_v50  ;;  %v1337_v31 = vadd.f32 1.0, %v7828_v17  ;;  %v1375_v12 = vmul.f32 0.5, %v1335_v35  ;;  %v9005_v1 = vmul.f32 %v1373_v16, %v10825_v6  ;;  %v10829_v17 = vld [vmem:[#allocation21_spill] sm:$0xff]  ;;  %v10832_v6 = vld [vmem:[#allocation22_spill] sm:$0xff] }
 0x1c1   : > { %v1451_v62 = vadd.f32 %v1450_v61, %v8997_v30  ;;  %v1190_v45 = vmul.f32 0.044715, %v8889_v39  ;;  %v1228_v42 = vadd.f32 %v1188_v23, %v8648_v44  ;;  %v1266_v9 = vmul.f32 0.7978846, %v1226_v15  ;;  %v10833_v30 = vld [vmem:[#allocation17_spill] sm:$0xff] }
 0x1c2   : > { %10826 = vst [vmem:[#allocation36_spill] sm:$0xff] %v9005_v1  ;;  %v7832_v5 = vpop.eup %7831  ;;  %7841 = vtanh.f32 %v1264_v58  ;;  %v1338_v47 = vadd.f32 1.0, %v7830_v36  ;;  %v1376_v22 = vmul.f32 0.5, %v1336_v27  ;;  %v9011_v57 = vmul.f32 %v1374_v24, %v10827_v29  ;;  %v10830_v58 = vld [vmem:[#allocation16_spill] sm:$0xff] }
 0x1c3   : > { %7117 = vmatpush3.bf16.msra.mxu1 %v7568_v25  ;;  %v1452_v50 = vadd.f32 %v1451_v62, %v9005_v1  ;;  %v1191_v16 = vmul.f32 0.044715, %v8893_v53  ;;  %v1229_v61 = vadd.f32 %v1189_v56, %v10829_v17  ;;  %v1267_v39 = vmul.f32 0.7978846, %v1227_v51 }
 0x1c4   : > { %10828 = vst [vmem:[#allocation37_spill] sm:$0xff] %v9011_v57  ;;  %7122 = vmatprep.subr.bf16.mxu1 %v10802_v2  ;;  %v7834_v35 = vpop.eup %7833  ;;  %7843 = vtanh.f32 %v1265_v63  ;;  %v1339_v23 = vadd.f32 1.0, %v7832_v5  ;;  %v1377_v15 = vmul.f32 0.5, %v1337_v31  ;;  %v9018_v25 = vmul.f32 %v1375_v12, %v10830_v58  ;;  %v10834_v12 = vld [vmem:[#allocation23_spill] sm:$0xff] }
 0x1c5   : > { %v1453_v27 = vadd.f32 %v1452_v50, %v9011_v57  ;;  %v1192_v36 = vmul.f32 0.044715, %v8897_v4  ;;  %v1230_v62 = vadd.f32 %v1190_v45, %v10832_v6  ;;  %v1268_v29 = vmul.f32 0.7978846, %v1228_v42  ;;  %v10835_v57 = vld [vmem:[#allocation18_spill] sm:$0xff] }
 0x1c6   : > { %10831 = vst [vmem:[#allocation38_spill] sm:$0xff] %v9018_v25  ;;  %v7836_v24 = vpop.eup %7835  ;;  %7845 = vtanh.f32 %v1266_v9  ;;  %v1340_v1 = vadd.f32 1.0, %v7834_v35  ;;  %v1378_v53 = vmul.f32 0.5, %v1338_v47  ;;  %v9024_v56 = vmul.f32 %v1376_v22, %v10833_v30  ;;  %v10836_v22 = vld [vmem:[#allocation24_spill] sm:$0xff] }
 0x1c7   : > { %v1454_v51 = vadd.f32 %v1453_v27, %v9018_v25  ;;  %v1193_v31 = vmul.f32 0.044715, %v8903_v37  ;;  %v1231_v5 = vadd.f32 %v1191_v16, %v10834_v12  ;;  %v1269_v50 = vmul.f32 0.7978846, %v1229_v61  ;;  %v10837_v25 = vld [vmem:[#allocation19_spill] sm:$0xff] }
 0x1c8   : > { %v7838_v63 = vpop.eup %7837  ;;  %7847 = vtanh.f32 %v1267_v39  ;;  %v1341_v58 = vadd.f32 1.0, %v7836_v24  ;;  %v1379_v4 = vmul.f32 0.5, %v1339_v23  ;;  %v9030_v45 = vmul.f32 %v1377_v15, %v10835_v57 }
 0x1c9   : > { %v1455_v42 = vadd.f32 %v1454_v51, %v9024_v56  ;;  %v1194_v30 = vmul.f32 0.044715, %v8907_v49  ;;  %v1232_v47 = vadd.f32 %v1192_v36, %v10836_v22  ;;  %v1270_v35 = vmul.f32 0.7978846, %v1230_v62 }
 0x1ca   : > { %v7840_v9 = vpop.eup %7839  ;;  %7849 = vtanh.f32 %v1268_v29  ;;  %v1342_v27 = vadd.f32 1.0, %v7838_v63  ;;  %v1380_v37 = vmul.f32 0.5, %v1340_v1  ;;  %v9036_v16 = vmul.f32 %v1378_v53, %v10837_v25 }
 0x1cb   : > { %v1456_v61 = vadd.f32 %v1455_v42, %v9030_v45  ;;  %v1195_v57 = vmul.f32 0.044715, %v8911_v54  ;;  %v1233_v23 = vadd.f32 %v1193_v31, %v10807_v55  ;;  %v1271_v15 = vmul.f32 0.7978846, %v1231_v5 }
 0x1cc   : > { %v7842_v39 = vpop.eup %7841  ;;  %7851 = vtanh.f32 %v1269_v50  ;;  %v1343_v24 = vadd.f32 1.0, %v7840_v9  ;;  %v1381_v49 = vmul.f32 0.5, %v1341_v58  ;;  %v9042_v36 = vmul.f32 %v1379_v4, %v8619_v3  ;;  %v10838_v50 = vld [vmem:[#allocation26_spill] sm:$0xff] }
 0x1cd   : > { %v1457_v62 = vadd.f32 %v1456_v61, %v9036_v16  ;;  %v1196_v25 = vmul.f32 0.044715, %v8915_v26  ;;  %v1234_v29 = vadd.f32 %v1194_v30, %v8672_v43  ;;  %v1272_v53 = vmul.f32 0.7978846, %v1232_v47 }
 0x1ce   : > { %v7844_v1 = vpop.eup %7843  ;;  %7853 = vtanh.f32 %v1270_v35  ;;  %v1344_v51 = vadd.f32 1.0, %v7842_v39  ;;  %v1382_v54 = vmul.f32 0.5, %v1342_v27  ;;  %v9048_v63 = vmul.f32 %v1380_v37, %v8622_v11  ;;  %v10839_v35 = vld [vmem:[#allocation27_spill] sm:$0xff] }
 0x1cf   : > { %v1458_v31 = vadd.f32 %v1457_v62, %v9042_v36  ;;  %v1197_v3 = vmul.f32 0.044715, %v8923_v13  ;;  %v1235_v58 = vadd.f32 %v1195_v57, %v10838_v50  ;;  %v1273_v4 = vmul.f32 0.7978846, %v1233_v23 }
 0x1d0   : > { %v7846_v5 = vpop.eup %7845  ;;  %7855 = vtanh.f32 %v1271_v15  ;;  %v1345_v42 = vadd.f32 1.0, %v7844_v1  ;;  %v1383_v26 = vmul.f32 0.5, %v1343_v24  ;;  %v9054_v9 = vmul.f32 %v1381_v49, %v8627_v48 }
 0x1d1   : > { %v1459_v30 = vadd.f32 %v1458_v31, %v9048_v63  ;;  %v1198_v11 = vmul.f32 0.044715, %v8927_v60  ;;  %v1236_v27 = vadd.f32 %v1196_v25, %v10839_v35  ;;  %v1274_v37 = vmul.f32 0.7978846, %v1234_v29 }
 0x1d2   : > { %v7848_v47 = vpop.eup %7847  ;;  %7857 = vtanh.f32 %v1272_v53  ;;  %v1346_v61 = vadd.f32 1.0, %v7846_v5  ;;  %v1384_v13 = vmul.f32 0.5, %v1344_v51  ;;  %v9060_v39 = vmul.f32 %v1382_v54, %v8630_v10 }
 0x1d3   : > { %v1460_v57 = vadd.f32 %v1459_v30, %v9054_v9  ;;  %v1199_v48 = vmul.f32 0.044715, %v8933_v28  ;;  %v1237_v15 = vadd.f32 %v1197_v3, %v8681_v38  ;;  %v1275_v24 = vmul.f32 0.7978846, %v1235_v58  ;;  %v10840_v3 = vld [vmem:[#allocation29_spill] sm:$0xff] }
 0x1d4   : > { %v7850_v23 = vpop.eup %7849  ;;  %7859 = vtanh.f32 %v1273_v4  ;;  %v1347_v49 = vadd.f32 1.0, %v7848_v47  ;;  %v1385_v60 = vmul.f32 0.5, %v1345_v42  ;;  %v9066_v62 = vmul.f32 %v1383_v26, %v8633_v0 }
 0x1d5   : > { %v1461_v1 = vadd.f32 %v1460_v57, %v9060_v39  ;;  %v1200_v10 = vmul.f32 0.044715, %v8937_v40  ;;  %v1238_v29 = vadd.f32 %v1198_v11, %v10811_v19  ;;  %v1276_v53 = vmul.f32 0.7978846, %v1236_v27  ;;  %v10841_v11 = vld [vmem:[#allocation33_spill] sm:$0xff]  ;;  %v10842_v27 = vld [vmem:[#allocation30_spill] sm:$0xff] }
 0x1d6   : > { %v7852_v25 = vpop.eup %7851  ;;  %7861 = vtanh.f32 %v1274_v37  ;;  %v1348_v51 = vadd.f32 1.0, %v7850_v23  ;;  %v1386_v28 = vmul.f32 0.5, %v1346_v61  ;;  %v9072_v54 = vmul.f32 %v1384_v13, %v8636_v20 }
 0x1d7   : > { %v1462_v31 = vadd.f32 %v1461_v1, %v9066_v62  ;;  %v1201_v0 = vmul.f32 0.044715, %v8941_v34  ;;  %v1239_v58 = vadd.f32 %v1199_v48, %v10840_v3  ;;  %v1277_v4 = vmul.f32 0.7978846, %v1237_v15  ;;  %v10843_v15 = vld [vmem:[#allocation31_spill] sm:$0xff] }
 0x1d8   : > { %v7854_v5 = vpop.eup %7853  ;;  %7863 = vtanh.f32 %v1275_v24  ;;  %v1349_v42 = vadd.f32 1.0, %v7852_v25  ;;  %v1387_v40 = vmul.f32 0.5, %v1347_v49  ;;  %v9078_v26 = vmul.f32 %v1385_v60, %v8639_v18 }
 0x1d9   : > { %v1463_v30 = vadd.f32 %v1462_v31, %v9072_v54  ;;  %v1202_v20 = vmul.f32 0.044715, %v10841_v11  ;;  %v1240_v37 = vadd.f32 %v1200_v10, %v10842_v27  ;;  %v1278_v61 = vmul.f32 0.7978846, %v1238_v29 }
 0x1da   : > { %v7856_v47 = vpop.eup %7855  ;;  %7865 = vtanh.f32 %v1276_v53  ;;  %v1350_v13 = vadd.f32 1.0, %v7854_v5  ;;  %v1388_v34 = vmul.f32 0.5, %v1348_v51  ;;  %v9084_v57 = vmul.f32 %v1386_v28, %v8642_v41  ;;  %v10844_v53 = vld [vmem:[#allocation32_spill] sm:$0xff] }
 0x1db   : > { %v1464_v23 = vadd.f32 %v1463_v30, %v9078_v26  ;;  %v1203_v18 = vmul.f32 0.044715, %v8953_v32  ;;  %v1241_v24 = vadd.f32 %v1201_v0, %v10843_v15  ;;  %v1279_v49 = vmul.f32 0.7978846, %v1239_v58 }
 0x1dc   : > { %v7858_v48 = vpop.eup %7857  ;;  %7867 = vtanh.f32 %v1277_v4  ;;  %v1351_v60 = vadd.f32 1.0, %v7856_v47  ;;  %v1389_v1 = vmul.f32 0.5, %v1349_v42  ;;  %v9090_v25 = vmul.f32 %v1387_v40, %v8645_v52 }
 0x1dd   : > { %v1465_v10 = vadd.f32 %v1464_v23, %v9084_v57  ;;  %v1204_v41 = vmul.f32 0.044715, %v8959_v7  ;;  %v1242_v51 = vadd.f32 %v1202_v20, %v10844_v53  ;;  %v1280_v28 = vmul.f32 0.7978846, %v1240_v37 }
 0x1de   : > { %v7860_v29 = vpop.eup %7859  ;;  %7869 = vtanh.f32 %v1278_v61  ;;  %v1352_v31 = vadd.f32 1.0, %v7858_v48  ;;  %v1390_v32 = vmul.f32 0.5, %v1350_v13  ;;  %v9096_v5 = vmul.f32 %v1388_v34, %v8648_v44  ;;  %v10845_v48 = vld [vmem:[#allocation7_spill] sm:$0xff] }
 0x1df   : > { %v1466_v0 = vadd.f32 %v1465_v10, %v9090_v25  ;;  %v1205_v52 = vmul.f32 0.044715, %v8963_v21  ;;  %v1243_v4 = vadd.f32 %v1203_v18, %v10814_v33  ;;  %v1281_v42 = vmul.f32 0.7978846, %v1241_v24 }
 0x1e0   : > { %v7862_v58 = vpop.eup %7861  ;;  %7871 = vtanh.f32 %v1279_v49  ;;  %v1353_v40 = vadd.f32 1.0, %v7860_v29  ;;  %v1391_v7 = vmul.f32 0.5, %v1351_v60  ;;  %v9102_v30 = vmul.f32 %v1389_v1, %v10829_v17  ;;  %v10846_v29 = vld [vmem:[#allocation8_spill] sm:$0xff] }
 0x1e1   : > { %v1467_v47 = vadd.f32 %v1466_v0, %v9096_v5  ;;  %v1206_v44 = vmul.f32 0.044715, %v8967_v8  ;;  %v1244_v20 = vadd.f32 %v1204_v41, %v10815_v59  ;;  %v1282_v37 = vmul.f32 0.7978846, %v1242_v51 }
 0x1e2   : > { %v7864_v11 = vpop.eup %7863  ;;  %7873 = vtanh.f32 %v1280_v28  ;;  %v1354_v61 = vadd.f32 1.0, %v7862_v58  ;;  %v1392_v21 = vmul.f32 0.5, %v1352_v31  ;;  %v9108_v13 = vmul.f32 %v1390_v32, %v10832_v6  ;;  %v10847_v58 = vld [vmem:[#allocation10_spill] sm:$0xff] }
 0x1e3   : > { %v1468_v34 = vadd.f32 %v1467_v47, %v9102_v30  ;;  %v1209_v17 = vmul.f32 0.044715, %v8989_v14  ;;  %v1245_v18 = vadd.f32 %v1205_v52, %v10845_v48  ;;  %v1283_v24 = vmul.f32 0.7978846, %v1243_v4  ;;  %v10848_v47 = vld [vmem:[#allocation9_spill] sm:$0xff] }
 0x1e4   : > { %v7866_v23 = vpop.eup %7865  ;;  %7875 = vtanh.f32 %v1281_v42  ;;  %v1355_v49 = vadd.f32 1.0, %v7864_v11  ;;  %v1393_v8 = vmul.f32 0.5, %v1353_v40  ;;  %v9114_v60 = vmul.f32 %v1391_v7, %v10834_v12 }
 0x1e5   : > { %v1469_v1 = vadd.f32 %v1468_v34, %v9108_v13  ;;  %v1208_v6 = vmul.f32 0.044715, %v8985_v46  ;;  %v1246_v41 = vadd.f32 %v1206_v44, %v10846_v29  ;;  %v1284_v51 = vmul.f32 0.7978846, %v1244_v20 }
 0x1e6   : > { %v7868_v10 = vpop.eup %7867  ;;  %7877 = vtanh.f32 %v1282_v37  ;;  %v1356_v28 = vadd.f32 1.0, %v7866_v23  ;;  %v1394_v14 = vmul.f32 0.5, %v1354_v61  ;;  %v9120_v31 = vmul.f32 %v1392_v21, %v10836_v22 }
 0x1e7   : > { %v1470_v32 = vadd.f32 %v1469_v1, %v9114_v60  ;;  %v1249_v12 = vadd.f32 %v1209_v17, %v10847_v58  ;;  %v1285_v52 = vmul.f32 0.7978846, %v1245_v18  ;;  %7879 = vtanh.f32 %v1283_v24 }
 0x1e8   : > { %v7870_v0 = vpop.eup %7869  ;;  %v1357_v4 = vadd.f32 1.0, %v7868_v10  ;;  %v1395_v42 = vmul.f32 0.5, %v1355_v49  ;;  %v9125_v46 = vmul.f32 %v1393_v8, %v10807_v55  ;;  %v1248_v11 = vadd.f32 %v1208_v6, %v10848_v47 }
 0x1e9   : > { %v1471_v40 = vadd.f32 %v1470_v32, %v9120_v31  ;;  %v1286_v44 = vmul.f32 0.7978846, %v1246_v41  ;;  %7881 = vtanh.f32 %v1284_v51  ;;  %v1358_v22 = vadd.f32 1.0, %v7870_v0 }
 0x1ea   : > { %v7872_v7 = vpop.eup %7871  ;;  %v1396_v20 = vmul.f32 0.5, %v1356_v28  ;;  %v9130_v37 = vmul.f32 %v1394_v14, %v8672_v43  ;;  %v1289_v34 = vmul.f32 0.7978846, %v1249_v12  ;;  %7883 = vtanh.f32 %v1285_v52 }
 0x1eb   : > { %v1472_v61 = vadd.f32 %v1471_v40, %v9125_v46  ;;  %v1359_v23 = vadd.f32 1.0, %v7872_v7  ;;  %v1397_v55 = vmul.f32 0.5, %v1357_v4  ;;  %v9134_v17 = vmul.f32 %v1395_v42, %v10838_v50 }
 0x1ec   : > { %v7874_v21 = vpop.eup %7873  ;;  %v1288_v49 = vmul.f32 0.7978846, %v1248_v11  ;;  %7885 = vtanh.f32 %v1286_v44  ;;  %v1398_v1 = vmul.f32 0.5, %v1358_v22  ;;  %v9138_v43 = vmul.f32 %v1396_v20, %v10839_v35 }
 0x1ed   : > { %v1473_v18 = vadd.f32 %v1472_v61, %v9130_v37  ;;  %v1360_v8 = vadd.f32 1.0, %v7874_v21  ;;  %7887 = vtanh.f32 %v1289_v34  ;;  %v1399_v51 = vmul.f32 0.5, %v1359_v23 }
 0x1ee   : > { %v7876_v24 = vpop.eup %7875  ;;  %v9142_v28 = vmul.f32 %v1397_v55, %v8681_v38  ;;  %7889 = vtanh.f32 %v1288_v49  ;;  %v9146_v12 = vmul.f32 %v1398_v1, %v10811_v19 }
 0x1ef   : > { %v1474_v10 = vadd.f32 %v1473_v18, %v9134_v17  ;;  %v1361_v41 = vadd.f32 1.0, %v7876_v24  ;;  %v1400_v0 = vmul.f32 0.5, %v1360_v8  ;;  %v9150_v40 = vmul.f32 %v1399_v51, %v10840_v3 }
 0x1f0   : > { %v7878_v6 = vpop.eup %7877 }
 0x1f1   : > { %v1475_v50 = vadd.f32 %v1474_v10, %v9138_v43  ;;  %v7880_v14 = vpop.eup %7879  ;;  %v1362_v32 = vadd.f32 1.0, %v7878_v6  ;;  %v1401_v42 = vmul.f32 0.5, %v1361_v41  ;;  %v9154_v22 = vmul.f32 %v1400_v0, %v10842_v27  ;;  %v10849_v6 = vld [vmem:[#allocation20_spill] sm:$0xff] }
 0x1f2   : > { %v1363_v4 = vadd.f32 1.0, %v7880_v14 }
 0x1f3   : > { %v1476_v35 = vadd.f32 %v1475_v50, %v9142_v28  ;;  %v7882_v52 = vpop.eup %7881  ;;  %v1402_v44 = vmul.f32 0.5, %v1362_v32  ;;  %v9158_v34 = vmul.f32 %v1401_v42, %v10843_v15  ;;  %v1367_v15 = vadd.f32 1.0, %v10849_v6  ;;  %v7573_v6 = vld [vmem:[%s10689_s6 + $0x20] sm:$0xff]  }
 0x1f4   : > { %v7884_v7 = vpop.eup %7883  ;;  %v1364_v11 = vadd.f32 1.0, %v7882_v52  ;;  %v1403_v21 = vmul.f32 0.5, %v1363_v4 }
 0x1f5   : > { %v1477_v38 = vadd.f32 %v1476_v35, %v9146_v12  ;;  %v1365_v61 = vadd.f32 1.0, %v7884_v7  ;;  %v9162_v18 = vmul.f32 %v1402_v44, %v10844_v53  ;;  %v1407_v0 = vmul.f32 0.5, %v1367_v15  ;;  %v7574_v15 = vld [vmem:[%s10689_s6 + $0x28] sm:$0xff]  }
 0x1f6   : > { %v7886_v19 = vpop.eup %7885  ;;  %v1404_v55 = vmul.f32 0.5, %v1364_v11  ;;  %v9166_v1 = vmul.f32 %v1403_v21, %v10814_v33 }
 0x1f7   : > { %v1478_v20 = vadd.f32 %v1477_v38, %v9150_v40  ;;  %v7888_v3 = vpop.eup %7887  ;;  %v1366_v49 = vadd.f32 1.0, %v7886_v19  ;;  %v1405_v8 = vmul.f32 0.5, %v1365_v61  ;;  %v10850_v38 = vld [vmem:[#allocation4_spill] sm:$0xff] }
 0x1f8   : > { %v7890_v27 = vpop.eup %7889  ;;  %v1369_v41 = vadd.f32 1.0, %v7888_v3  ;;  %v9171_v51 = vmul.f32 %v1404_v55, %v10815_v59  ;;  %v9183_v59 = vmul.f32 %v1407_v0, %v10850_v38 }
 0x1f9   : > { %v1479_v23 = vadd.f32 %v1478_v20, %v9154_v22  ;;  %v1368_v53 = vadd.f32 1.0, %v7890_v27  ;;  %v1406_v14 = vmul.f32 0.5, %v1366_v49  ;;  %v9175_v32 = vmul.f32 %v1405_v8, %v10845_v48  ;;  %v7570_v27 = vld [vmem:[%s10689_s6 + $0x8] sm:$0xff]   ;;  %v7571_v8 = vld [vmem:[%s10689_s6 + $0x10] sm:$0xff]  }
 0x1fa   : > { %v1409_v33 = vmul.f32 0.5, %v1369_v41  ;;  %v7575_v41 = vld [vmem:[%s10689_s6 + $0x30] sm:$0xff]  }
 0x1fb   : > { %v1480_v24 = vadd.f32 %v1479_v23, %v9158_v34  ;;  %v1408_v52 = vmul.f32 0.5, %v1368_v53  ;;  %v9179_v4 = vmul.f32 %v1406_v14, %v10846_v29  ;;  %v1514_v53 = vld [vmem:[%s10688_s5] sm:$0x1] }
 0x1fc   : > { %v9187_v11 = vmul.f32 %v1409_v33, %v10847_v58  ;;  %v7569_v58 = vld [vmem:[%s10689_s6] sm:$0xff]  }
 0x1fd   : > { %v1481_v10 = vadd.f32 %v1480_v24, %v9162_v18  ;;  %v9190_v48 = vmul.f32 %v1408_v52, %v10848_v47 }
 0x1fe   : > { %v1488_v29 = vsel %vm819_vm0, %v9187_v11, 0.0 }
 0x1ff   : > { %v1482_v50 = vadd.f32 %v1481_v10, %v9166_v1  ;;  %v7572_v10 = vld [vmem:[%s10689_s6 + $0x18] sm:$0xff]  }
 0x201   : > { %v1483_v35 = vadd.f32 %v1482_v50, %v9171_v51  ;;  %v7576_v50 = vld [vmem:[%s10689_s6 + $0x38] sm:$0xff]  }
 0x203   : > { %v1484_v42 = vadd.f32 %v1483_v35, %v9175_v32 }
 0x205   : > { %v1485_v7 = vadd.f32 %v1484_v42, %v9179_v4 }
 0x207   : > { %v1486_v44 = vadd.f32 %v1485_v7, %v9183_v59  ;;  %v7577_v7 = vld [vmem:[%s10684_s1 + $0x140] sm:$0xff]  }
 0x208   : > { %7142 = vmatprep.subr.bf16.mxu0 %v7577_v7 }
 0x209   : > { %v1487_v20 = vadd.f32 %v1486_v44, %v9190_v48  ;;  %v7578_v44 = vld [vmem:[%s10684_s1 + $0x100] sm:$0xff]   ;;  %7143 = vmatpush3.bf16.msra.mxu0 %v7577_v7 }
 0x20b   : > { %v1489_v19 = vadd.f32 %v1488_v29, %v1487_v20  ;;  %v7579_v20 = vld [vmem:[%s10684_s1 + $0xc0] sm:$0xff]   ;;  %v7580_v29 = vld [vmem:[%s10684_s1 + $0x148] sm:$0xff]  }
 0x20c   : > { %7144 = vmatprep.subr.bf16.mxu0 %v7580_v29 }
 0x20d   : > { %v1490_v61 = vrot.slane %v1489_v19, 4  ;;  %7145 = vmatpush3.bf16.msra.mxu0 %v7580_v29 }
 0x20f   : > { %v1491_v21 = vadd.f32 %v1490_v61, %v1489_v19  ;;  %v7581_v19 = vld [vmem:[%s10684_s1 + $0x108] sm:$0xff]  }
 0x210   : > { %v7582_v61 = vld [vmem:[%s10684_s1 + $0xc8] sm:$0xff]  }
 0x211   : > { %v1492_v23 = vrot.slane %v1491_v21, 2 }
 0x213   : > { %v1493_v3 = vadd.f32 %v1492_v23, %v1491_v21  ;;  %v7583_v21 = vld [vmem:[%s10684_s1 + $0x110] sm:$0xff]  }
 0x214   : > { %v7584_v23 = vld [vmem:[%s10684_s1 + $0x150] sm:$0xff]  }
 0x215   : > { %v1494_v55 = vrot.slane %v1493_v3, 1  ;;  %7146 = vmatprep.subr.bf16.mxu0 %v7584_v23 }
 0x216   : > { %7147 = vmatpush3.bf16.msra.mxu0 %v7584_v23 }
 0x217   : > { %v1495_v24 = vadd.f32 %v1494_v55, %v1493_v3  ;;  %v7585_v3 = vld [vmem:[%s10684_s1 + $0xd0] sm:$0xff]   ;;  %v7586_v55 = vld [vmem:[%s10684_s1 + $0x118] sm:$0xff]  }
 0x219   : > { %v1496_v49 = vmul.f32 0.0031347962, %v1495_v24  ;;  %v7587_v24 = vld [vmem:[%s10684_s1 + $0x158] sm:$0xff]  }
 0x21a   : > { %7148 = vmatprep.subr.bf16.mxu0 %v7587_v24 }
 0x21b   : > { %v1497_v47 = vpack.c.bf16 %v1496_v49, %v1496_v49  ;;  %v7588_v49 = vld [vmem:[%s10684_s1 + $0xd8] sm:$0xff]   ;;  %7149 = vmatpush3.bf16.msra.mxu0 %v7587_v24 }
 0x21d   : > { %7119 = vmatmul.mubr.bf16.vlgmr.msra.gmra.mrb[0].mxu1 %v1497_v47  ;;  %v7590_v47 = vld [vmem:[%s10684_s1 + $0x160] sm:$0xff]  }
 0x21e   : > { %7123 = vmatpush3.bf16.msra.mxu1 %v7569_v58  ;;  %7138 = vmatprep.mubr.msk.bf16.mxu1 %vm8010_vm1, %v10802_v2  ;;  %v7589_v58 = vld [vmem:[%s10684_s1 + $0x120] sm:$0xff]  }
 0x21f   : > { %7124 = vmatprep.subr.bf16.mxu1 %v10802_v2  ;;  %7150 = vmatprep.subr.bf16.mxu0 %v7590_v47 }
 0x220   : > { %7151 = vmatpush3.bf16.msra.mxu0 %v7590_v47  ;;  %v10853_v47 = vld [vmem:[#allocation25_spill] sm:$0xff] }
 0x222   : > { %7125 = vmatpush3.bf16.msra.mxu1 %v7570_v27  ;;  %v7591_v27 = vld [vmem:[%s10684_s1 + $0xe0] sm:$0xff]  }
 0x223   : > { %7126 = vmatprep.subr.bf16.mxu1 %v10802_v2 }
 0x226   : > { %7127 = vmatpush3.bf16.msra.mxu1 %v7571_v8  ;;  %v7592_v8 = vld [vmem:[%s10684_s1 + $0x128] sm:$0xff]  }
 0x227   : > { %7128 = vmatprep.subr.bf16.mxu1 %v10802_v2 }
 0x22a   : > { %7129 = vmatpush3.bf16.msra.mxu1 %v7572_v10  ;;  %v7593_v10 = vld [vmem:[%s10684_s1 + $0x168] sm:$0xff]  }
 0x22b   : > { %7130 = vmatprep.subr.bf16.mxu1 %v10802_v2  ;;  %7152 = vmatprep.subr.bf16.mxu0 %v7593_v10 }
 0x22c   : > { %7153 = vmatpush3.bf16.msra.mxu0 %v7593_v10 }
 0x22e   : > { %7131 = vmatpush3.bf16.msra.mxu1 %v7573_v6  ;;  %v7594_v6 = vld [vmem:[%s10684_s1 + $0xe8] sm:$0xff]  }
 0x22f   : > { %7132 = vmatprep.subr.bf16.mxu1 %v10802_v2 }
 0x232   : > { %7133 = vmatpush3.bf16.msra.mxu1 %v7574_v15  ;;  %v7595_v15 = vld [vmem:[%s10684_s1 + $0x130] sm:$0xff]  }
 0x233   : > { %7134 = vmatprep.subr.bf16.mxu1 %v10802_v2 }
 0x236   : > { %7135 = vmatpush3.bf16.msra.mxu1 %v7575_v41  ;;  %v7596_v41 = vld [vmem:[%s10684_s1 + $0x170] sm:$0xff]  }
 0x237   : > { %7136 = vmatprep.subr.bf16.mxu1 %v10802_v2  ;;  %7154 = vmatprep.subr.bf16.mxu0 %v7596_v41 }
 0x238   : > { %7155 = vmatpush3.bf16.msra.mxu0 %v7596_v41  ;;  %v10856_v41 = vld [vmem:[#allocation38_spill] sm:$0xff] }
 0x23a   : > { %7137 = vmatpush3.bf16.msra.mxu1 %v7576_v50  ;;  %v7597_v50 = vld [vmem:[%s10684_s1 + $0xf0] sm:$0xff]  }
 0x23b   : > { %6649 = vmatprep.subr.bf16.mxu1 %v7578_v44 }
 0x2f0   : > { %v1597_v14 = vpop.f32.mrb[0].mxu1 }
 0x2f1   : > { %v1598_v0 = vadd.f32 %v1597_v14, %v1514_v53  ;;  %v7120_v35 = vpop.f32.mrb[1].mxu1  ;;  %v7598_v53 = vld [vmem:[%s10684_s1 + $0x138] sm:$0xff]  }
 0x2f2   : > { %v1600_v33 = vpop.f32.mrb[2].mxu1  ;;  %v7599_v14 = vld [vmem:[%s10684_s1 + $0x178] sm:$0xff]   ;;  %v1621_v35 = vld [vmem:[%s10690_s7] sm:$0x1] }
 0x2f3   : > { %v1603_v52 = vmax.f32 %v1598_v0, 0.0  ;;  %v7121_v42 = vpop.f32.mrb[3].mxu1  ;;  %v7600_v0 = vld [vmem:[%s10684_s1 + $0xf8] sm:$0xff]   ;;  %7156 = vmatprep.subr.bf16.mxu0 %v7599_v14 }
 0x2f4   : > { %7157 = vmatpush3.bf16.msra.mxu0 %v7599_v14 }
 0x2f5   : > { %v1604_v38 = vpack.c.bf16 %v1603_v52, %v1603_v52  ;;  %7178 = vmatprep.subr.bf16.mxu0 %v10802_v2 }
 0x2f7   : > { %7139 = vmatmul.mubr.bf16.vlgmr.msra.gmra.mrb[4].mxu1 %v1604_v38 }
 0x2f8   : > { %6650 = vmatpush3.bf16.msra.mxu1 %v7579_v20 }
 0x2f9   : > { %6651 = vmatprep.subr.bf16.mxu1 %v7581_v19  ;;  %v1716_v19 = vlaneseq }
 0x2fc   : > { %6652 = vmatpush3.bf16.msra.mxu1 %v7582_v61  ;;  %v1717_v61 = vshrl.u32 %v1716_v19, 7 }
 0x2fd   : > { %6653 = vmatprep.subr.bf16.mxu1 %v7583_v21 }
 0x2fe   : > { %v9309_v21 = vsub.s32 0, %v1717_v61 }
 0x300   : > { %6654 = vmatpush3.bf16.msra.mxu1 %v7585_v3 }
 0x301   : > { %6655 = vmatprep.subr.bf16.mxu1 %v7586_v55  ;;  %v10851_v55 = vld [vmem:[#allocation34_spill] sm:$0xff] }
 0x304   : > { %6656 = vmatpush3.bf16.msra.mxu1 %v7588_v49  ;;  %v10852_v49 = vld [vmem:[#allocation35_spill] sm:$0xff] }
 0x305   : > { %6657 = vmatprep.subr.bf16.mxu1 %v7589_v58 }
 0x308   : > { %6658 = vmatpush3.bf16.msra.mxu1 %v7591_v27 }
 0x309   : > { %6659 = vmatprep.subr.bf16.mxu1 %v7592_v8  ;;  %v10854_v8 = vld [vmem:[#allocation36_spill] sm:$0xff] }
 0x30c   : > { %6660 = vmatpush3.bf16.msra.mxu1 %v7594_v6  ;;  %v10855_v6 = vld [vmem:[#allocation37_spill] sm:$0xff] }
 0x30d   : > { %6661 = vmatprep.subr.bf16.mxu1 %v7595_v15 }
 0x310   : > { %6662 = vmatpush3.bf16.msra.mxu1 %v7597_v50 }
 0x311   : > { %6663 = vmatprep.subr.bf16.mxu1 %v7598_v53 }
 0x314   : > { %6664 = vmatpush3.bf16.msra.mxu1 %v7600_v0 }
 0x315   : > { %7198 = vmatprep.subr.bf16.mxu1 %v10802_v2 }
 0x3ca   : > { %v1704_v33 = vpop.f32.mrb[4].mxu1 }
 0x3cb   : > { %v1705_v52 = vadd.f32 %v1704_v33, %v1621_v35  ;;  %v7140_v42 = vpop.f32.mrb[5].mxu1 }
 0x3cc   : > { %v1707_v38 = vpop.f32.mrb[6].mxu1 }
 0x3cd   : > { %v5907_v7 = vmul.f32 -1.442695, %v1705_v52  ;;  %v7141_v44 = vpop.f32.mrb[7].mxu1 }
 0x3cf   : > { %7891 = vpow2.f32 %v5907_v7 }
 0x3d9   : > { %v7892_v20 = vpop.eup %7891 }
 0x3da   : > { %v1713_v29 = vadd.f32 1.0, %v7892_v20 }
 0x3dc   : > { %7893 = vrcp.f32 %v1713_v29 }
 0x3e6   : > { %v7894_v23 = vpop.eup %7893 }
 0x3e7   : > { %v9312_v3 = vrot.slane %v7894_v23, %v9309_v21 }
 0x3e9   : > { %v1720_v24 = vmul.f32 %v9312_v3, %v10851_v55  ;;  %v1721_v58 = vmul.f32 %v9312_v3, %v10852_v49  ;;  %v1722_v27 = vmul.f32 %v9312_v3, %v10853_v47  ;;  %v1723_v10 = vmul.f32 %v9312_v3, %v10854_v8 }
 0x3ea   : > { %v1724_v15 = vmul.f32 %v9312_v3, %v10855_v6  ;;  %v1725_v50 = vmul.f32 %v9312_v3, %v10856_v41  ;;  %v1726_v53 = vmul.f32 %v9312_v3, %v9024_v56  ;;  %v1727_v14 = vmul.f32 %v9312_v3, %v9030_v45 }
 0x3eb   : > { %v1728_v0 = vmul.f32 %v9312_v3, %v9036_v16  ;;  %v1729_v35 = vmul.f32 %v9312_v3, %v9042_v36  ;;  %v1730_v33 = vmul.f32 %v9312_v3, %v9048_v63  ;;  %v1731_v52 = vmul.f32 %v9312_v3, %v9054_v9  ;;  %1760 = vst [vmem:[#allocation2] sm:$0xff] %v1720_v24 }
 0x3ec   : > { %1761 = vst [vmem:[#allocation2 + $0x8] sm:$0xff] %v1721_v58  ;;  %1762 = vst [vmem:[#allocation2 + $0x10] sm:$0xff] %v1722_v27  ;;  %v1732_v56 = vmul.f32 %v9312_v3, %v9060_v39  ;;  %v1733_v45 = vmul.f32 %v9312_v3, %v9066_v62  ;;  %v1734_v16 = vmul.f32 %v9312_v3, %v9072_v54 }
 0x3ed   : > { %1763 = vst [vmem:[#allocation2 + $0x18] sm:$0xff] %v1723_v10  ;;  %v1735_v36 = vmul.f32 %v9312_v3, %v9078_v26  ;;  %1764 = vst [vmem:[#allocation2 + $0x20] sm:$0xff] %v1724_v15  ;;  %v1736_v63 = vmul.f32 %v9312_v3, %v9084_v57  ;;  %v1737_v9 = vmul.f32 %v9312_v3, %v9090_v25 }
 0x3ee   : > { %1765 = vst [vmem:[#allocation2 + $0x28] sm:$0xff] %v1725_v50  ;;  %1766 = vst [vmem:[#allocation2 + $0x30] sm:$0xff] %v1726_v53  ;;  %v1738_v39 = vmul.f32 %v9312_v3, %v9096_v5  ;;  %v1739_v62 = vmul.f32 %v9312_v3, %v9102_v30  ;;  %v1740_v54 = vmul.f32 %v9312_v3, %v9108_v13 }
 0x3ef   : > { %1767 = vst [vmem:[#allocation2 + $0x38] sm:$0xff] %v1727_v14  ;;  %1768 = vst [vmem:[#allocation2 + $0x40] sm:$0xff] %v1728_v0  ;;  %v1741_v26 = vmul.f32 %v9312_v3, %v9114_v60  ;;  %v1742_v57 = vmul.f32 %v9312_v3, %v9120_v31  ;;  %v1743_v25 = vmul.f32 %v9312_v3, %v9125_v46 }
 0x3f0   : > { %1769 = vst [vmem:[#allocation2 + $0x48] sm:$0xff] %v1729_v35  ;;  %1770 = vst [vmem:[#allocation2 + $0x50] sm:$0xff] %v1730_v33  ;;  %v1744_v5 = vmul.f32 %v9312_v3, %v9130_v37  ;;  %v1745_v30 = vmul.f32 %v9312_v3, %v9134_v17  ;;  %v1746_v13 = vmul.f32 %v9312_v3, %v9138_v43 }
 0x3f1   : > { %1771 = vst [vmem:[#allocation2 + $0x58] sm:$0xff] %v1731_v52  ;;  %1772 = vst [vmem:[#allocation2 + $0x60] sm:$0xff] %v1732_v56  ;;  %v1747_v60 = vmul.f32 %v9312_v3, %v9142_v28  ;;  %v1748_v31 = vmul.f32 %v9312_v3, %v9146_v12  ;;  %v1749_v46 = vmul.f32 %v9312_v3, %v9150_v40 }
 0x3f2   : > { %1773 = vst [vmem:[#allocation2 + $0x68] sm:$0xff] %v1733_v45  ;;  %1774 = vst [vmem:[#allocation2 + $0x70] sm:$0xff] %v1734_v16  ;;  %v1750_v37 = vmul.f32 %v9312_v3, %v9154_v22  ;;  %v1751_v17 = vmul.f32 %v9312_v3, %v9158_v34  ;;  %v1752_v43 = vmul.f32 %v9312_v3, %v9162_v18 }
 0x3f3   : > { %1775 = vst [vmem:[#allocation2 + $0x78] sm:$0xff] %v1735_v36  ;;  %1776 = vst [vmem:[#allocation2 + $0x80] sm:$0xff] %v1736_v63  ;;  %v1753_v28 = vmul.f32 %v9312_v3, %v9166_v1  ;;  %v1754_v12 = vmul.f32 %v9312_v3, %v9171_v51  ;;  %v1755_v40 = vmul.f32 %v9312_v3, %v9175_v32  ;;  %v1840_v51 = vld [vmem:[#allocation2 + $0x1] ss:$2 sm:$0xff]  ;;  %v1880_v42 = vld [vmem:[#allocation2 + $0x2] ss:$2 sm:$0xff] }
 0x3f4   : > { %1777 = vst [vmem:[#allocation2 + $0x88] sm:$0xff] %v1737_v9  ;;  %1778 = vst [vmem:[#allocation2 + $0x90] sm:$0xff] %v1738_v39  ;;  %v1756_v22 = vmul.f32 %v9312_v3, %v9179_v4  ;;  %v1757_v34 = vmul.f32 %v9312_v3, %v9183_v59  ;;  %v1758_v18 = vmul.f32 %v9312_v3, %v9190_v48  ;;  %v1842_v32 = vld [vmem:[#allocation2 + $0x11] ss:$2 sm:$0xff]  ;;  %v1882_v38 = vld [vmem:[#allocation2 + $0x12] ss:$2 sm:$0xff] }
 0x3f5   : > { %1779 = vst [vmem:[#allocation2 + $0x98] sm:$0xff] %v1739_v62  ;;  %1780 = vst [vmem:[#allocation2 + $0xa0] sm:$0xff] %v1740_v54  ;;  %v1759_v1 = vmul.f32 %v9312_v3, %v9187_v11  ;;  %v1920_v4 = vpack.c.bf16 %v1842_v32, %v1840_v51  ;;  %v1800_v59 = vld [vmem:[#allocation2] ss:$2 sm:$0xff]  ;;  %v1802_v7 = vld [vmem:[#allocation2 + $0x10] ss:$2 sm:$0xff]  ;;  %v1921_v11 = vpack.c.bf16 %v1882_v38, %v1880_v42 }
 0x3f6   : > { %1781 = vst [vmem:[#allocation2 + $0xa8] sm:$0xff] %v1741_v26  ;;  %1782 = vst [vmem:[#allocation2 + $0xb0] sm:$0xff] %v1742_v57  ;;  %v1919_v48 = vpack.c.bf16 %v1802_v7, %v1800_v59  ;;  %v1884_v44 = vld [vmem:[#allocation2 + $0x22] ss:$2 sm:$0xff]  ;;  %v1886_v20 = vld [vmem:[#allocation2 + $0x32] ss:$2 sm:$0xff] }
 0x3f7   : > { %1783 = vst [vmem:[#allocation2 + $0xb8] sm:$0xff] %v1743_v25  ;;  %1784 = vst [vmem:[#allocation2 + $0xc0] sm:$0xff] %v1744_v5  ;;  %v1844_v29 = vld [vmem:[#allocation2 + $0x21] ss:$2 sm:$0xff]  ;;  %2179 = vmatprep.mubr.bf16.mxu1 %v1920_v4  ;;  %v1924_v19 = vpack.c.bf16 %v1886_v20, %v1884_v44  ;;  %v1846_v61 = vld [vmem:[#allocation2 + $0x31] ss:$2 sm:$0xff]  ;;  %7158 = vmatprep.mubr.bf16.mxu0 %v1921_v11 }
 0x3f8   : > { %1785 = vst [vmem:[#allocation2 + $0xc8] sm:$0xff] %v1745_v30  ;;  %1786 = vst [vmem:[#allocation2 + $0xd0] sm:$0xff] %v1746_v13  ;;  %v1888_v23 = vld [vmem:[#allocation2 + $0x42] ss:$2 sm:$0xff]  ;;  %v1890_v3 = vld [vmem:[#allocation2 + $0x52] ss:$2 sm:$0xff]  ;;  %2180 = vmatmul.mubr.bf16.vlgmr.msra.gmra.mrb[8].mxu1 %v1919_v48  ;;  %v1923_v55 = vpack.c.bf16 %v1846_v61, %v1844_v29 }
 0x3f9   : > { %1787 = vst [vmem:[#allocation2 + $0xd8] sm:$0xff] %v1747_v60  ;;  %1788 = vst [vmem:[#allocation2 + $0xe0] sm:$0xff] %v1748_v31  ;;  %v1927_v24 = vpack.c.bf16 %v1890_v3, %v1888_v23  ;;  %7159 = vmatmul.mubr.bf16.vlgmr.msra.gmra.mrb[40].mxu0 %v1924_v19  ;;  %v1804_v49 = vld [vmem:[#allocation2 + $0x20] ss:$2 sm:$0xff]  ;;  %v1806_v58 = vld [vmem:[#allocation2 + $0x30] ss:$2 sm:$0xff] }
 0x3fa   : > { %1789 = vst [vmem:[#allocation2 + $0xe8] sm:$0xff] %v1749_v46  ;;  %1790 = vst [vmem:[#allocation2 + $0xf0] sm:$0xff] %v1750_v37  ;;  %2187 = vmatprep.mubr.bf16.mxu1 %v1923_v55  ;;  %v1892_v47 = vld [vmem:[#allocation2 + $0x62] ss:$2 sm:$0xff]  ;;  %v1894_v27 = vld [vmem:[#allocation2 + $0x72] ss:$2 sm:$0xff]  ;;  %v1922_v41 = vpack.c.bf16 %v1806_v58, %v1804_v49 }
 0x3fb   : > { %1791 = vst [vmem:[#allocation2 + $0xf8] sm:$0xff] %v1751_v17  ;;  %1792 = vst [vmem:[#allocation2 + $0x100] sm:$0xff] %v1752_v43  ;;  %7162 = vmatprep.mubr.bf16.mxu0 %v1927_v24  ;;  %v1848_v8 = vld [vmem:[#allocation2 + $0x41] ss:$2 sm:$0xff]  ;;  %v1850_v10 = vld [vmem:[#allocation2 + $0x51] ss:$2 sm:$0xff]  ;;  %v1930_v50 = vpack.c.bf16 %v1894_v27, %v1892_v47 }
 0x3fc   : > { %1793 = vst [vmem:[#allocation2 + $0x108] sm:$0xff] %v1753_v28  ;;  %1794 = vst [vmem:[#allocation2 + $0x110] sm:$0xff] %v1754_v12  ;;  %v1896_v6 = vld [vmem:[#allocation2 + $0x82] ss:$2 sm:$0xff]  ;;  %v1898_v15 = vld [vmem:[#allocation2 + $0x92] ss:$2 sm:$0xff]  ;;  %v1926_v53 = vpack.c.bf16 %v1850_v10, %v1848_v8 }
 0x3fd   : > { %1795 = vst [vmem:[#allocation2 + $0x118] sm:$0xff] %v1755_v40  ;;  %1796 = vst [vmem:[#allocation2 + $0x120] sm:$0xff] %v1756_v22  ;;  %v1933_v14 = vpack.c.bf16 %v1898_v15, %v1896_v6  ;;  %v1808_v0 = vld [vmem:[#allocation2 + $0x40] ss:$2 sm:$0xff]  ;;  %v1810_v35 = vld [vmem:[#allocation2 + $0x50] ss:$2 sm:$0xff] }
 0x3fe   : > { %1797 = vst [vmem:[#allocation2 + $0x128] sm:$0xff] %v1757_v34  ;;  %1798 = vst [vmem:[#allocation2 + $0x130] sm:$0xff] %v1758_v18  ;;  %v1900_v33 = vld [vmem:[#allocation2 + $0xa2] ss:$2 sm:$0xff]  ;;  %v1902_v52 = vld [vmem:[#allocation2 + $0xb2] ss:$2 sm:$0xff]  ;;  %v1925_v63 = vpack.c.bf16 %v1810_v35, %v1808_v0 }
 0x3ff   : > { %1799 = vst [vmem:[#allocation2 + $0x138] sm:$0x7f] %v1759_v1  ;;  %v1852_v56 = vld [vmem:[#allocation2 + $0x61] ss:$2 sm:$0xff]  ;;  %v1854_v45 = vld [vmem:[#allocation2 + $0x71] ss:$2 sm:$0xff]  ;;  %v1936_v9 = vpack.c.bf16 %v1902_v52, %v1900_v33 }
 0x400   : > { %2188 = vmatmul.mubr.bf16.gmra.mrb[12].mxu1 %v1922_v41  ;;  %v1904_v16 = vld [vmem:[#allocation2 + $0xc2] ss:$2 sm:$0xff]  ;;  %v1906_v36 = vld [vmem:[#allocation2 + $0xd2] ss:$2 sm:$0xff]  ;;  %v1929_v39 = vpack.c.bf16 %v1854_v45, %v1852_v56  ;;  %v1856_v5 = vld [vmem:[#allocation2 + $0x81] ss:$2 sm:$0xff] }
 0x401   : > { %7163 = vmatmul.mubr.bf16.gmra.mrb[44].mxu0 %v1930_v50  ;;  %2195 = vmatprep.mubr.bf16.mxu1 %v1926_v53  ;;  %v1939_v62 = vpack.c.bf16 %v1906_v36, %v1904_v16  ;;  %v1812_v54 = vld [vmem:[#allocation2 + $0x60] ss:$2 sm:$0xff]  ;;  %v1814_v26 = vld [vmem:[#allocation2 + $0x70] ss:$2 sm:$0xff]  ;;  %v1858_v30 = vld [vmem:[#allocation2 + $0x91] ss:$2 sm:$0xff] }
 0x402   : > { %7166 = vmatprep.mubr.bf16.mxu0 %v1933_v14  ;;  %v1908_v57 = vld [vmem:[#allocation2 + $0xe2] ss:$2 sm:$0xff]  ;;  %v1910_v25 = vld [vmem:[#allocation2 + $0xf2] ss:$2 sm:$0xff]  ;;  %v1928_v31 = vpack.c.bf16 %v1814_v26, %v1812_v54  ;;  %v1932_v37 = vpack.c.bf16 %v1858_v30, %v1856_v5  ;;  %v1860_v22 = vld [vmem:[#allocation2 + $0xa1] ss:$2 sm:$0xff] }
 0x403   : > { %v1912_v13 = vld [vmem:[#allocation2 + $0x102] ss:$2 sm:$0xff]  ;;  %v1942_v46 = vpack.c.bf16 %v1910_v25, %v1908_v57  ;;  %v1862_v34 = vld [vmem:[#allocation2 + $0xb1] ss:$2 sm:$0xff]  ;;  %v1864_v4 = vld [vmem:[#allocation2 + $0xc1] ss:$2 sm:$0xff] }
 0x404   : > { %v1914_v60 = vld [vmem:[#allocation2 + $0x112] ss:$2 sm:$0xff]  ;;  %v1935_v51 = vpack.c.bf16 %v1862_v34, %v1860_v22  ;;  %v1866_v38 = vld [vmem:[#allocation2 + $0xd1] ss:$2 sm:$0xff]  ;;  %v1868_v44 = vld [vmem:[#allocation2 + $0xe1] ss:$2 sm:$0xff] }
 0x405   : > { %v1945_v17 = vpack.c.bf16 %v1914_v60, %v1912_v13  ;;  %v1816_v43 = vld [vmem:[#allocation2 + $0x80] ss:$2 sm:$0xff]  ;;  %v1818_v28 = vld [vmem:[#allocation2 + $0x90] ss:$2 sm:$0xff]  ;;  %v1938_v7 = vpack.c.bf16 %v1866_v38, %v1864_v4  ;;  %v1870_v20 = vld [vmem:[#allocation2 + $0xf1] ss:$2 sm:$0xff] }
 0x406   : > { %v1918_v12 = vld [vmem:[#allocation2 + $0x132] ss:$2 sm:$0x7f]  ;;  %v1916_v40 = vld [vmem:[#allocation2 + $0x122] ss:$2 sm:$0xff]  ;;  %v1931_v18 = vpack.c.bf16 %v1818_v28, %v1816_v43  ;;  %v1941_v19 = vpack.c.bf16 %v1870_v20, %v1868_v44 }
 0x407   : > { %v1948_v1 = vpack.c.bf16 %v1918_v12, %v1916_v40  ;;  %v1820_v32 = vld [vmem:[#allocation2 + $0xa0] ss:$2 sm:$0xff]  ;;  %v1822_v42 = vld [vmem:[#allocation2 + $0xb0] ss:$2 sm:$0xff]  ;;  %v1872_v3 = vld [vmem:[#allocation2 + $0x101] ss:$2 sm:$0xff] }
 0x408   : > { %2196 = vmatmul.mubr.bf16.gmra.mrb[16].mxu1 %v1925_v63  ;;  %v1934_v59 = vpack.c.bf16 %v1822_v42, %v1820_v32  ;;  %v1824_v11 = vld [vmem:[#allocation2 + $0xc0] ss:$2 sm:$0xff]  ;;  %v1826_v48 = vld [vmem:[#allocation2 + $0xd0] ss:$2 sm:$0xff]  ;;  %v1874_v55 = vld [vmem:[#allocation2 + $0x111] ss:$2 sm:$0xff] }
 0x409   : > { %7167 = vmatmul.mubr.bf16.gmra.mrb[48].mxu0 %v1936_v9  ;;  %2203 = vmatprep.mubr.bf16.mxu1 %v1929_v39  ;;  %v1937_v29 = vpack.c.bf16 %v1826_v48, %v1824_v11  ;;  %v1828_v61 = vld [vmem:[#allocation2 + $0xe0] ss:$2 sm:$0xff]  ;;  %v1830_v23 = vld [vmem:[#allocation2 + $0xf0] ss:$2 sm:$0xff]  ;;  %v1944_v49 = vpack.c.bf16 %v1874_v55, %v1872_v3  ;;  %v1876_v27 = vld [vmem:[#allocation2 + $0x121] ss:$2 sm:$0xff] }
 0x40a   : > { %7170 = vmatprep.mubr.bf16.mxu0 %v1939_v62  ;;  %v1940_v24 = vpack.c.bf16 %v1830_v23, %v1828_v61  ;;  %v1832_v58 = vld [vmem:[#allocation2 + $0x100] ss:$2 sm:$0xff]  ;;  %v1834_v47 = vld [vmem:[#allocation2 + $0x110] ss:$2 sm:$0xff]  ;;  %v9423_v36 = vld [vmem:[%s10685_s2 + $0x1] ss:$0 sm:$0xff] }
 0x40b   : > { %v1878_v8 = vld [vmem:[#allocation2 + $0x131] ss:$2 sm:$0x7f]  ;;  %v1943_v10 = vpack.c.bf16 %v1834_v47, %v1832_v58  ;;  %v1836_v15 = vld [vmem:[#allocation2 + $0x120] ss:$2 sm:$0xff] }
 0x40c   : > { %v1947_v6 = vpack.c.bf16 %v1878_v8, %v1876_v27  ;;  %v1838_v41 = vld [vmem:[#allocation2 + $0x130] ss:$2 sm:$0x7f]  ;;  %v7601_v53 = vld [vmem:[%s10687_s4 + $0x40] sm:$0xff]   ;;  %v7602_v14 = vld [vmem:[%s10687_s4 + $0x48] sm:$0xff]  }
 0x40d   : > { %v1946_v50 = vpack.c.bf16 %v1838_v41, %v1836_v15  ;;  %7179 = vmatpush3.bf16.msra.mxu0 %v7601_v53  ;;  %v7603_v0 = vld [vmem:[%s10687_s4 + $0x50] sm:$0xff]   ;;  %v7604_v35 = vld [vmem:[%s10687_s4 + $0x58] sm:$0xff]   ;;  %v7605_v33 = vld [vmem:[%s10687_s4 + $0x60] sm:$0xff]  }
 0x40e   : > { %7180 = vmatprep.subr.bf16.mxu0 %v10802_v2  ;;  %v7609_v56 = vld [vmem:[%s10689_s6 + $0x40] sm:$0xff]   ;;  %v7606_v62 = vld [vmem:[%s10687_s4 + $0x68] sm:$0xff]  }
 0x40f   : > { %7199 = vmatpush3.bf16.msra.mxu1 %v7609_v56  ;;  %v7610_v54 = vld [vmem:[%s10689_s6 + $0x48] sm:$0xff]  }
 0x410   : > { %2204 = vmatmul.mubr.bf16.gmra.mrb[20].mxu1 %v1928_v31  ;;  %7200 = vmatprep.subr.bf16.mxu1 %v10802_v2  ;;  %v7607_v31 = vld [vmem:[%s10687_s4 + $0x70] sm:$0xff]  }
 0x411   : > { %7171 = vmatmul.mubr.bf16.gmra.mrb[52].mxu0 %v1942_v46  ;;  %2211 = vmatprep.mubr.bf16.mxu1 %v1932_v37  ;;  %v7611_v46 = vld [vmem:[%s10689_s6 + $0x50] sm:$0xff]  }
 0x412   : > { %7174 = vmatprep.mubr.bf16.mxu0 %v1945_v17  ;;  %7181 = vmatpush3.bf16.msra.mxu0 %v7602_v14 }
 0x413   : > { %7182 = vmatprep.subr.bf16.mxu0 %v10802_v2  ;;  %7201 = vmatpush3.bf16.msra.mxu1 %v7610_v54 }
 0x414   : > { %7202 = vmatprep.subr.bf16.mxu1 %v10802_v2 }
 0x416   : > { %7183 = vmatpush3.bf16.msra.mxu0 %v7603_v0 }
 0x417   : > { %7184 = vmatprep.subr.bf16.mxu0 %v10802_v2  ;;  %7203 = vmatpush3.bf16.msra.mxu1 %v7611_v46 }
 0x418   : > { %2212 = vmatmul.mubr.bf16.gmra.mrb[24].mxu1 %v1931_v18  ;;  %7204 = vmatprep.subr.bf16.mxu1 %v10802_v2 }
 0x419   : > { %7175 = vmatmul.mubr.bf16.gmra.mrb[56].mxu0 %v1948_v1  ;;  %2219 = vmatprep.mubr.bf16.mxu1 %v1935_v51  ;;  %v7608_v1 = vld [vmem:[%s10687_s4 + $0x78] sm:$0xff]  }
 0x41a   : > { %7194 = vmatprep.mubr.msk.bf16.mxu0 %vm8010_vm1, %v10802_v2  ;;  %7185 = vmatpush3.bf16.msra.mxu0 %v7604_v35  ;;  %v7612_v51 = vld [vmem:[%s10689_s6 + $0x58] sm:$0xff]  }
 0x41b   : > { %7186 = vmatprep.subr.bf16.mxu0 %v10802_v2  ;;  %7205 = vmatpush3.bf16.msra.mxu1 %v7612_v51 }
 0x41c   : > { %7206 = vmatprep.subr.bf16.mxu1 %v10802_v2 }
 0x41e   : > { %7187 = vmatpush3.bf16.msra.mxu0 %v7605_v33 }
 0x41f   : > { %7188 = vmatprep.subr.bf16.mxu0 %v10802_v2 }
 0x420   : > { %2220 = vmatmul.mubr.bf16.gmra.mrb[28].mxu1 %v1934_v59 }
 0x421   : > { %2227 = vmatprep.mubr.bf16.mxu1 %v1938_v7 }
 0x422   : > { %7189 = vmatpush3.bf16.msra.mxu0 %v7606_v62 }
 0x423   : > { %7190 = vmatprep.subr.bf16.mxu0 %v10802_v2 }
 0x426   : > { %7191 = vmatpush3.bf16.msra.mxu0 %v7607_v31 }
 0x427   : > { %7192 = vmatprep.subr.bf16.mxu0 %v10802_v2 }
 0x428   : > { %2228 = vmatmul.mubr.bf16.gmra.mrb[32].mxu1 %v1937_v29  ;;  %v7613_v29 = vld [vmem:[%s10689_s6 + $0x60] sm:$0xff]  }
 0x429   : > { %2235 = vmatprep.mubr.bf16.mxu1 %v1941_v19  ;;  %7207 = vmatpush3.bf16.msra.mxu1 %v7613_v29 }
 0x42a   : > { %7193 = vmatpush3.bf16.msra.mxu0 %v7608_v1  ;;  %7208 = vmatprep.subr.bf16.mxu1 %v10802_v2 }
 0x430   : > { %2236 = vmatmul.mubr.bf16.gmra.mrb[36].mxu1 %v1940_v24 }
 0x431   : > { %2243 = vmatprep.mubr.bf16.mxu1 %v1944_v49 }
 0x438   : > { %2244 = vmatmul.mubr.bf16.gmra.mrb[40].mxu1 %v1943_v10  ;;  %v7614_v10 = vld [vmem:[%s10689_s6 + $0x68] sm:$0xff]  }
 0x439   : > { %2251 = vmatprep.mubr.bf16.mxu1 %v1947_v6  ;;  %7209 = vmatpush3.bf16.msra.mxu1 %v7614_v10 }
 0x43a   : > { %7210 = vmatprep.subr.bf16.mxu1 %v10802_v2 }
 0x440   : > { %2252 = vmatmul.mubr.bf16.gmra.mrb[44].mxu1 %v1946_v50 }
 0x441   : > { %7214 = vmatprep.mubr.msk.bf16.mxu1 %vm8010_vm1, %v10802_v2 }
 0x4cb   : > { %v6665_v52 = vpop.f32.mrb[8].mxu1 }
 0x4cc   : > { %v7160_v45 = vpop.f32.mrb[40].mxu0  ;;  %v6666_v16 = vpop.f32.mrb[9].mxu1 }
 0x4cd   : > { %v6667_v63 = vadd.f32 %v6666_v16, %v6665_v52  ;;  %v2294_v9 = vpop.f32.mrb[41].mxu0  ;;  %v6668_v39 = vpop.f32.mrb[10].mxu1 }
 0x4ce   : > { %v7161_v26 = vpop.f32.mrb[42].mxu0  ;;  %v6669_v57 = vpop.f32.mrb[11].mxu1 }
 0x4cf   : > { %v2182_v25 = vadd.f32 %v6667_v63, %v9423_v36  ;;  %v6670_v5 = vadd.f32 %v6669_v57, %v6668_v39  ;;  %v2297_v30 = vpop.f32.mrb[43].mxu0  ;;  %v7615_v63 = vld [vmem:[%s10689_s6 + $0x70] sm:$0xff]  }
 0x4d0   : > { %7211 = vmatpush3.bf16.msra.mxu1 %v7615_v63 }
 0x4d1   : > { %v9434_v13 = vadd.f32 %v2294_v9, %v2182_v25  ;;  %v2185_v60 = vadd.f32 %v6670_v5, %v9423_v36  ;;  %7212 = vmatprep.subr.bf16.mxu1 %v10802_v2 }
 0x4d3   : > { %v2373_v37 = vmul.f32 %v9434_v13, %v9434_v13  ;;  %v9447_v17 = vadd.f32 %v2297_v30, %v2185_v60  ;;  %v6671_v43 = vpop.f32.mrb[12].mxu1 }
 0x4d4   : > { %v9449_v28 = vpop.f32.mrb[44].mxu0  ;;  %v6672_v12 = vpop.f32.mrb[13].mxu1 }
 0x4d5   : > { %v2374_v40 = vmul.f32 %v9447_v17, %v9447_v17  ;;  %v6673_v22 = vadd.f32 %v6672_v12, %v6671_v43  ;;  %v2310_v34 = vpop.f32.mrb[45].mxu0  ;;  %v6674_v18 = vpop.f32.mrb[14].mxu1  ;;  %v2393_v32 = vmul.f32 %v2373_v37, %v9434_v13  ;;  %v7616_v43 = vld [vmem:[%s10689_s6 + $0x78] sm:$0xff]  }
 0x4d6   : > { %v9460_v42 = vpop.f32.mrb[46].mxu0  ;;  %v6675_v4 = vpop.f32.mrb[15].mxu1  ;;  %7213 = vmatpush3.bf16.msra.mxu1 %v7616_v43 }
 0x4d7   : > { %v2394_v38 = vmul.f32 %v2374_v40, %v9447_v17  ;;  %v2190_v59 = vadd.f32 %v6673_v22, %v9423_v36  ;;  %v6676_v7 = vadd.f32 %v6675_v4, %v6674_v18  ;;  %v2313_v11 = vpop.f32.mrb[47].mxu0  ;;  %v2413_v19 = vmul.f32 0.044715, %v2393_v32  ;;  %7218 = vmatprep.subr.bf16.mxu1 %v10802_v2 }
 0x4d9   : > { %v2414_v48 = vmul.f32 0.044715, %v2394_v38  ;;  %v9466_v44 = vadd.f32 %v7160_v45, %v2190_v59  ;;  %v2193_v20 = vadd.f32 %v6676_v7, %v9423_v36  ;;  %v2433_v6 = vadd.f32 %v2413_v19, %v9434_v13 }
 0x4db   : > { %v2375_v61 = vmul.f32 %v9466_v44, %v9466_v44  ;;  %v9475_v23 = vadd.f32 %v7161_v26, %v2193_v20  ;;  %v6677_v3 = vpop.f32.mrb[16].mxu1  ;;  %v2434_v49 = vadd.f32 %v2414_v48, %v9447_v17  ;;  %v2453_v9 = vmul.f32 0.7978846, %v2433_v6 }
 0x4dc   : > { %v9477_v55 = vpop.f32.mrb[48].mxu0  ;;  %v6678_v24 = vpop.f32.mrb[17].mxu1 }
 0x4dd   : > { %v2395_v58 = vmul.f32 %v2375_v61, %v9466_v44  ;;  %v2376_v47 = vmul.f32 %v9475_v23, %v9475_v23  ;;  %v9483_v27 = vpop.f32.mrb[49].mxu0  ;;  %v6680_v8 = vpop.f32.mrb[18].mxu1  ;;  %v6679_v15 = vadd.f32 %v6678_v24, %v6677_v3  ;;  %v2454_v52 = vmul.f32 0.7978846, %v2434_v49 }
 0x4de   : > { %v9489_v41 = vpop.f32.mrb[50].mxu0  ;;  %v6681_v50 = vpop.f32.mrb[19].mxu1 }
 0x4df   : > { %v2415_v53 = vmul.f32 0.044715, %v2395_v58  ;;  %v2396_v14 = vmul.f32 %v2376_v47, %v9475_v23  ;;  %v6682_v0 = vadd.f32 %v6681_v50, %v6680_v8  ;;  %v9493_v35 = vpop.f32.mrb[51].mxu0  ;;  %v2198_v33 = vadd.f32 %v6679_v15, %v9423_v36 }
 0x4e0   : > { %7895 = vtanh.f32 %v2454_v52 }
 0x4e1   : > { %v2435_v56 = vadd.f32 %v2415_v53, %v9466_v44  ;;  %v2416_v45 = vmul.f32 0.044715, %v2396_v14  ;;  %v2201_v16 = vadd.f32 %v6682_v0, %v9423_v36  ;;  %v9501_v39 = vadd.f32 %v2310_v34, %v2198_v33 }
 0x4e2   : > { %7897 = vtanh.f32 %v2453_v9 }
 0x4e3   : > { %v2455_v62 = vmul.f32 0.7978846, %v2435_v56  ;;  %v9504_v54 = vadd.f32 %v2313_v11, %v2201_v16  ;;  %v6683_v26 = vpop.f32.mrb[20].mxu1  ;;  %v2377_v57 = vmul.f32 %v9501_v39, %v9501_v39  ;;  %v2436_v30 = vadd.f32 %v2416_v45, %v9475_v23 }
 0x4e4   : > { %v9508_v25 = vpop.f32.mrb[52].mxu0  ;;  %v6684_v5 = vpop.f32.mrb[21].mxu1 }
 0x4e5   : > { %v2378_v60 = vmul.f32 %v9504_v54, %v9504_v54  ;;  %v6685_v31 = vadd.f32 %v6684_v5, %v6683_v26  ;;  %v9513_v46 = vpop.f32.mrb[53].mxu0  ;;  %v6686_v37 = vpop.f32.mrb[22].mxu1  ;;  %v2397_v12 = vmul.f32 %v2377_v57, %v9501_v39  ;;  %7899 = vtanh.f32 %v2455_v62 }
 0x4e6   : > { %v9519_v40 = vpop.f32.mrb[54].mxu0  ;;  %v6687_v22 = vpop.f32.mrb[23].mxu1  ;;  %v2456_v4 = vmul.f32 0.7978846, %v2436_v30 }
 0x4e7   : > { %v2398_v34 = vmul.f32 %v2378_v60, %v9504_v54  ;;  %v2206_v18 = vadd.f32 %v6685_v31, %v9423_v36  ;;  %v6688_v1 = vadd.f32 %v6687_v22, %v6686_v37  ;;  %v9524_v51 = vpop.f32.mrb[55].mxu0  ;;  %v2417_v32 = vmul.f32 0.044715, %v2397_v12 }
 0x4e8   : > { %7901 = vtanh.f32 %v2456_v4 }
 0x4e9   : > { %v2418_v38 = vmul.f32 0.044715, %v2398_v34  ;;  %v9527_v59 = vadd.f32 %v9449_v28, %v2206_v18  ;;  %v2209_v7 = vadd.f32 %v6688_v1, %v9423_v36  ;;  %v2437_v11 = vadd.f32 %v2417_v32, %v9501_v39 }
 0x4ea   : > { %v7896_v15 = vpop.eup %7895 }
 0x4eb   : > { %v2438_v48 = vadd.f32 %v2418_v38, %v9504_v54  ;;  %v2379_v20 = vmul.f32 %v9527_v59, %v9527_v59  ;;  %v9536_v29 = vadd.f32 %v9460_v42, %v2209_v7  ;;  %v6689_v19 = vpop.f32.mrb[24].mxu1  ;;  %v2457_v61 = vmul.f32 0.7978846, %v2437_v11 }
 0x4ec   : > { %v9538_v3 = vpop.f32.mrb[56].mxu0  ;;  %v6690_v28 = vpop.f32.mrb[25].mxu1  ;;  %v2494_v9 = vadd.f32 1.0, %v7896_v15 }
 0x4ed   : > { %v2399_v24 = vmul.f32 %v2379_v20, %v9527_v59  ;;  %v2380_v49 = vmul.f32 %v9536_v29, %v9536_v29  ;;  %v6691_v58 = vadd.f32 %v6690_v28, %v6689_v19  ;;  %v9543_v47 = vpop.f32.mrb[57].mxu0  ;;  %v6692_v8 = vpop.f32.mrb[26].mxu1  ;;  %v2458_v10 = vmul.f32 0.7978846, %v2438_v48 }
 0x4ee   : > { %v9545_v6 = vpop.f32.mrb[58].mxu0  ;;  %v6693_v42 = vpop.f32.mrb[27].mxu1  ;;  %7903 = vtanh.f32 %v2457_v61  ;;  %v2514_v4 = vmul.f32 0.5, %v2494_v9 }
 0x4ef   : > { %v2419_v50 = vmul.f32 0.044715, %v2399_v24  ;;  %v2400_v53 = vmul.f32 %v2380_v49, %v9536_v29  ;;  %v2214_v14 = vadd.f32 %v6691_v58, %v9423_v36  ;;  %v9549_v0 = vpop.f32.mrb[59].mxu0  ;;  %v7898_v33 = vpop.eup %7897  ;;  %v6694_v52 = vadd.f32 %v6693_v42, %v6692_v8 }
 0x4f0   : > { %v7900_v56 = vpop.eup %7899  ;;  %7905 = vtanh.f32 %v2458_v10  ;;  %v2493_v60 = vadd.f32 1.0, %v7898_v33  ;;  %v9573_v8 = vmul.f32 %v2514_v4, %v9447_v17 }
 0x4f1   : > { %v2439_v45 = vadd.f32 %v2419_v50, %v9527_v59  ;;  %v2420_v16 = vmul.f32 0.044715, %v2400_v53  ;;  %v9553_v63 = vadd.f32 %v9483_v27, %v2214_v14  ;;  %v2217_v62 = vadd.f32 %v6694_v52, %v9423_v36 }
 0x4f2   : > { %v2495_v31 = vadd.f32 1.0, %v7900_v56  ;;  %v7902_v32 = vpop.eup %7901  ;;  %v2513_v48 = vmul.f32 0.5, %v2493_v60 }
 0x4f3   : > { %v2459_v26 = vmul.f32 0.7978846, %v2439_v45  ;;  %v2440_v57 = vadd.f32 %v2420_v16, %v9536_v29  ;;  %v2381_v5 = vmul.f32 %v9553_v63, %v9553_v63  ;;  %v6695_v30 = vpop.f32.mrb[28].mxu1  ;;  %v9560_v37 = vadd.f32 %v9493_v35, %v2217_v62 }
 0x4f4   : > { %v6696_v43 = vpop.f32.mrb[29].mxu1  ;;  %v2515_v35 = vmul.f32 0.5, %v2495_v31  ;;  %v2496_v49 = vadd.f32 1.0, %v7902_v32  ;;  %v9581_v53 = vmul.f32 %v2513_v48, %v9434_v13 }
 0x4f5   : > { %7907 = vtanh.f32 %v2459_v26  ;;  %v2460_v27 = vmul.f32 0.7978846, %v2440_v57  ;;  %v2401_v12 = vmul.f32 %v2381_v5, %v9553_v63  ;;  %v6697_v22 = vadd.f32 %v6696_v43, %v6695_v30  ;;  %v6698_v34 = vpop.f32.mrb[30].mxu1 }
 0x4f6   : > { %v2382_v18 = vmul.f32 %v9560_v37, %v9560_v37  ;;  %v6699_v1 = vpop.f32.mrb[31].mxu1  ;;  %v9585_v56 = vmul.f32 %v2515_v35, %v9466_v44  ;;  %v2516_v16 = vmul.f32 0.5, %v2496_v49  ;;  %v2553_v57 = vadd.f32 %v9573_v8, %v9581_v53 }
 0x4f7   : > { %v2421_v38 = vmul.f32 0.044715, %v2401_v12  ;;  %v2222_v7 = vadd.f32 %v6697_v22, %v9423_v36  ;;  %v6700_v11 = vadd.f32 %v6699_v1, %v6698_v34  ;;  %7909 = vtanh.f32 %v2460_v27 }
 0x4f8   : > { %v2402_v20 = vmul.f32 %v2382_v18, %v9560_v37  ;;  %v7904_v19 = vpop.eup %7903  ;;  %v2554_v27 = vadd.f32 %v2553_v57, %v9585_v56  ;;  %v9598_v18 = vmul.f32 %v2516_v16, %v9475_v23 }
 0x4f9   : > { %v2441_v61 = vadd.f32 %v2421_v38, %v9553_v63  ;;  %v9569_v28 = vadd.f32 %v9477_v55, %v2222_v7  ;;  %v2225_v24 = vadd.f32 %v6700_v11, %v9423_v36  ;;  %v2497_v55 = vadd.f32 1.0, %v7904_v19 }
 0x4fa   : > { %v2422_v58 = vmul.f32 0.044715, %v2402_v20  ;;  %v7906_v52 = vpop.eup %7905 }
 0x4fb   : > { %v2461_v10 = vmul.f32 0.7978846, %v2441_v61  ;;  %v2383_v42 = vmul.f32 %v9569_v28, %v9569_v28  ;;  %v9578_v15 = vadd.f32 %v9489_v41, %v2225_v24  ;;  %v6701_v50 = vpop.f32.mrb[32].mxu1  ;;  %v2517_v60 = vmul.f32 0.5, %v2497_v55 }
 0x4fc   : > { %v2442_v14 = vadd.f32 %v2422_v58, %v9560_v37  ;;  %v6702_v33 = vpop.f32.mrb[33].mxu1  ;;  %v2498_v31 = vadd.f32 1.0, %v7906_v52  ;;  %v2555_v58 = vadd.f32 %v2554_v27, %v9598_v18 }
 0x4fd   : > { %7911 = vtanh.f32 %v2461_v10  ;;  %v2403_v17 = vmul.f32 %v2383_v42, %v9569_v28  ;;  %v2384_v45 = vmul.f32 %v9578_v15, %v9578_v15  ;;  %v6704_v41 = vpop.f32.mrb[34].mxu1  ;;  %v6703_v62 = vadd.f32 %v6702_v33, %v6701_v50 }
 0x4fe   : > { %v2462_v9 = vmul.f32 0.7978846, %v2442_v14  ;;  %v6705_v13 = vpop.f32.mrb[35].mxu1  ;;  %v9608_v35 = vmul.f32 %v2517_v60, %v9501_v39  ;;  %v2518_v20 = vmul.f32 0.5, %v2498_v31 }
 0x4ff   : > { %v7908_v26 = vpop.eup %7907  ;;  %v2423_v5 = vmul.f32 0.044715, %v2403_v17  ;;  %v2404_v30 = vmul.f32 %v2384_v45, %v9578_v15  ;;  %v6706_v44 = vadd.f32 %v6705_v13, %v6704_v41  ;;  %v2230_v43 = vadd.f32 %v6703_v62, %v9423_v36 }
 0x500   : > { %v2499_v1 = vadd.f32 1.0, %v7908_v26  ;;  %7913 = vtanh.f32 %v2462_v9  ;;  %v2556_v52 = vadd.f32 %v2555_v58, %v9608_v35  ;;  %v9620_v17 = vmul.f32 %v2518_v20, %v9504_v54 }
 0x501   : > { %v2443_v12 = vadd.f32 %v2423_v5, %v9569_v28  ;;  %v2424_v22 = vmul.f32 0.044715, %v2404_v30  ;;  %v2233_v34 = vadd.f32 %v6706_v44, %v9423_v36  ;;  %v9601_v32 = vadd.f32 %v9513_v46, %v2230_v43  ;;  %v7910_v4 = vpop.eup %7909 }
 0x502   : > { %v2500_v10 = vadd.f32 1.0, %v7910_v4 }
 0x503   : > { %v2463_v38 = vmul.f32 0.7978846, %v2443_v12  ;;  %v2444_v7 = vadd.f32 %v2424_v22, %v9578_v15  ;;  %v9605_v11 = vadd.f32 %v9524_v51, %v2233_v34  ;;  %v6707_v48 = vpop.f32.mrb[36].mxu1  ;;  %v2385_v23 = vmul.f32 %v9601_v32, %v9601_v32 }
 0x504   : > { %v6708_v19 = vpop.f32.mrb[37].mxu1  ;;  %v2519_v51 = vmul.f32 0.5, %v2499_v1  ;;  %v2520_v26 = vmul.f32 0.5, %v2500_v10 }
 0x505   : > { %7915 = vtanh.f32 %v2463_v38  ;;  %v2464_v61 = vmul.f32 0.7978846, %v2444_v7  ;;  %v2386_v46 = vmul.f32 %v9605_v11, %v9605_v11  ;;  %v6709_v24 = vadd.f32 %v6708_v19, %v6707_v48  ;;  %v6710_v49 = vpop.f32.mrb[38].mxu1 }
 0x506   : > { %v2405_v42 = vmul.f32 %v2385_v23, %v9601_v32  ;;  %v6711_v39 = vpop.f32.mrb[39].mxu1  ;;  %v9627_v13 = vmul.f32 %v2519_v51, %v9527_v59  ;;  %v9642_v4 = vmul.f32 %v2520_v26, %v9536_v29 }
 0x507   : > { %v7912_v50 = vpop.eup %7911  ;;  %v2406_v55 = vmul.f32 %v2386_v46, %v9605_v11  ;;  %v2238_v14 = vadd.f32 %v6709_v24, %v9423_v36  ;;  %v6712_v33 = vadd.f32 %v6711_v39, %v6710_v49  ;;  %7917 = vtanh.f32 %v2464_v61 }
 0x508   : > { %v2425_v45 = vmul.f32 0.044715, %v2405_v42  ;;  %v2501_v41 = vadd.f32 1.0, %v7912_v50 }
 0x509   : > { %v2426_v16 = vmul.f32 0.044715, %v2406_v55  ;;  %v9623_v9 = vadd.f32 %v9508_v25, %v2238_v14  ;;  %v2241_v62 = vadd.f32 %v6712_v33, %v9423_v36  ;;  %v2557_v25 = vadd.f32 %v2556_v52, %v9620_v17 }
 0x50a   : > { %v2445_v57 = vadd.f32 %v2425_v45, %v9601_v32  ;;  %v7914_v60 = vpop.eup %7913  ;;  %v2521_v27 = vmul.f32 0.5, %v2501_v41 }
 0x50b   : > { %v2446_v5 = vadd.f32 %v2426_v16, %v9605_v11  ;;  %v2387_v54 = vmul.f32 %v9623_v9, %v9623_v9  ;;  %v9634_v30 = vadd.f32 %v9519_v40, %v2241_v62  ;;  %v6713_v44 = vpop.f32.mrb[40].mxu1  ;;  %v2558_v1 = vadd.f32 %v2557_v25, %v9627_v13 }
 0x50c   : > { %v2465_v31 = vmul.f32 0.7978846, %v2445_v57  ;;  %v6714_v43 = vpop.f32.mrb[41].mxu1  ;;  %v2502_v48 = vadd.f32 1.0, %v7914_v60  ;;  %v9647_v46 = vmul.f32 %v2521_v27, %v9553_v63 }
 0x50d   : > { %v2466_v59 = vmul.f32 0.7978846, %v2446_v5  ;;  %v2407_v12 = vmul.f32 %v2387_v54, %v9623_v9  ;;  %v2388_v22 = vmul.f32 %v9634_v30, %v9634_v30  ;;  %v6716_v34 = vpop.f32.mrb[42].mxu1  ;;  %v6715_v40 = vadd.f32 %v6714_v43, %v6713_v44 }
 0x50e   : > { %7919 = vtanh.f32 %v2465_v31  ;;  %v6717_v38 = vpop.f32.mrb[43].mxu1  ;;  %v2559_v42 = vadd.f32 %v2558_v1, %v9642_v4  ;;  %v2522_v39 = vmul.f32 0.5, %v2502_v48 }
 0x50f   : > { %v7916_v7 = vpop.eup %7915  ;;  %7921 = vtanh.f32 %v2466_v59  ;;  %v2427_v20 = vmul.f32 0.044715, %v2407_v12  ;;  %v2408_v23 = vmul.f32 %v2388_v22, %v9634_v30  ;;  %v2246_v19 = vadd.f32 %v6715_v40, %v9423_v36 }
 0x510   : > { %v6718_v61 = vadd.f32 %v6717_v38, %v6716_v34  ;;  %v2503_v58 = vadd.f32 1.0, %v7916_v7  ;;  %v2560_v45 = vadd.f32 %v2559_v42, %v9647_v46  ;;  %v9666_v44 = vmul.f32 %v2522_v39, %v9560_v37 }
 0x511   : > { %v2447_v24 = vadd.f32 %v2427_v20, %v9623_v9  ;;  %v2428_v49 = vmul.f32 0.044715, %v2408_v23  ;;  %v7918_v29 = vpop.eup %7917  ;;  %v9651_v51 = vadd.f32 %v9543_v47, %v2246_v19 }
 0x512   : > { %v2249_v10 = vadd.f32 %v6718_v61, %v9423_v36  ;;  %v2523_v62 = vmul.f32 0.5, %v2503_v58  ;;  %v2504_v26 = vadd.f32 1.0, %v7918_v29  ;;  %v2561_v38 = vadd.f32 %v2560_v45, %v9666_v44 }
 0x513   : > { %v2467_v50 = vmul.f32 0.7978846, %v2447_v24  ;;  %v2448_v55 = vadd.f32 %v2428_v49, %v9634_v30  ;;  %v6719_v14 = vpop.f32.mrb[44].mxu1  ;;  %v2389_v63 = vmul.f32 %v9651_v51, %v9651_v51 }
 0x514   : > { %v9659_v33 = vadd.f32 %v9549_v0, %v2249_v10  ;;  %v6720_v52 = vpop.f32.mrb[45].mxu1  ;;  %v9673_v34 = vmul.f32 %v2523_v62, %v9569_v28  ;;  %v2524_v1 = vmul.f32 0.5, %v2504_v26 }
 0x515   : > { %7923 = vtanh.f32 %v2467_v50  ;;  %v2468_v47 = vmul.f32 0.7978846, %v2448_v55  ;;  %v6721_v41 = vadd.f32 %v6720_v52, %v6719_v14  ;;  %v6722_v16 = vpop.f32.mrb[46].mxu1  ;;  %v2409_v57 = vmul.f32 %v2389_v63, %v9651_v51 }
 0x516   : > { %v2390_v5 = vmul.f32 %v9659_v33, %v9659_v33  ;;  %v6723_v54 = vpop.f32.mrb[47].mxu1  ;;  %v9681_v28 = vmul.f32 %v2524_v1, %v9578_v15 }
 0x517   : > { %7925 = vtanh.f32 %v2468_v47  ;;  %v2254_v0 = vadd.f32 %v6721_v41, %v9423_v36  ;;  %v6724_v60 = vadd.f32 %v6723_v54, %v6722_v16  ;;  %v2429_v31 = vmul.f32 0.044715, %v2409_v57 }
 0x518   : > { %v7920_v25 = vpop.eup %7919  ;;  %v2410_v43 = vmul.f32 %v2390_v5, %v9659_v33 }
 0x519   : > { %v7922_v27 = vpop.eup %7921  ;;  %v2505_v59 = vadd.f32 1.0, %v7920_v25  ;;  %v2367_v12 = vadd.f32 %v9538_v3, %v2254_v0  ;;  %v2257_v22 = vadd.f32 %v6724_v60, %v9423_v36  ;;  %v2449_v37 = vadd.f32 %v2429_v31, %v9651_v51 }
 0x51a   : > { %v2430_v40 = vmul.f32 0.044715, %v2410_v43  ;;  %v2506_v23 = vadd.f32 1.0, %v7922_v27  ;;  %v2562_v36 = vadd.f32 %v2561_v38, %v9673_v34 }
 0x51b   : > { %v2391_v7 = vmul.f32 %v2367_v12, %v2367_v12  ;;  %v2370_v48 = vadd.f32 %v9545_v6, %v2257_v22  ;;  %v2525_v20 = vmul.f32 0.5, %v2505_v59  ;;  %v2469_v19 = vmul.f32 0.7978846, %v2449_v37 }
 0x51c   : > { %v2450_v61 = vadd.f32 %v2430_v40, %v9659_v33  ;;  %v2526_v6 = vmul.f32 0.5, %v2506_v23  ;;  %v2563_v63 = vadd.f32 %v2562_v36, %v9681_v28 }
 0x51d   : > { %v2411_v3 = vmul.f32 %v2391_v7, %v2367_v12  ;;  %v2392_v24 = vmul.f32 %v2370_v48, %v2370_v48  ;;  %7927 = vtanh.f32 %v2469_v19  ;;  %v9684_v42 = vmul.f32 %v2525_v20, %v9601_v32 }
 0x51e   : > { %v2470_v49 = vmul.f32 0.7978846, %v2450_v61  ;;  %v9689_v16 = vmul.f32 %v2526_v6, %v9605_v11 }
 0x51f   : > { %v7924_v29 = vpop.eup %7923  ;;  %v2431_v58 = vmul.f32 0.044715, %v2411_v3  ;;  %v2412_v10 = vmul.f32 %v2392_v24, %v2370_v48  ;;  %v2564_v41 = vadd.f32 %v2563_v63, %v9684_v42 }
 0x520   : > { %v2507_v39 = vadd.f32 1.0, %v7924_v29  ;;  %7929 = vtanh.f32 %v2470_v49 }
 0x521   : > { %v7926_v50 = vpop.eup %7925  ;;  %v2451_v55 = vadd.f32 %v2431_v58, %v2367_v12  ;;  %v2432_v14 = vmul.f32 0.044715, %v2412_v10  ;;  %v2565_v5 = vadd.f32 %v2564_v41, %v9689_v16  ;;  %v7620_v41 = vld [vmem:[%s10684_s1 + $0x1c8] sm:$0xff]  }
 0x522   : > { %v2527_v52 = vmul.f32 0.5, %v2507_v39  ;;  %v2508_v45 = vadd.f32 1.0, %v7926_v50 }
 0x523   : > { %v2471_v15 = vmul.f32 0.7978846, %v2451_v55  ;;  %v2452_v47 = vadd.f32 %v2432_v14, %v2370_v48 }
 0x524   : > { %v9692_v62 = vmul.f32 %v2527_v52, %v9623_v9  ;;  %v2528_v26 = vmul.f32 0.5, %v2508_v45  ;;  %v7617_v45 = vld [vmem:[%s10684_s1 + $0x1c0] sm:$0xff]  }
 0x525   : > { %7931 = vtanh.f32 %v2471_v15  ;;  %v2472_v32 = vmul.f32 0.7978846, %v2452_v47  ;;  %v7618_v15 = vld [vmem:[%s10684_s1 + $0x200] sm:$0xff]   ;;  %6761 = vmatprep.subr.bf16.mxu0 %v7617_v45 }
 0x526   : > { %v2566_v60 = vadd.f32 %v2565_v5, %v9692_v62  ;;  %v9697_v25 = vmul.f32 %v2528_v26, %v9634_v30  ;;  %v7619_v47 = vld [vmem:[%s10684_s1 + $0x180] sm:$0xff]   ;;  %v7622_v26 = vld [vmem:[%s10684_s1 + $0x188] sm:$0xff]   ;;  %v7624_v5 = vld [vmem:[%s10684_s1 + $0x210] sm:$0xff]  }
 0x527   : > { %7933 = vtanh.f32 %v2472_v32  ;;  %v7928_v57 = vpop.eup %7927  ;;  %v7621_v32 = vld [vmem:[%s10684_s1 + $0x208] sm:$0xff]  }
 0x528   : > { %v2509_v54 = vadd.f32 1.0, %v7928_v57  ;;  %v2567_v9 = vadd.f32 %v2566_v60, %v9697_v25  ;;  %v7623_v57 = vld [vmem:[%s10684_s1 + $0x1d0] sm:$0xff]   ;;  %v7627_v60 = vld [vmem:[%s10684_s1 + $0x218] sm:$0xff]  }
 0x52a   : > { %v7930_v0 = vpop.eup %7929  ;;  %v2529_v31 = vmul.f32 0.5, %v2509_v54  ;;  %v7625_v54 = vld [vmem:[%s10684_s1 + $0x190] sm:$0xff]  }
 0x52b   : > { %v2510_v11 = vadd.f32 1.0, %v7930_v0  ;;  %v7626_v0 = vld [vmem:[%s10684_s1 + $0x1d8] sm:$0xff]  }
 0x52c   : > { %v9700_v43 = vmul.f32 %v2529_v31, %v9651_v51  ;;  %v7628_v31 = vld [vmem:[%s10684_s1 + $0x198] sm:$0xff]  }
 0x52d   : > { %v2530_v27 = vmul.f32 0.5, %v2510_v11  ;;  %v7629_v11 = vld [vmem:[%s10684_s1 + $0x1e0] sm:$0xff]  }
 0x52e   : > { %v2568_v22 = vadd.f32 %v2567_v9, %v9700_v43  ;;  %v7631_v9 = vld [vmem:[%s10684_s1 + $0x1a0] sm:$0xff]  }
 0x52f   : > { %v7932_v59 = vpop.eup %7931  ;;  %v9705_v1 = vmul.f32 %v2530_v27, %v9659_v33  ;;  %v7630_v27 = vld [vmem:[%s10684_s1 + $0x220] sm:$0xff]  }
 0x530   : > { %v2511_v37 = vadd.f32 1.0, %v7932_v59  ;;  %v7632_v59 = vld [vmem:[%s10684_s1 + $0x1e8] sm:$0xff]  }
 0x531   : > { %v7934_v40 = vpop.eup %7933  ;;  %v2569_v30 = vadd.f32 %v2568_v22, %v9705_v1  ;;  %v7633_v22 = vld [vmem:[%s10684_s1 + $0x228] sm:$0xff]  }
 0x532   : > { %v2531_v38 = vmul.f32 0.5, %v2511_v37  ;;  %v2512_v7 = vadd.f32 1.0, %v7934_v40  ;;  %v7634_v37 = vld [vmem:[%s10684_s1 + $0x1a8] sm:$0xff]   ;;  %v7635_v40 = vld [vmem:[%s10684_s1 + $0x1f0] sm:$0xff]  }
 0x534   : > { %v9708_v20 = vmul.f32 %v2531_v38, %v2367_v12  ;;  %v2532_v23 = vmul.f32 0.5, %v2512_v7  ;;  %v2598_v12 = vld [vmem:[%s10688_s5 + $0x1] sm:$0x1]  ;;  %v7636_v38 = vld [vmem:[%s10684_s1 + $0x230] sm:$0xff]  }
 0x535   : > { %v7637_v7 = vld [vmem:[%s10684_s1 + $0x1b0] sm:$0xff]  }
 0x536   : > { %v2570_v51 = vadd.f32 %v2569_v30, %v9708_v20  ;;  %v9711_v19 = vmul.f32 %v2532_v23, %v2370_v48  ;;  %v7638_v30 = vld [vmem:[%s10684_s1 + $0x1f8] sm:$0xff]  }
 0x537   : > { %v7639_v23 = vld [vmem:[%s10684_s1 + $0x238] sm:$0xff]  }
 0x538   : > { %v2571_v61 = vsel %vm819_vm0, %v9711_v19, 0.0 }
 0x539   : > { %v2572_v3 = vadd.f32 %v2571_v61, %v2570_v51  ;;  %v7640_v51 = vld [vmem:[%s10684_s1 + $0x1b8] sm:$0xff]   ;;  %v2706_v61 = vld [vmem:[%s10690_s7 + $0x1] sm:$0x1] }
 0x53b   : > { %v2573_v24 = vrot.slane %v2572_v3, 4 }
 0x53d   : > { %v2574_v33 = vadd.f32 %v2573_v24, %v2572_v3 }
 0x53f   : > { %v2575_v36 = vrot.slane %v2574_v33, 2 }
 0x541   : > { %v2576_v49 = vadd.f32 %v2575_v36, %v2574_v33 }
 0x543   : > { %v2577_v29 = vrot.slane %v2576_v49, 1 }
 0x545   : > { %v2578_v58 = vadd.f32 %v2577_v29, %v2576_v49 }
 0x547   : > { %v2579_v10 = vmul.f32 0.006289308, %v2578_v58 }
 0x549   : > { %v2580_v6 = vpack.c.bf16 %v2579_v10, %v2579_v10 }
 0x54b   : > { %7195 = vmatmul.mubr.bf16.vlgmr.msra.gmra.mrb[60].mxu0 %v2580_v6 }
 0x54c   : > { %6762 = vmatpush3.bf16.msra.mxu0 %v7619_v47 }
 0x54d   : > { %6763 = vmatprep.subr.bf16.mxu0 %v7620_v41 }
 0x550   : > { %6764 = vmatpush3.bf16.msra.mxu0 %v7622_v26 }
 0x551   : > { %6765 = vmatprep.subr.bf16.mxu0 %v7623_v57 }
 0x554   : > { %6766 = vmatpush3.bf16.msra.mxu0 %v7625_v54 }
 0x555   : > { %6767 = vmatprep.subr.bf16.mxu0 %v7626_v0 }
 0x558   : > { %6768 = vmatpush3.bf16.msra.mxu0 %v7628_v31 }
 0x559   : > { %6769 = vmatprep.subr.bf16.mxu0 %v7629_v11 }
 0x55c   : > { %6770 = vmatpush3.bf16.msra.mxu0 %v7631_v9 }
 0x55d   : > { %6771 = vmatprep.subr.bf16.mxu0 %v7632_v59 }
 0x560   : > { %6772 = vmatpush3.bf16.msra.mxu0 %v7634_v37 }
 0x561   : > { %6773 = vmatprep.subr.bf16.mxu0 %v7635_v40 }
 0x564   : > { %6774 = vmatpush3.bf16.msra.mxu0 %v7637_v7 }
 0x565   : > { %6775 = vmatprep.subr.bf16.mxu0 %v7638_v30 }
 0x568   : > { %6776 = vmatpush3.bf16.msra.mxu0 %v7640_v51 }
 0x569   : > { %7254 = vmatprep.subr.bf16.mxu0 %v10802_v2 }
 0x61e   : > { %v2681_v39 = vpop.f32.mrb[60].mxu0 }
 0x61f   : > { %v2682_v48 = vadd.f32 %v2681_v39, %v2598_v12  ;;  %v7196_v50 = vpop.f32.mrb[61].mxu0 }
 0x620   : > { %v2684_v55 = vpop.f32.mrb[62].mxu0 }
 0x621   : > { %v2687_v14 = vmax.f32 %v2682_v48, 0.0  ;;  %v7197_v63 = vpop.f32.mrb[63].mxu0 }
 0x623   : > { %v2688_v52 = vpack.c.bf16 %v2687_v14, %v2687_v14 }
 0x625   : > { %7215 = vmatmul.mubr.bf16.vlgmr.msra.gmra.mrb[48].mxu1 %v2688_v52 }
 0x626   : > { %7234 = vmatprep.mubr.msk.bf16.mxu1 %vm8010_vm1, %v10802_v2  ;;  %7219 = vmatpush3.bf16.msra.mxu1 %v7618_v15 }
 0x627   : > { %7220 = vmatprep.subr.bf16.mxu1 %v10802_v2 }
 0x62a   : > { %7221 = vmatpush3.bf16.msra.mxu1 %v7621_v32 }
 0x62b   : > { %7222 = vmatprep.subr.bf16.mxu1 %v10802_v2 }
 0x62e   : > { %7223 = vmatpush3.bf16.msra.mxu1 %v7624_v5 }
 0x62f   : > { %7224 = vmatprep.subr.bf16.mxu1 %v10802_v2 }
 0x632   : > { %7225 = vmatpush3.bf16.msra.mxu1 %v7627_v60 }
 0x633   : > { %7226 = vmatprep.subr.bf16.mxu1 %v10802_v2 }
 0x636   : > { %7227 = vmatpush3.bf16.msra.mxu1 %v7630_v27 }
 0x637   : > { %7228 = vmatprep.subr.bf16.mxu1 %v10802_v2 }
 0x63a   : > { %7229 = vmatpush3.bf16.msra.mxu1 %v7633_v22 }
 0x63b   : > { %7230 = vmatprep.subr.bf16.mxu1 %v10802_v2 }
 0x63e   : > { %7231 = vmatpush3.bf16.msra.mxu1 %v7636_v38 }
 0x63f   : > { %7232 = vmatprep.subr.bf16.mxu1 %v10802_v2 }
 0x642   : > { %7233 = vmatpush3.bf16.msra.mxu1 %v7639_v23 }
 0x643   : > { %7274 = vmatprep.subr.bf16.mxu1 %v10802_v2 }
 0x6f8   : > { %v2789_v3 = vpop.f32.mrb[48].mxu1 }
 0x6f9   : > { %v2790_v24 = vadd.f32 %v2789_v3, %v2706_v61  ;;  %v7216_v33 = vpop.f32.mrb[49].mxu1 }
 0x6fa   : > { %v2792_v36 = vpop.f32.mrb[50].mxu1 }
 0x6fb   : > { %v6029_v49 = vmul.f32 -1.442695, %v2790_v24  ;;  %v7217_v29 = vpop.f32.mrb[51].mxu1 }
 0x6fd   : > { %7935 = vpow2.f32 %v6029_v49 }
 0x707   : > { %v7936_v58 = vpop.eup %7935 }
 0x708   : > { %v2798_v10 = vadd.f32 1.0, %v7936_v58 }
 0x70a   : > { %7937 = vrcp.f32 %v2798_v10 }
 0x714   : > { %v7938_v6 = vpop.eup %7937 }
 0x715   : > { %v2804_v12 = vrot.slane %v7938_v6, %v9309_v21 }
 0x717   : > { %v2805_v39 = vmul.f32 %v2804_v12, %v9581_v53  ;;  %v2806_v48 = vmul.f32 %v2804_v12, %v9573_v8  ;;  %v2807_v50 = vmul.f32 %v2804_v12, %v9585_v56  ;;  %v2808_v55 = vmul.f32 %v2804_v12, %v9598_v18 }
 0x718   : > { %v2809_v14 = vmul.f32 %v2804_v12, %v9608_v35  ;;  %v2810_v63 = vmul.f32 %v2804_v12, %v9620_v17  ;;  %v2811_v52 = vmul.f32 %v2804_v12, %v9627_v13  ;;  %v2812_v45 = vmul.f32 %v2804_v12, %v9642_v4 }
 0x719   : > { %2825 = vst [vmem:[#allocation3] sm:$0xff] %v2805_v39  ;;  %2826 = vst [vmem:[#allocation3 + $0x8] sm:$0xff] %v2806_v48  ;;  %v2813_v53 = vmul.f32 %v2804_v12, %v9647_v46  ;;  %v2814_v8 = vmul.f32 %v2804_v12, %v9666_v44  ;;  %v2815_v56 = vmul.f32 %v2804_v12, %v9673_v34 }
 0x71a   : > { %2827 = vst [vmem:[#allocation3 + $0x10] sm:$0xff] %v2807_v50  ;;  %2828 = vst [vmem:[#allocation3 + $0x18] sm:$0xff] %v2808_v55  ;;  %v2816_v18 = vmul.f32 %v2804_v12, %v9681_v28  ;;  %v2817_v35 = vmul.f32 %v2804_v12, %v9684_v42  ;;  %v2818_v17 = vmul.f32 %v2804_v12, %v9689_v16  ;;  %v7641_v55 = vld [vmem:[%s10687_s4 + $0x80] sm:$0xff]  }
 0x71b   : > { %2829 = vst [vmem:[#allocation3 + $0x20] sm:$0xff] %v2809_v14  ;;  %2830 = vst [vmem:[#allocation3 + $0x28] sm:$0xff] %v2810_v63  ;;  %v2819_v13 = vmul.f32 %v2804_v12, %v9692_v62  ;;  %v2820_v4 = vmul.f32 %v2804_v12, %v9697_v25  ;;  %v2821_v46 = vmul.f32 %v2804_v12, %v9700_v43  ;;  %v7642_v14 = vld [vmem:[%s10687_s4 + $0x88] sm:$0xff]   ;;  %v7643_v63 = vld [vmem:[%s10687_s4 + $0x90] sm:$0xff]  }
 0x71c   : > { %2831 = vst [vmem:[#allocation3 + $0x30] sm:$0xff] %v2811_v52  ;;  %2832 = vst [vmem:[#allocation3 + $0x38] sm:$0xff] %v2812_v45  ;;  %v2822_v44 = vmul.f32 %v2804_v12, %v9705_v1  ;;  %v2823_v34 = vmul.f32 %v2804_v12, %v9708_v20  ;;  %v2824_v28 = vmul.f32 %v2804_v12, %v9711_v19  ;;  %v7644_v52 = vld [vmem:[%s10687_s4 + $0x98] sm:$0xff]   ;;  %v7645_v45 = vld [vmem:[%s10687_s4 + $0xa0] sm:$0xff]  }
 0x71d   : > { %2833 = vst [vmem:[#allocation3 + $0x40] sm:$0xff] %v2813_v53  ;;  %2834 = vst [vmem:[#allocation3 + $0x48] sm:$0xff] %v2814_v8  ;;  %v7649_v53 = vld [vmem:[%s10689_s6 + $0x80] sm:$0xff]   ;;  %v7646_v8 = vld [vmem:[%s10687_s4 + $0xa8] sm:$0xff]  }
 0x71e   : > { %2835 = vst [vmem:[#allocation3 + $0x50] sm:$0xff] %v2815_v56  ;;  %2836 = vst [vmem:[#allocation3 + $0x58] sm:$0xff] %v2816_v18  ;;  %v7650_v56 = vld [vmem:[%s10689_s6 + $0x88] sm:$0xff]   ;;  %v7647_v18 = vld [vmem:[%s10687_s4 + $0xb0] sm:$0xff]  }
 0x71f   : > { %2837 = vst [vmem:[#allocation3 + $0x60] sm:$0xff] %v2817_v35  ;;  %2838 = vst [vmem:[#allocation3 + $0x68] sm:$0xff] %v2818_v17  ;;  %v7651_v35 = vld [vmem:[%s10689_s6 + $0x90] sm:$0xff]   ;;  %v7648_v17 = vld [vmem:[%s10687_s4 + $0xb8] sm:$0xff]  }
 0x720   : > { %2839 = vst [vmem:[#allocation3 + $0x70] sm:$0xff] %v2819_v13  ;;  %2840 = vst [vmem:[#allocation3 + $0x78] sm:$0xff] %v2820_v4  ;;  %v2865_v42 = vld [vmem:[#allocation3 + $0x1] ss:$2 sm:$0xff]  ;;  %v2845_v43 = vld [vmem:[#allocation3] ss:$2 sm:$0xff] }
 0x721   : > { %2841 = vst [vmem:[#allocation3 + $0x80] sm:$0xff] %v2821_v46  ;;  %2842 = vst [vmem:[#allocation3 + $0x88] sm:$0xff] %v2822_v44  ;;  %v2867_v16 = vld [vmem:[#allocation3 + $0x11] ss:$2 sm:$0xff]  ;;  %v2885_v62 = vld [vmem:[#allocation3 + $0x2] ss:$2 sm:$0xff] }
 0x722   : > { %2843 = vst [vmem:[#allocation3 + $0x90] sm:$0xff] %v2823_v34  ;;  %2844 = vst [vmem:[#allocation3 + $0x98] sm:$0x7f] %v2824_v28  ;;  %v2905_v25 = vpack.c.bf16 %v2867_v16, %v2865_v42  ;;  %v2887_v15 = vld [vmem:[#allocation3 + $0x12] ss:$2 sm:$0xff]  ;;  %v7654_v46 = vld [vmem:[%s10689_s6 + $0xa8] sm:$0xff]  }
 0x723   : > { %v2847_v47 = vld [vmem:[#allocation3 + $0x10] ss:$2 sm:$0xff]  ;;  %v2906_v1 = vpack.c.bf16 %v2887_v15, %v2885_v62  ;;  %v2869_v20 = vld [vmem:[#allocation3 + $0x21] ss:$2 sm:$0xff]  ;;  %v2871_v32 = vld [vmem:[#allocation3 + $0x31] ss:$2 sm:$0xff] }
 0x724   : > { %v2904_v41 = vpack.c.bf16 %v2847_v47, %v2845_v43  ;;  %3149 = vmatprep.mubr.bf16.mxu0 %v2905_v25  ;;  %v2908_v19 = vpack.c.bf16 %v2871_v32, %v2869_v20  ;;  %v2889_v26 = vld [vmem:[#allocation3 + $0x22] ss:$2 sm:$0xff]  ;;  %v2891_v57 = vld [vmem:[#allocation3 + $0x32] ss:$2 sm:$0xff]  ;;  %v2873_v0 = vld [vmem:[#allocation3 + $0x41] ss:$2 sm:$0xff] }
 0x725   : > { %7235 = vmatmul.mubr.bf16.vlgmr.msra.gmra.mrb[52].mxu1 %v2906_v1  ;;  %v2849_v5 = vld [vmem:[#allocation3 + $0x20] ss:$2 sm:$0xff]  ;;  %v2851_v54 = vld [vmem:[#allocation3 + $0x30] ss:$2 sm:$0xff]  ;;  %v2875_v60 = vld [vmem:[#allocation3 + $0x51] ss:$2 sm:$0xff]  ;;  %v2909_v31 = vpack.c.bf16 %v2891_v57, %v2889_v26 }
 0x726   : > { %3150 = vmatmul.mubr.bf16.vlgmr.msra.gmra.mrb[64].mxu0 %v2904_v41  ;;  %7238 = vmatprep.mubr.msk.bf16.mxu1 %vm8010_vm1, %v10802_v2  ;;  %v2907_v11 = vpack.c.bf16 %v2851_v54, %v2849_v5  ;;  %v2911_v27 = vpack.c.bf16 %v2875_v60, %v2873_v0  ;;  %v2893_v9 = vld [vmem:[#allocation3 + $0x42] ss:$2 sm:$0xff]  ;;  %v2895_v59 = vld [vmem:[#allocation3 + $0x52] ss:$2 sm:$0xff]  ;;  %v2877_v40 = vld [vmem:[#allocation3 + $0x61] ss:$2 sm:$0xff] }
 0x727   : > { %3157 = vmatprep.mubr.bf16.mxu0 %v2908_v19  ;;  %v2853_v22 = vld [vmem:[#allocation3 + $0x40] ss:$2 sm:$0xff]  ;;  %v2855_v37 = vld [vmem:[#allocation3 + $0x50] ss:$2 sm:$0xff]  ;;  %v2879_v38 = vld [vmem:[#allocation3 + $0x71] ss:$2 sm:$0xff]  ;;  %v2912_v7 = vpack.c.bf16 %v2895_v59, %v2893_v9  ;;  %7255 = vmatpush3.bf16.msra.mxu0 %v7641_v55 }
 0x728   : > { %v2910_v30 = vpack.c.bf16 %v2855_v37, %v2853_v22  ;;  %v2914_v23 = vpack.c.bf16 %v2879_v38, %v2877_v40  ;;  %v2897_v51 = vld [vmem:[#allocation3 + $0x62] ss:$2 sm:$0xff]  ;;  %v2899_v61 = vld [vmem:[#allocation3 + $0x72] ss:$2 sm:$0xff]  ;;  %v2881_v33 = vld [vmem:[#allocation3 + $0x81] ss:$2 sm:$0xff]  ;;  %7256 = vmatprep.subr.bf16.mxu0 %v10802_v2  ;;  %7275 = vmatpush3.bf16.msra.mxu1 %v7649_v53 }
 0x729   : > { %v2857_v3 = vld [vmem:[#allocation3 + $0x60] ss:$2 sm:$0xff]  ;;  %v2859_v24 = vld [vmem:[#allocation3 + $0x70] ss:$2 sm:$0xff]  ;;  %v2915_v49 = vpack.c.bf16 %v2899_v61, %v2897_v51  ;;  %7276 = vmatprep.subr.bf16.mxu1 %v10802_v2 }
 0x72a   : > { %v2883_v36 = vld [vmem:[#allocation3 + $0x91] ss:$2 sm:$0x7f]  ;;  %v2913_v29 = vpack.c.bf16 %v2859_v24, %v2857_v3  ;;  %v2901_v10 = vld [vmem:[#allocation3 + $0x82] ss:$2 sm:$0xff] }
 0x72b   : > { %v2917_v58 = vpack.c.bf16 %v2883_v36, %v2881_v33  ;;  %v2903_v6 = vld [vmem:[#allocation3 + $0x92] ss:$2 sm:$0x7f]  ;;  %v2861_v12 = vld [vmem:[#allocation3 + $0x80] ss:$2 sm:$0xff]  ;;  %7257 = vmatpush3.bf16.msra.mxu0 %v7642_v14 }
 0x72c   : > { %v2863_v39 = vld [vmem:[#allocation3 + $0x90] ss:$2 sm:$0x7f]  ;;  %v2918_v48 = vpack.c.bf16 %v2903_v6, %v2901_v10  ;;  %7258 = vmatprep.subr.bf16.mxu0 %v10802_v2  ;;  %7277 = vmatpush3.bf16.msra.mxu1 %v7650_v56  ;;  %v7653_v4 = vld [vmem:[%s10689_s6 + $0xa0] sm:$0xff]  }
 0x72d   : > { %7239 = vmatmul.mubr.bf16.gmra.mrb[56].mxu1 %v2909_v31  ;;  %v2916_v50 = vpack.c.bf16 %v2863_v39, %v2861_v12  ;;  %7278 = vmatprep.subr.bf16.mxu1 %v10802_v2  ;;  %v7652_v13 = vld [vmem:[%s10689_s6 + $0x98] sm:$0xff]   ;;  %v7655_v44 = vld [vmem:[%s10689_s6 + $0xb0] sm:$0xff]   ;;  %v9899_v16 = vld [vmem:[%s10685_s2 + $0x2] ss:$0 sm:$0xff] }
 0x72e   : > { %3158 = vmatmul.mubr.bf16.gmra.mrb[68].mxu0 %v2907_v11  ;;  %7242 = vmatprep.mubr.msk.bf16.mxu1 %vm8010_vm1, %v10802_v2 }
 0x72f   : > { %3165 = vmatprep.mubr.bf16.mxu0 %v2911_v27  ;;  %7259 = vmatpush3.bf16.msra.mxu0 %v7643_v63 }
 0x730   : > { %7260 = vmatprep.subr.bf16.mxu0 %v10802_v2  ;;  %7279 = vmatpush3.bf16.msra.mxu1 %v7651_v35 }
 0x731   : > { %7280 = vmatprep.subr.bf16.mxu1 %v10802_v2 }
 0x733   : > { %7261 = vmatpush3.bf16.msra.mxu0 %v7644_v52 }
 0x734   : > { %7262 = vmatprep.subr.bf16.mxu0 %v10802_v2  ;;  %7281 = vmatpush3.bf16.msra.mxu1 %v7652_v13 }
 0x735   : > { %7243 = vmatmul.mubr.bf16.gmra.mrb[60].mxu1 %v2912_v7  ;;  %7282 = vmatprep.subr.bf16.mxu1 %v10802_v2 }
 0x736   : > { %3166 = vmatmul.mubr.bf16.gmra.mrb[72].mxu0 %v2910_v30  ;;  %7246 = vmatprep.mubr.msk.bf16.mxu1 %vm8010_vm1, %v10802_v2 }
 0x737   : > { %3173 = vmatprep.mubr.bf16.mxu0 %v2914_v23  ;;  %7263 = vmatpush3.bf16.msra.mxu0 %v7645_v45 }
 0x738   : > { %7264 = vmatprep.subr.bf16.mxu0 %v10802_v2  ;;  %7283 = vmatpush3.bf16.msra.mxu1 %v7653_v4 }
 0x739   : > { %7284 = vmatprep.subr.bf16.mxu1 %v10802_v2 }
 0x73b   : > { %7265 = vmatpush3.bf16.msra.mxu0 %v7646_v8 }
 0x73c   : > { %7266 = vmatprep.subr.bf16.mxu0 %v10802_v2  ;;  %7285 = vmatpush3.bf16.msra.mxu1 %v7654_v46 }
 0x73d   : > { %7247 = vmatmul.mubr.bf16.gmra.mrb[64].mxu1 %v2915_v49  ;;  %7286 = vmatprep.subr.bf16.mxu1 %v10802_v2 }
 0x73e   : > { %3174 = vmatmul.mubr.bf16.gmra.mrb[76].mxu0 %v2913_v29  ;;  %7250 = vmatprep.mubr.msk.bf16.mxu1 %vm8010_vm1, %v10802_v2 }
 0x73f   : > { %3181 = vmatprep.mubr.bf16.mxu0 %v2917_v58  ;;  %7267 = vmatpush3.bf16.msra.mxu0 %v7647_v18 }
 0x740   : > { %7268 = vmatprep.subr.bf16.mxu0 %v10802_v2  ;;  %7287 = vmatpush3.bf16.msra.mxu1 %v7655_v44 }
 0x741   : > { %7288 = vmatprep.subr.bf16.mxu1 %v10802_v2 }
 0x743   : > { %7269 = vmatpush3.bf16.msra.mxu0 %v7648_v17 }
 0x745   : > { %7251 = vmatmul.mubr.bf16.gmra.mrb[68].mxu1 %v2918_v48 }
 0x746   : > { %3182 = vmatmul.mubr.bf16.gmra.mrb[80].mxu0 %v2916_v50  ;;  %7290 = vmatprep.mubr.msk.bf16.mxu1 %vm8010_vm1, %v10802_v2 }
 0x747   : > { %7270 = vmatprep.mubr.msk.bf16.mxu0 %vm8010_vm1, %v10802_v2 }
 0x7f8   : > { %v3224_v34 = vpop.f32.mrb[52].mxu1 }
 0x7f9   : > { %v6777_v28 = vpop.f32.mrb[64].mxu0  ;;  %v7236_v42 = vpop.f32.mrb[53].mxu1 }
 0x7fa   : > { %v6778_v62 = vpop.f32.mrb[65].mxu0  ;;  %v3227_v15 = vpop.f32.mrb[54].mxu1 }
 0x7fb   : > { %v6779_v25 = vadd.f32 %v6778_v62, %v6777_v28  ;;  %v6780_v43 = vpop.f32.mrb[66].mxu0  ;;  %v7237_v47 = vpop.f32.mrb[55].mxu1 }
 0x7fc   : > { %v6781_v1 = vpop.f32.mrb[67].mxu0 }
 0x7fd   : > { %v3152_v41 = vadd.f32 %v6779_v25, %v9899_v16  ;;  %v6782_v20 = vadd.f32 %v6781_v1, %v6780_v43 }
 0x7ff   : > { %v9902_v32 = vadd.f32 %v3224_v34, %v3152_v41  ;;  %v3155_v19 = vadd.f32 %v6782_v20, %v9899_v16 }
 0x800   : > { %v3232_v5 = vpop.f32.mrb[56].mxu1 }
 0x801   : > { %v3263_v26 = vmul.f32 %v9902_v32, %v9902_v32  ;;  %v9907_v57 = vadd.f32 %v3227_v15, %v3155_v19  ;;  %v6783_v54 = vpop.f32.mrb[68].mxu0  ;;  %v7240_v0 = vpop.f32.mrb[57].mxu1 }
 0x802   : > { %v6784_v60 = vpop.f32.mrb[69].mxu0  ;;  %v3235_v9 = vpop.f32.mrb[58].mxu1 }
 0x803   : > { %v3273_v31 = vmul.f32 %v3263_v26, %v9902_v32  ;;  %v3264_v11 = vmul.f32 %v9907_v57, %v9907_v57  ;;  %v6785_v27 = vadd.f32 %v6784_v60, %v6783_v54  ;;  %v6786_v59 = vpop.f32.mrb[70].mxu0  ;;  %v7241_v22 = vpop.f32.mrb[59].mxu1 }
 0x804   : > { %v6787_v37 = vpop.f32.mrb[71].mxu0 }
 0x805   : > { %v3283_v40 = vmul.f32 0.044715, %v3273_v31  ;;  %v3274_v38 = vmul.f32 %v3264_v11, %v9907_v57  ;;  %v3160_v7 = vadd.f32 %v6785_v27, %v9899_v16  ;;  %v6788_v30 = vadd.f32 %v6787_v37, %v6786_v59 }
 0x807   : > { %v3284_v23 = vmul.f32 0.044715, %v3274_v38  ;;  %v9914_v51 = vadd.f32 %v3232_v5, %v3160_v7  ;;  %v3163_v61 = vadd.f32 %v6788_v30, %v9899_v16  ;;  %v3293_v3 = vadd.f32 %v3283_v40, %v9902_v32 }
 0x808   : > { %v3240_v49 = vpop.f32.mrb[60].mxu1 }
 0x809   : > { %v3294_v24 = vadd.f32 %v3284_v23, %v9907_v57  ;;  %v3265_v33 = vmul.f32 %v9914_v51, %v9914_v51  ;;  %v9921_v36 = vadd.f32 %v3235_v9, %v3163_v61  ;;  %v6789_v29 = vpop.f32.mrb[72].mxu0  ;;  %v7244_v58 = vpop.f32.mrb[61].mxu1  ;;  %v3303_v52 = vmul.f32 0.7978846, %v3293_v3 }
 0x80a   : > { %v6790_v10 = vpop.f32.mrb[73].mxu0  ;;  %v3243_v48 = vpop.f32.mrb[62].mxu1 }
 0x80b   : > { %v3304_v6 = vmul.f32 0.7978846, %v3294_v24  ;;  %v3275_v12 = vmul.f32 %v3265_v33, %v9914_v51  ;;  %v3266_v39 = vmul.f32 %v9921_v36, %v9921_v36  ;;  %v6792_v50 = vpop.f32.mrb[74].mxu0  ;;  %v6791_v55 = vadd.f32 %v6790_v10, %v6789_v29  ;;  %v7245_v14 = vpop.f32.mrb[63].mxu1 }
 0x80c   : > { %v6793_v63 = vpop.f32.mrb[75].mxu0 }
 0x80d   : > { %v3285_v45 = vmul.f32 0.044715, %v3275_v12  ;;  %v3276_v53 = vmul.f32 %v3266_v39, %v9921_v36  ;;  %v6794_v8 = vadd.f32 %v6793_v63, %v6792_v50  ;;  %v3168_v56 = vadd.f32 %v6791_v55, %v9899_v16 }
 0x80e   : > { %7939 = vtanh.f32 %v3304_v6 }
 0x80f   : > { %v3295_v18 = vadd.f32 %v3285_v45, %v9914_v51  ;;  %v3286_v35 = vmul.f32 0.044715, %v3276_v53  ;;  %v3171_v17 = vadd.f32 %v6794_v8, %v9899_v16  ;;  %v9930_v13 = vadd.f32 %v3240_v49, %v3168_v56 }
 0x810   : > { %7941 = vtanh.f32 %v3303_v52  ;;  %v3248_v34 = vpop.f32.mrb[64].mxu1 }
 0x811   : > { %v3305_v4 = vmul.f32 0.7978846, %v3295_v18  ;;  %v3296_v46 = vadd.f32 %v3286_v35, %v9921_v36  ;;  %v9933_v44 = vadd.f32 %v3243_v48, %v3171_v17  ;;  %v6795_v28 = vpop.f32.mrb[76].mxu0  ;;  %v3267_v42 = vmul.f32 %v9930_v13, %v9930_v13  ;;  %v7248_v62 = vpop.f32.mrb[65].mxu1 }
 0x812   : > { %v6796_v25 = vpop.f32.mrb[77].mxu0  ;;  %v3251_v1 = vpop.f32.mrb[66].mxu1 }
 0x813   : > { %7943 = vtanh.f32 %v3305_v4  ;;  %v3306_v15 = vmul.f32 0.7978846, %v3296_v46  ;;  %v3268_v43 = vmul.f32 %v9933_v44, %v9933_v44  ;;  %v6797_v47 = vadd.f32 %v6796_v25, %v6795_v28  ;;  %v6798_v41 = vpop.f32.mrb[78].mxu0  ;;  %v7249_v19 = vpop.f32.mrb[67].mxu1 }
 0x814   : > { %v3277_v20 = vmul.f32 %v3267_v42, %v9930_v13  ;;  %v6799_v26 = vpop.f32.mrb[79].mxu0 }
 0x815   : > { %7945 = vtanh.f32 %v3306_v15  ;;  %v3278_v5 = vmul.f32 %v3268_v43, %v9933_v44  ;;  %v3176_v54 = vadd.f32 %v6797_v47, %v9899_v16  ;;  %v6800_v0 = vadd.f32 %v6799_v26, %v6798_v41 }
 0x816   : > { %v3287_v60 = vmul.f32 0.044715, %v3277_v20 }
 0x817   : > { %v3288_v31 = vmul.f32 0.044715, %v3278_v5  ;;  %v9942_v11 = vadd.f32 %v3248_v34, %v3176_v54  ;;  %v3179_v27 = vadd.f32 %v6800_v0, %v9899_v16 }
 0x818   : > { %v3297_v9 = vadd.f32 %v3287_v60, %v9930_v13  ;;  %v7940_v59 = vpop.eup %7939  ;;  %v3256_v38 = vpop.f32.mrb[68].mxu1 }
 0x819   : > { %v3298_v22 = vadd.f32 %v3288_v31, %v9933_v44  ;;  %v3269_v37 = vmul.f32 %v9942_v11, %v9942_v11  ;;  %v9949_v40 = vadd.f32 %v3251_v1, %v3179_v27  ;;  %v6801_v7 = vpop.f32.mrb[80].mxu0  ;;  %v7252_v23 = vpop.f32.mrb[69].mxu1  ;;  %v3324_v6 = vadd.f32 1.0, %v7940_v59 }
 0x81a   : > { %v3307_v30 = vmul.f32 0.7978846, %v3297_v9  ;;  %v6802_v61 = vpop.f32.mrb[81].mxu0  ;;  %v7942_v3 = vpop.eup %7941 }
 0x81b   : > { %v3308_v24 = vmul.f32 0.7978846, %v3298_v22  ;;  %v3279_v33 = vmul.f32 %v3269_v37, %v9942_v11  ;;  %v3270_v49 = vmul.f32 %v9949_v40, %v9949_v40  ;;  %v6803_v29 = vadd.f32 %v6802_v61, %v6801_v7  ;;  %v3259_v58 = vpop.f32.mrb[70].mxu1  ;;  %v6804_v10 = vpop.f32.mrb[82].mxu0 }
 0x81c   : > { %7947 = vtanh.f32 %v3307_v30  ;;  %v7253_v12 = vpop.f32.mrb[71].mxu1  ;;  %v6805_v39 = vpop.f32.mrb[83].mxu0  ;;  %v3323_v63 = vadd.f32 1.0, %v7942_v3  ;;  %v3334_v35 = vmul.f32 0.5, %v3324_v6 }
 0x81d   : > { %v7944_v48 = vpop.eup %7943  ;;  %7949 = vtanh.f32 %v3308_v24  ;;  %v3289_v50 = vmul.f32 0.044715, %v3279_v33  ;;  %v3280_v55 = vmul.f32 %v3270_v49, %v9949_v40  ;;  %v3184_v14 = vadd.f32 %v6803_v29, %v9899_v16 }
 0x81e   : > { %v3325_v52 = vadd.f32 1.0, %v7944_v48  ;;  %v6806_v45 = vadd.f32 %v6805_v39, %v6804_v10  ;;  %v3333_v28 = vmul.f32 0.5, %v3323_v63  ;;  %v9960_v47 = vmul.f32 %v3334_v35, %v9907_v57 }
 0x81f   : > { %v7946_v53 = vpop.eup %7945  ;;  %v3299_v8 = vadd.f32 %v3289_v50, %v9942_v11  ;;  %v3290_v56 = vmul.f32 0.044715, %v3280_v55  ;;  %v3257_v18 = vadd.f32 %v3256_v38, %v3184_v14 }
 0x820   : > { %v3187_v17 = vadd.f32 %v6806_v45, %v9899_v16  ;;  %v3335_v42 = vmul.f32 0.5, %v3325_v52  ;;  %v3326_v62 = vadd.f32 1.0, %v7946_v53  ;;  %v9963_v16 = vmul.f32 %v3333_v28, %v9902_v32  ;;  %v3388_v28 = vld [vmem:[%s10688_s5 + $0x2] sm:$0x1] }
 0x821   : > { %v3309_v4 = vmul.f32 0.7978846, %v3299_v8  ;;  %v3300_v46 = vadd.f32 %v3290_v56, %v9949_v40  ;;  %v3271_v34 = vmul.f32 %v3257_v18, %v3257_v18 }
 0x822   : > { %v3260_v25 = vadd.f32 %v3259_v58, %v3187_v17  ;;  %v9966_v19 = vmul.f32 %v3335_v42, %v9914_v51  ;;  %v3336_v26 = vmul.f32 0.5, %v3326_v62  ;;  %v3353_v31 = vadd.f32 %v9960_v47, %v9963_v16 }
 0x823   : > { %7951 = vtanh.f32 %v3309_v4  ;;  %v3310_v15 = vmul.f32 0.7978846, %v3300_v46  ;;  %v3281_v43 = vmul.f32 %v3271_v34, %v3257_v18 }
 0x824   : > { %v3272_v1 = vmul.f32 %v3260_v25, %v3260_v25  ;;  %v3354_v22 = vadd.f32 %v3353_v31, %v9966_v19  ;;  %v9972_v32 = vmul.f32 %v3336_v26, %v9921_v36  ;;  %v7658_v26 = vld [vmem:[%s10684_s1 + $0x2c0] sm:$0xff]   ;;  %v7663_v31 = vld [vmem:[%s10684_s1 + $0x290] sm:$0xff]  }
 0x825   : > { %7953 = vtanh.f32 %v3310_v15  ;;  %v3291_v41 = vmul.f32 0.044715, %v3281_v43 }
 0x826   : > { %v7948_v20 = vpop.eup %7947  ;;  %v3282_v5 = vmul.f32 %v3272_v1, %v3260_v25  ;;  %v3355_v23 = vadd.f32 %v3354_v22, %v9972_v32  ;;  %v7668_v22 = vld [vmem:[%s10684_s1 + $0x258] sm:$0xff]  }
 0x827   : > { %v7950_v54 = vpop.eup %7949  ;;  %v3327_v0 = vadd.f32 1.0, %v7948_v20  ;;  %v3301_v60 = vadd.f32 %v3291_v41, %v3257_v18  ;;  %v7657_v20 = vld [vmem:[%s10684_s1 + $0x280] sm:$0xff]  }
 0x828   : > { %v3328_v57 = vadd.f32 1.0, %v7950_v54  ;;  %v3292_v27 = vmul.f32 0.044715, %v3282_v5  ;;  %v7659_v5 = vld [vmem:[%s10684_s1 + $0x240] sm:$0xff]   ;;  %v7660_v54 = vld [vmem:[%s10684_s1 + $0x288] sm:$0xff]   ;;  %6838 = vmatprep.subr.bf16.mxu0 %v7657_v20 }
 0x829   : > { %v3337_v9 = vmul.f32 0.5, %v3327_v0  ;;  %v3311_v59 = vmul.f32 0.7978846, %v3301_v60  ;;  %v7661_v0 = vld [vmem:[%s10684_s1 + $0x2c8] sm:$0xff]  }
 0x82a   : > { %v3302_v37 = vadd.f32 %v3292_v27, %v3260_v25  ;;  %v3338_v38 = vmul.f32 0.5, %v3328_v57  ;;  %v7662_v60 = vld [vmem:[%s10684_s1 + $0x248] sm:$0xff]   ;;  %v7664_v57 = vld [vmem:[%s10684_s1 + $0x2d0] sm:$0xff]  }
 0x82b   : > { %7955 = vtanh.f32 %v3311_v59  ;;  %v9975_v51 = vmul.f32 %v3337_v9, %v9930_v13  ;;  %v7665_v27 = vld [vmem:[%s10684_s1 + $0x250] sm:$0xff]   ;;  %v7666_v9 = vld [vmem:[%s10684_s1 + $0x298] sm:$0xff]  }
 0x82c   : > { %v3312_v7 = vmul.f32 0.7978846, %v3302_v37  ;;  %v9980_v33 = vmul.f32 %v3338_v38, %v9933_v44  ;;  %v7667_v59 = vld [vmem:[%s10684_s1 + $0x2d8] sm:$0xff]   ;;  %v7669_v37 = vld [vmem:[%s10684_s1 + $0x2a0] sm:$0xff]  }
 0x82d   : > { %v7952_v30 = vpop.eup %7951  ;;  %v3356_v24 = vadd.f32 %v3355_v23, %v9975_v51  ;;  %v7670_v38 = vld [vmem:[%s10684_s1 + $0x2e0] sm:$0xff]   ;;  %v7673_v23 = vld [vmem:[%s10684_s1 + $0x2e8] sm:$0xff]  }
 0x82e   : > { %v3329_v61 = vadd.f32 1.0, %v7952_v30  ;;  %7957 = vtanh.f32 %v3312_v7  ;;  %v7671_v7 = vld [vmem:[%s10684_s1 + $0x260] sm:$0xff]   ;;  %v7672_v30 = vld [vmem:[%s10684_s1 + $0x2a8] sm:$0xff]  }
 0x82f   : > { %v7954_v3 = vpop.eup %7953  ;;  %v3357_v58 = vadd.f32 %v3356_v24, %v9980_v33  ;;  %v7676_v24 = vld [vmem:[%s10684_s1 + $0x2f0] sm:$0xff]  }
 0x830   : > { %v3339_v36 = vmul.f32 0.5, %v3329_v61  ;;  %v3330_v49 = vadd.f32 1.0, %v7954_v3  ;;  %v7674_v61 = vld [vmem:[%s10684_s1 + $0x268] sm:$0xff]   ;;  %v7675_v3 = vld [vmem:[%s10684_s1 + $0x2b0] sm:$0xff]  }
 0x832   : > { %v9983_v29 = vmul.f32 %v3339_v36, %v9942_v11  ;;  %v3340_v13 = vmul.f32 0.5, %v3330_v49  ;;  %v7677_v36 = vld [vmem:[%s10684_s1 + $0x270] sm:$0xff]   ;;  %v7678_v49 = vld [vmem:[%s10684_s1 + $0x2b8] sm:$0xff]  }
 0x834   : > { %v3358_v6 = vadd.f32 %v3357_v58, %v9983_v29  ;;  %v9988_v12 = vmul.f32 %v3340_v13, %v9949_v40  ;;  %v7679_v13 = vld [vmem:[%s10684_s1 + $0x2f8] sm:$0xff]  }
 0x835   : > { %v7956_v10 = vpop.eup %7955  ;;  %v7680_v58 = vld [vmem:[%s10684_s1 + $0x278] sm:$0xff]  }
 0x836   : > { %v3331_v39 = vadd.f32 1.0, %v7956_v10  ;;  %v3359_v44 = vadd.f32 %v3358_v6, %v9988_v12  ;;  %v3496_v10 = vld [vmem:[%s10690_s7 + $0x2] sm:$0x1] }
 0x838   : > { %v7958_v48 = vpop.eup %7957  ;;  %v3341_v50 = vmul.f32 0.5, %v3331_v39 }
 0x839   : > { %v3332_v55 = vadd.f32 1.0, %v7958_v48 }
 0x83a   : > { %v9991_v14 = vmul.f32 %v3341_v50, %v3257_v18  ;;  %v7656_v18 = vld [vmem:[%s10689_s6 + $0xb8] sm:$0xff]  }
 0x83b   : > { %v3342_v63 = vmul.f32 0.5, %v3332_v55  ;;  %7289 = vmatpush3.bf16.msra.mxu1 %v7656_v18 }
 0x83c   : > { %v3360_v11 = vadd.f32 %v3359_v44, %v9991_v14  ;;  %7294 = vmatprep.subr.bf16.mxu1 %v10802_v2 }
 0x83d   : > { %v9994_v52 = vmul.f32 %v3342_v63, %v3260_v25 }
 0x83f   : > { %v3361_v45 = vsel %vm819_vm0, %v9994_v52, 0.0 }
 0x840   : > { %v3362_v53 = vadd.f32 %v3361_v45, %v3360_v11 }
 0x842   : > { %v3363_v8 = vrot.slane %v3362_v53, 4 }
 0x844   : > { %v3364_v40 = vadd.f32 %v3363_v8, %v3362_v53 }
 0x846   : > { %v3365_v56 = vrot.slane %v3364_v40, 2 }
 0x848   : > { %v3366_v35 = vadd.f32 %v3365_v56, %v3364_v40 }
 0x84a   : > { %v3367_v17 = vrot.slane %v3366_v35, 1 }
 0x84c   : > { %v3368_v4 = vadd.f32 %v3367_v17, %v3366_v35 }
 0x84e   : > { %v3369_v46 = vmul.f32 0.012658228, %v3368_v4 }
 0x850   : > { %v3370_v34 = vpack.c.bf16 %v3369_v46, %v3369_v46 }
 0x852   : > { %7271 = vmatmul.mubr.bf16.vlgmr.msra.gmra.mrb[84].mxu0 %v3370_v34 }
 0x853   : > { %6839 = vmatpush3.bf16.msra.mxu0 %v7659_v5 }
 0x854   : > { %6840 = vmatprep.subr.bf16.mxu0 %v7660_v54 }
 0x857   : > { %6841 = vmatpush3.bf16.msra.mxu0 %v7662_v60 }
 0x858   : > { %6842 = vmatprep.subr.bf16.mxu0 %v7663_v31 }
 0x85b   : > { %6843 = vmatpush3.bf16.msra.mxu0 %v7665_v27  ;;  %v7682_v27 = vld [vmem:[%s10687_s4 + $0xc8] sm:$0xff]  }
 0x85c   : > { %6844 = vmatprep.subr.bf16.mxu0 %v7666_v9  ;;  %v7683_v9 = vld [vmem:[%s10687_s4 + $0xd0] sm:$0xff]  }
 0x85f   : > { %6845 = vmatpush3.bf16.msra.mxu0 %v7668_v22  ;;  %v7685_v22 = vld [vmem:[%s10687_s4 + $0xe0] sm:$0xff]  }
 0x860   : > { %6846 = vmatprep.subr.bf16.mxu0 %v7669_v37  ;;  %v7689_v37 = vld [vmem:[%s10689_s6 + $0xc0] sm:$0xff]  }
 0x863   : > { %6847 = vmatpush3.bf16.msra.mxu0 %v7671_v7  ;;  %v7690_v7 = vld [vmem:[%s10689_s6 + $0xc8] sm:$0xff]  }
 0x864   : > { %6848 = vmatprep.subr.bf16.mxu0 %v7672_v30  ;;  %v7687_v30 = vld [vmem:[%s10687_s4 + $0xf0] sm:$0xff]  }
 0x867   : > { %6849 = vmatpush3.bf16.msra.mxu0 %v7674_v61  ;;  %v7688_v61 = vld [vmem:[%s10687_s4 + $0xf8] sm:$0xff]  }
 0x868   : > { %6850 = vmatprep.subr.bf16.mxu0 %v7675_v3  ;;  %v7692_v3 = vld [vmem:[%s10689_s6 + $0xd8] sm:$0xff]  }
 0x86b   : > { %6851 = vmatpush3.bf16.msra.mxu0 %v7677_v36  ;;  %v7694_v36 = vld [vmem:[%s10689_s6 + $0xe8] sm:$0xff]  }
 0x86c   : > { %6852 = vmatprep.subr.bf16.mxu0 %v7678_v49 }
 0x86f   : > { %6853 = vmatpush3.bf16.msra.mxu0 %v7680_v58 }
 0x870   : > { %7322 = vmatprep.subr.bf16.mxu0 %v10802_v2 }
 0x925   : > { %v3471_v42 = vpop.f32.mrb[84].mxu0 }
 0x926   : > { %v3472_v62 = vadd.f32 %v3471_v42, %v3388_v28  ;;  %v7272_v25 = vpop.f32.mrb[85].mxu0 }
 0x927   : > { %v3474_v15 = vpop.f32.mrb[86].mxu0 }
 0x928   : > { %v3477_v43 = vmax.f32 %v3472_v62, 0.0  ;;  %v7273_v1 = vpop.f32.mrb[87].mxu0 }
 0x92a   : > { %v3478_v41 = vpack.c.bf16 %v3477_v43, %v3477_v43 }
 0x92c   : > { %7291 = vmatmul.mubr.bf16.vlgmr.msra.gmra.mrb[72].mxu1 %v3478_v41 }
 0x92d   : > { %7310 = vmatprep.mubr.msk.bf16.mxu1 %vm8010_vm1, %v10802_v2  ;;  %7295 = vmatpush3.bf16.msra.mxu1 %v7658_v26 }
 0x92e   : > { %7296 = vmatprep.subr.bf16.mxu1 %v10802_v2 }
 0x931   : > { %7297 = vmatpush3.bf16.msra.mxu1 %v7661_v0 }
 0x932   : > { %7298 = vmatprep.subr.bf16.mxu1 %v10802_v2 }
 0x935   : > { %7299 = vmatpush3.bf16.msra.mxu1 %v7664_v57  ;;  %v7681_v57 = vld [vmem:[%s10687_s4 + $0xc0] sm:$0xff]  }
 0x936   : > { %7300 = vmatprep.subr.bf16.mxu1 %v10802_v2 }
 0x939   : > { %7301 = vmatpush3.bf16.msra.mxu1 %v7667_v59  ;;  %v7684_v59 = vld [vmem:[%s10687_s4 + $0xd8] sm:$0xff]  }
 0x93a   : > { %7302 = vmatprep.subr.bf16.mxu1 %v10802_v2 }
 0x93d   : > { %7303 = vmatpush3.bf16.msra.mxu1 %v7670_v38  ;;  %v7686_v38 = vld [vmem:[%s10687_s4 + $0xe8] sm:$0xff]  }
 0x93e   : > { %7304 = vmatprep.subr.bf16.mxu1 %v10802_v2 }
 0x941   : > { %7305 = vmatpush3.bf16.msra.mxu1 %v7673_v23  ;;  %v7691_v23 = vld [vmem:[%s10689_s6 + $0xd0] sm:$0xff]  }
 0x942   : > { %7306 = vmatprep.subr.bf16.mxu1 %v10802_v2 }
 0x945   : > { %7307 = vmatpush3.bf16.msra.mxu1 %v7676_v24  ;;  %v7693_v24 = vld [vmem:[%s10689_s6 + $0xe0] sm:$0xff]  }
 0x946   : > { %7308 = vmatprep.subr.bf16.mxu1 %v10802_v2 }
 0x949   : > { %7309 = vmatpush3.bf16.msra.mxu1 %v7679_v13 }
 0x94a   : > { %7342 = vmatprep.subr.bf16.mxu1 %v10802_v2 }
 0x9ff   : > { %v3579_v6 = vpop.f32.mrb[72].mxu1 }
 0xa00   : > { %v3580_v39 = vadd.f32 %v3579_v6, %v3496_v10  ;;  %v7292_v48 = vpop.f32.mrb[73].mxu1  ;;  %v6200_v10 = vld [vmem:[%s10685_s2 + $0x3] ss:$0 sm:$0xff] }
 0xa01   : > { %v3582_v50 = vpop.f32.mrb[74].mxu1 }
 0xa02   : > { %v6151_v55 = vmul.f32 -1.442695, %v3580_v39  ;;  %v7293_v44 = vpop.f32.mrb[75].mxu1 }
 0xa04   : > { %7959 = vpow2.f32 %v6151_v55 }
 0xa0e   : > { %v7960_v63 = vpop.eup %7959 }
 0xa0f   : > { %v3588_v11 = vadd.f32 1.0, %v7960_v63 }
 0xa11   : > { %7961 = vrcp.f32 %v3588_v11 }
 0xa1b   : > { %v7962_v45 = vpop.eup %7961 }
 0xa1c   : > { %v3594_v53 = vrot.slane %v7962_v45, %v9309_v21 }
 0xa1e   : > { %v3595_v8 = vmul.f32 %v3594_v53, %v9963_v16  ;;  %v3596_v40 = vmul.f32 %v3594_v53, %v9960_v47  ;;  %v3597_v56 = vmul.f32 %v3594_v53, %v9966_v19  ;;  %v3598_v35 = vmul.f32 %v3594_v53, %v9972_v32 }
 0xa1f   : > { %v3599_v17 = vmul.f32 %v3594_v53, %v9975_v51  ;;  %v3600_v4 = vmul.f32 %v3594_v53, %v9980_v33  ;;  %v3601_v46 = vmul.f32 %v3594_v53, %v9983_v29  ;;  %v3602_v34 = vmul.f32 %v3594_v53, %v9988_v12 }
 0xa20   : > { %3605 = vst [vmem:[#allocation2] sm:$0xff] %v3595_v8  ;;  %3606 = vst [vmem:[#allocation2 + $0x8] sm:$0xff] %v3596_v40  ;;  %v3603_v16 = vmul.f32 %v3594_v53, %v9991_v14  ;;  %v3604_v47 = vmul.f32 %v3594_v53, %v9994_v52 }
 0xa21   : > { %3607 = vst [vmem:[#allocation2 + $0x10] sm:$0xff] %v3597_v56  ;;  %3608 = vst [vmem:[#allocation2 + $0x18] sm:$0xff] %v3598_v35 }
 0xa22   : > { %3609 = vst [vmem:[#allocation2 + $0x20] sm:$0xff] %v3599_v17  ;;  %3610 = vst [vmem:[#allocation2 + $0x28] sm:$0xff] %v3600_v4 }
 0xa23   : > { %3611 = vst [vmem:[#allocation2 + $0x30] sm:$0xff] %v3601_v46  ;;  %3612 = vst [vmem:[#allocation2 + $0x38] sm:$0xff] %v3602_v34 }
 0xa24   : > { %3613 = vst [vmem:[#allocation2 + $0x40] sm:$0xff] %v3603_v16  ;;  %3614 = vst [vmem:[#allocation2 + $0x48] sm:$0x7f] %v3604_v47 }
 0xa27   : > { %v3620_v19 = vld [vmem:[#allocation2 + $0x1] ss:$2 sm:$0xff]  ;;  %v3615_v12 = vld [vmem:[#allocation2] ss:$2 sm:$0xff] }
 0xa28   : > { %v3621_v32 = vld [vmem:[#allocation2 + $0x11] ss:$2 sm:$0xff]  ;;  %v3626_v51 = vld [vmem:[#allocation2 + $0x2] ss:$2 sm:$0xff] }
 0xa29   : > { %v3636_v33 = vpack.c.bf16 %v3621_v32, %v3620_v19  ;;  %v3628_v29 = vld [vmem:[#allocation2 + $0x12] ss:$2 sm:$0xff]  ;;  %v3622_v62 = vld [vmem:[#allocation2 + $0x21] ss:$2 sm:$0xff] }
 0xa2a   : > { %v3616_v18 = vld [vmem:[#allocation2 + $0x10] ss:$2 sm:$0xff]  ;;  %v3637_v28 = vpack.c.bf16 %v3628_v29, %v3626_v51  ;;  %v3623_v25 = vld [vmem:[#allocation2 + $0x31] ss:$2 sm:$0xff]  ;;  %v3617_v43 = vld [vmem:[#allocation2 + $0x20] ss:$2 sm:$0xff] }
 0xa2b   : > { %v3635_v42 = vpack.c.bf16 %v3616_v18, %v3615_v12  ;;  %3874 = vmatprep.mubr.bf16.mxu0 %v3636_v33  ;;  %v3639_v14 = vpack.c.bf16 %v3623_v25, %v3622_v62  ;;  %v3630_v52 = vld [vmem:[#allocation2 + $0x22] ss:$2 sm:$0xff]  ;;  %v3632_v15 = vld [vmem:[#allocation2 + $0x32] ss:$2 sm:$0xff] }
 0xa2c   : > { %7311 = vmatmul.mubr.bf16.vlgmr.msra.gmra.mrb[76].mxu1 %v3637_v28  ;;  %v3618_v1 = vld [vmem:[#allocation2 + $0x30] ss:$2 sm:$0xff]  ;;  %v3624_v41 = vld [vmem:[#allocation2 + $0x41] ss:$2 sm:$0x7f]  ;;  %v3640_v20 = vpack.c.bf16 %v3632_v15, %v3630_v52 }
 0xa2d   : > { %3875 = vmatmul.mubr.bf16.vlgmr.msra.gmra.mrb[88].mxu0 %v3635_v42  ;;  %7314 = vmatprep.mubr.msk.bf16.mxu1 %vm8010_vm1, %v10802_v2  ;;  %v3638_v26 = vpack.c.bf16 %v3618_v1, %v3617_v43  ;;  %v3642_v5 = vpack.c.bf16 %v3624_v41, %v3624_v41  ;;  %v3634_v54 = vld [vmem:[#allocation2 + $0x42] ss:$2 sm:$0x7f] }
 0xa2e   : > { %3882 = vmatprep.mubr.bf16.mxu0 %v3639_v14  ;;  %v3619_v0 = vld [vmem:[#allocation2 + $0x40] ss:$2 sm:$0x7f]  ;;  %v3643_v60 = vpack.c.bf16 %v3634_v54, %v3634_v54  ;;  %7323 = vmatpush3.bf16.msra.mxu0 %v7681_v57 }
 0xa2f   : > { %v3641_v31 = vpack.c.bf16 %v3619_v0, %v3619_v0  ;;  %7324 = vmatprep.subr.bf16.mxu0 %v10802_v2  ;;  %7343 = vmatpush3.bf16.msra.mxu1 %v7689_v37 }
 0xa30   : > { %7344 = vmatprep.subr.bf16.mxu1 %v10802_v2 }
 0xa32   : > { %7325 = vmatpush3.bf16.msra.mxu0 %v7682_v27 }
 0xa33   : > { %7326 = vmatprep.subr.bf16.mxu0 %v10802_v2  ;;  %7345 = vmatpush3.bf16.msra.mxu1 %v7690_v7 }
 0xa34   : > { %7315 = vmatmul.mubr.bf16.gmra.mrb[80].mxu1 %v3640_v20  ;;  %7346 = vmatprep.subr.bf16.mxu1 %v10802_v2 }
 0xa35   : > { %3883 = vmatmul.mubr.bf16.gmra.mrb[92].mxu0 %v3638_v26  ;;  %7318 = vmatprep.mubr.msk.bf16.mxu1 %vm8010_vm1, %v10802_v2 }
 0xa36   : > { %3890 = vmatprep.mubr.bf16.mxu0 %v3642_v5  ;;  %7327 = vmatpush3.bf16.msra.mxu0 %v7683_v9 }
 0xa37   : > { %7328 = vmatprep.subr.bf16.mxu0 %v10802_v2  ;;  %7347 = vmatpush3.bf16.msra.mxu1 %v7691_v23 }
 0xa38   : > { %7348 = vmatprep.subr.bf16.mxu1 %v10802_v2 }
 0xa3a   : > { %7329 = vmatpush3.bf16.msra.mxu0 %v7684_v59 }
 0xa3b   : > { %7330 = vmatprep.subr.bf16.mxu0 %v10802_v2  ;;  %7349 = vmatpush3.bf16.msra.mxu1 %v7692_v3 }
 0xa3c   : > { %7319 = vmatmul.mubr.bf16.gmra.mrb[84].mxu1 %v3643_v60  ;;  %7350 = vmatprep.subr.bf16.mxu1 %v10802_v2 }
 0xa3d   : > { %3891 = vmatmul.mubr.bf16.gmra.mrb[96].mxu0 %v3641_v31  ;;  %7358 = vmatprep.mubr.msk.bf16.mxu1 %vm8010_vm1, %v10802_v2 }
 0xa3e   : > { %7338 = vmatprep.mubr.msk.bf16.mxu0 %vm8010_vm1, %v10802_v2  ;;  %7331 = vmatpush3.bf16.msra.mxu0 %v7685_v22 }
 0xa3f   : > { %7332 = vmatprep.subr.bf16.mxu0 %v10802_v2  ;;  %7351 = vmatpush3.bf16.msra.mxu1 %v7693_v24 }
 0xa40   : > { %7352 = vmatprep.subr.bf16.mxu1 %v10802_v2 }
 0xa42   : > { %7333 = vmatpush3.bf16.msra.mxu0 %v7686_v38 }
 0xa43   : > { %7334 = vmatprep.subr.bf16.mxu0 %v10802_v2  ;;  %7353 = vmatpush3.bf16.msra.mxu1 %v7694_v36 }
 0xa44   : > { %7354 = vmatprep.subr.bf16.mxu1 %v10802_v2 }
 0xa46   : > { %7335 = vmatpush3.bf16.msra.mxu0 %v7687_v30 }
 0xa47   : > { %7336 = vmatprep.subr.bf16.mxu0 %v10802_v2 }
 0xa4a   : > { %7337 = vmatpush3.bf16.msra.mxu0 %v7688_v61 }
 0xaff   : > { %v3932_v49 = vpop.f32.mrb[76].mxu1 }
 0xb00   : > { %v6854_v13 = vpop.f32.mrb[88].mxu0  ;;  %v7312_v58 = vpop.f32.mrb[77].mxu1 }
 0xb01   : > { %v6855_v6 = vpop.f32.mrb[89].mxu0  ;;  %v3935_v48 = vpop.f32.mrb[78].mxu1 }
 0xb02   : > { %v6856_v39 = vadd.f32 %v6855_v6, %v6854_v13  ;;  %v6857_v50 = vpop.f32.mrb[90].mxu0  ;;  %v7313_v55 = vpop.f32.mrb[79].mxu1 }
 0xb03   : > { %v6858_v44 = vpop.f32.mrb[91].mxu0 }
 0xb04   : > { %v3877_v63 = vadd.f32 %v6856_v39, %v6200_v10  ;;  %v6859_v11 = vadd.f32 %v6858_v44, %v6857_v50 }
 0xb06   : > { %v10168_v45 = vadd.f32 %v3932_v49, %v3877_v63  ;;  %v3880_v53 = vadd.f32 %v6859_v11, %v6200_v10 }
 0xb07   : > { %v3940_v56 = vpop.f32.mrb[80].mxu1 }
 0xb08   : > { %v3954_v8 = vmul.f32 %v10168_v45, %v10168_v45  ;;  %v10172_v40 = vadd.f32 %v3935_v48, %v3880_v53  ;;  %v6860_v35 = vpop.f32.mrb[92].mxu0  ;;  %v7316_v17 = vpop.f32.mrb[81].mxu1 }
 0xb09   : > { %v6861_v4 = vpop.f32.mrb[93].mxu0  ;;  %v3943_v47 = vpop.f32.mrb[82].mxu1 }
 0xb0a   : > { %v3959_v46 = vmul.f32 %v3954_v8, %v10168_v45  ;;  %v3955_v34 = vmul.f32 %v10172_v40, %v10172_v40  ;;  %v6862_v16 = vadd.f32 %v6861_v4, %v6860_v35  ;;  %v6863_v19 = vpop.f32.mrb[94].mxu0  ;;  %v7317_v32 = vpop.f32.mrb[83].mxu1 }
 0xb0b   : > { %v6864_v51 = vpop.f32.mrb[95].mxu0 }
 0xb0c   : > { %v3964_v33 = vmul.f32 0.044715, %v3959_v46  ;;  %v3960_v29 = vmul.f32 %v3955_v34, %v10172_v40  ;;  %v3885_v12 = vadd.f32 %v6862_v16, %v6200_v10  ;;  %v6865_v18 = vadd.f32 %v6864_v51, %v6863_v19 }
 0xb0e   : > { %v3969_v28 = vadd.f32 %v3964_v33, %v10168_v45  ;;  %v3965_v42 = vmul.f32 0.044715, %v3960_v29  ;;  %v3941_v62 = vadd.f32 %v3940_v56, %v3885_v12  ;;  %v3888_v25 = vadd.f32 %v6865_v18, %v6200_v10 }
 0xb0f   : > { %v3948_v43 = vpop.f32.mrb[84].mxu1 }
 0xb10   : > { %v3970_v14 = vadd.f32 %v3965_v42, %v10172_v40  ;;  %v3956_v52 = vmul.f32 %v3941_v62, %v3941_v62  ;;  %v3944_v15 = vadd.f32 %v3943_v47, %v3888_v25  ;;  %v6866_v1 = vpop.f32.mrb[96].mxu0  ;;  %v7320_v41 = vpop.f32.mrb[85].mxu1  ;;  %v3974_v26 = vmul.f32 0.7978846, %v3969_v28 }
 0xb11   : > { %v6867_v20 = vpop.f32.mrb[97].mxu0  ;;  %v3951_v60 = vpop.f32.mrb[86].mxu1 }
 0xb12   : > { %v3975_v5 = vmul.f32 0.7978846, %v3970_v14  ;;  %v3961_v54 = vmul.f32 %v3956_v52, %v3941_v62  ;;  %v3957_v0 = vmul.f32 %v3944_v15, %v3944_v15  ;;  %v6869_v31 = vpop.f32.mrb[98].mxu0  ;;  %v6868_v57 = vadd.f32 %v6867_v20, %v6866_v1  ;;  %v7321_v27 = vpop.f32.mrb[87].mxu1  ;;  %v7695_v52 = vld [vmem:[%s10689_s6 + $0xf0] sm:$0xff]   ;;  %v7697_v60 = vld [vmem:[%s10684_s1 + $0x340] sm:$0xff]  }
 0xb13   : > { %v6870_v9 = vpop.f32.mrb[99].mxu0  ;;  %7355 = vmatpush3.bf16.msra.mxu1 %v7695_v52  ;;  %v7698_v31 = vld [vmem:[%s10684_s1 + $0x380] sm:$0xff]   ;;  %6901 = vmatprep.subr.bf16.mxu0 %v7697_v60  ;;  %v7700_v27 = vld [vmem:[%s10684_s1 + $0x348] sm:$0xff]  }
 0xb14   : > { %7963 = vtanh.f32 %v3975_v5  ;;  %v3966_v59 = vmul.f32 0.044715, %v3961_v54  ;;  %v3962_v22 = vmul.f32 %v3957_v0, %v3944_v15  ;;  %v3893_v37 = vadd.f32 %v6868_v57, %v6200_v10  ;;  %7356 = vmatprep.subr.bf16.mxu1 %v10802_v2  ;;  %v7699_v57 = vld [vmem:[%s10684_s1 + $0x300] sm:$0xff]   ;;  %v7701_v9 = vld [vmem:[%s10684_s1 + $0x388] sm:$0xff]  }
 0xb15   : > { %7965 = vtanh.f32 %v3974_v26  ;;  %v7730_v60 = vld [vmem:[%s10689_s6 + $0x108] sm:$0xff]  }
 0xb16   : > { %v3971_v38 = vadd.f32 %v3966_v59, %v3941_v62  ;;  %v3967_v7 = vmul.f32 0.044715, %v3962_v22  ;;  %v3949_v30 = vadd.f32 %v3948_v43, %v3893_v37  ;;  %v4029_v43 = vld [vmem:[%s10688_s5 + $0x3] sm:$0x1]  ;;  %v7702_v59 = vld [vmem:[%s10684_s1 + $0x308] sm:$0xff]   ;;  %v7703_v22 = vld [vmem:[%s10684_s1 + $0x350] sm:$0xff]  }
 0xb17   : > { %v7704_v37 = vld [vmem:[%s10684_s1 + $0x390] sm:$0xff]  }
 0xb18   : > { %v3976_v23 = vmul.f32 0.7978846, %v3971_v38  ;;  %v3972_v61 = vadd.f32 %v3967_v7, %v3944_v15  ;;  %v3958_v3 = vmul.f32 %v3949_v30, %v3949_v30  ;;  %v7705_v38 = vld [vmem:[%s10684_s1 + $0x310] sm:$0xff]   ;;  %v7706_v7 = vld [vmem:[%s10684_s1 + $0x358] sm:$0xff]  }
 0xb1a   : > { %7967 = vtanh.f32 %v3976_v23  ;;  %v3977_v24 = vmul.f32 0.7978846, %v3972_v61  ;;  %v3963_v36 = vmul.f32 %v3958_v3, %v3949_v30  ;;  %v7708_v23 = vld [vmem:[%s10684_s1 + $0x318] sm:$0xff]   ;;  %v7709_v61 = vld [vmem:[%s10684_s1 + $0x360] sm:$0xff]  }
 0xb1b   : > { %v7710_v3 = vld [vmem:[%s10684_s1 + $0x3a0] sm:$0xff]  }
 0xb1c   : > { %7969 = vtanh.f32 %v3977_v24  ;;  %v3968_v49 = vmul.f32 0.044715, %v3963_v36  ;;  %v7711_v24 = vld [vmem:[%s10684_s1 + $0x320] sm:$0xff]   ;;  %v7712_v36 = vld [vmem:[%s10684_s1 + $0x368] sm:$0xff]  }
 0xb1e   : > { %v7964_v13 = vpop.eup %7963  ;;  %v3973_v58 = vadd.f32 %v3968_v49, %v3949_v30  ;;  %v7713_v49 = vld [vmem:[%s10684_s1 + $0x3a8] sm:$0xff]  }
 0xb1f   : > { %v7966_v6 = vpop.eup %7965  ;;  %v3985_v39 = vadd.f32 1.0, %v7964_v13  ;;  %v7714_v13 = vld [vmem:[%s10684_s1 + $0x328] sm:$0xff]  }
 0xb20   : > { %v3978_v48 = vmul.f32 0.7978846, %v3973_v58  ;;  %v3984_v50 = vadd.f32 1.0, %v7966_v6  ;;  %v7715_v58 = vld [vmem:[%s10684_s1 + $0x370] sm:$0xff]  }
 0xb21   : > { %v3990_v55 = vmul.f32 0.5, %v3985_v39  ;;  %v7716_v6 = vld [vmem:[%s10684_s1 + $0x3b0] sm:$0xff]  }
 0xb22   : > { %7971 = vtanh.f32 %v3978_v48  ;;  %v3989_v11 = vmul.f32 0.5, %v3984_v50  ;;  %v7717_v39 = vld [vmem:[%s10684_s1 + $0x330] sm:$0xff]   ;;  %v7718_v48 = vld [vmem:[%s10684_s1 + $0x378] sm:$0xff]  }
 0xb23   : > { %v10181_v56 = vmul.f32 %v3990_v55, %v10172_v40  ;;  %v7719_v50 = vld [vmem:[%s10684_s1 + $0x3b8] sm:$0xff]   ;;  %v4137_v55 = vld [vmem:[%s10690_s7 + $0x3] sm:$0x1] }
 0xb24   : > { %v7968_v10 = vpop.eup %7967  ;;  %v10184_v35 = vmul.f32 %v3989_v11, %v10168_v45 }
 0xb25   : > { %v3986_v44 = vadd.f32 1.0, %v7968_v10  ;;  %v7720_v10 = vld [vmem:[%s10684_s1 + $0x338] sm:$0xff]  }
 0xb26   : > { %v7970_v63 = vpop.eup %7969  ;;  %v3999_v34 = vadd.f32 %v10181_v56, %v10184_v35 }
 0xb27   : > { %v3991_v53 = vmul.f32 0.5, %v3986_v44  ;;  %v3987_v8 = vadd.f32 1.0, %v7970_v63 }
 0xb29   : > { %v10186_v17 = vmul.f32 %v3991_v53, %v3941_v62  ;;  %v3992_v4 = vmul.f32 0.5, %v3987_v8 }
 0xb2b   : > { %v4000_v47 = vadd.f32 %v3999_v34, %v10186_v17  ;;  %v10191_v19 = vmul.f32 %v3992_v4, %v3944_v15  ;;  %v7696_v15 = vld [vmem:[%s10689_s6 + $0xf8] sm:$0xff]  }
 0xb2c   : > { %v7972_v46 = vpop.eup %7971  ;;  %7357 = vmatpush3.bf16.msra.mxu1 %v7696_v15 }
 0xb2d   : > { %v3988_v16 = vadd.f32 1.0, %v7972_v46  ;;  %v4001_v40 = vadd.f32 %v4000_v47, %v10191_v19  ;;  %7362 = vmatprep.subr.bf16.mxu1 %v7698_v31 }
 0xb2f   : > { %v3993_v32 = vmul.f32 0.5, %v3988_v16 }
 0xb31   : > { %v10193_v51 = vmul.f32 %v3993_v32, %v3949_v30  ;;  %v7707_v30 = vld [vmem:[%s10684_s1 + $0x398] sm:$0xff]  }
 0xb33   : > { %v4002_v45 = vsel %vm819_vm0, %v10193_v51, 0.0 }
 0xb34   : > { %v4003_v33 = vadd.f32 %v4002_v45, %v4001_v40 }
 0xb36   : > { %v4004_v29 = vrot.slane %v4003_v33, 4 }
 0xb38   : > { %v4005_v12 = vadd.f32 %v4004_v29, %v4003_v33 }
 0xb3a   : > { %v4006_v18 = vrot.slane %v4005_v12, 2 }
 0xb3c   : > { %v4007_v28 = vadd.f32 %v4006_v18, %v4005_v12 }
 0xb3e   : > { %v4008_v42 = vrot.slane %v4007_v28, 1 }
 0xb40   : > { %v4009_v62 = vadd.f32 %v4008_v42, %v4007_v28 }
 0xb42   : > { %v4010_v25 = vmul.f32 0.025641026, %v4009_v62 }
 0xb44   : > { %v4011_v14 = vpack.c.bf16 %v4010_v25, %v4010_v25 }
 0xb46   : > { %7339 = vmatmul.mubr.bf16.vlgmr.msra.gmra.mrb[100].mxu0 %v4011_v14 }
 0xb47   : > { %6902 = vmatpush3.bf16.msra.mxu0 %v7699_v57  ;;  %v7731_v57 = vld [vmem:[%s10689_s6 + $0x110] sm:$0xff]  }
 0xb48   : > { %6903 = vmatprep.subr.bf16.mxu0 %v7700_v27  ;;  %v7728_v27 = vld [vmem:[%s10687_s4 + $0x138] sm:$0xff]  }
 0xb4b   : > { %6904 = vmatpush3.bf16.msra.mxu0 %v7702_v59  ;;  %v7733_v59 = vld [vmem:[%s10689_s6 + $0x120] sm:$0xff]  }
 0xb4c   : > { %6905 = vmatprep.subr.bf16.mxu0 %v7703_v22  ;;  %v7734_v22 = vld [vmem:[%s10689_s6 + $0x128] sm:$0xff]  }
 0xb4f   : > { %6906 = vmatpush3.bf16.msra.mxu0 %v7705_v38 }
 0xb50   : > { %6907 = vmatprep.subr.bf16.mxu0 %v7706_v7 }
 0xb53   : > { %6908 = vmatpush3.bf16.msra.mxu0 %v7708_v23 }
 0xb54   : > { %6909 = vmatprep.subr.bf16.mxu0 %v7709_v61 }
 0xb57   : > { %6910 = vmatpush3.bf16.msra.mxu0 %v7711_v24 }
 0xb58   : > { %6911 = vmatprep.subr.bf16.mxu0 %v7712_v36 }
 0xb5b   : > { %6912 = vmatpush3.bf16.msra.mxu0 %v7714_v13 }
 0xb5c   : > { %6913 = vmatprep.subr.bf16.mxu0 %v7715_v58 }
 0xb5f   : > { %6914 = vmatpush3.bf16.msra.mxu0 %v7717_v39 }
 0xb60   : > { %6915 = vmatprep.subr.bf16.mxu0 %v7718_v48 }
 0xb63   : > { %6916 = vmatpush3.bf16.msra.mxu0 %v7720_v10 }
 0xb64   : > { %7382 = vmatprep.subr.bf16.mxu0 %v10802_v2 }
 0xc19   : > { %v4112_v1 = vpop.f32.mrb[100].mxu0 }
 0xc1a   : > { %v4113_v41 = vadd.f32 %v4112_v1, %v4029_v43  ;;  %v7340_v20 = vpop.f32.mrb[101].mxu0  ;;  %v7721_v1 = vld [vmem:[%s10687_s4 + $0x100] sm:$0xff]  }
 0xc1b   : > { %v4115_v26 = vpop.f32.mrb[102].mxu0  ;;  %v7723_v20 = vld [vmem:[%s10687_s4 + $0x110] sm:$0xff]  }
 0xc1c   : > { %v4118_v5 = vmax.f32 %v4113_v41, 0.0  ;;  %v7341_v54 = vpop.f32.mrb[103].mxu0  ;;  %v7722_v41 = vld [vmem:[%s10687_s4 + $0x108] sm:$0xff]   ;;  %v7724_v26 = vld [vmem:[%s10687_s4 + $0x118] sm:$0xff]  }
 0xc1d   : > { %v7729_v54 = vld [vmem:[%s10689_s6 + $0x100] sm:$0xff]  }
 0xc1e   : > { %v4119_v0 = vpack.c.bf16 %v4118_v5, %v4118_v5  ;;  %v7725_v5 = vld [vmem:[%s10687_s4 + $0x120] sm:$0xff]  }
 0xc20   : > { %7359 = vmatmul.mubr.bf16.vlgmr.msra.gmra.mrb[88].mxu1 %v4119_v0  ;;  %v7726_v0 = vld [vmem:[%s10687_s4 + $0x128] sm:$0xff]  }
 0xc21   : > { %7363 = vmatpush3.bf16.msra.mxu1 %v7698_v31  ;;  %v7727_v31 = vld [vmem:[%s10687_s4 + $0x130] sm:$0xff]  }
 0xc22   : > { %7364 = vmatprep.subr.bf16.mxu1 %v7701_v9 }
 0xc25   : > { %7365 = vmatpush3.bf16.msra.mxu1 %v7701_v9  ;;  %v7732_v9 = vld [vmem:[%s10689_s6 + $0x118] sm:$0xff]  }
 0xc26   : > { %7366 = vmatprep.subr.bf16.mxu1 %v7704_v37 }
 0xc29   : > { %7367 = vmatpush3.bf16.msra.mxu1 %v7704_v37 }
 0xc2a   : > { %7368 = vmatprep.subr.bf16.mxu1 %v7707_v30 }
 0xc2d   : > { %7369 = vmatpush3.bf16.msra.mxu1 %v7707_v30  ;;  %v6322_v30 = vld [vmem:[%s10685_s2 + $0x4] ss:$0 sm:$0xff] }
 0xc2e   : > { %7370 = vmatprep.subr.bf16.mxu1 %v7710_v3 }
 0xc31   : > { %7371 = vmatpush3.bf16.msra.mxu1 %v7710_v3 }
 0xc32   : > { %7372 = vmatprep.subr.bf16.mxu1 %v7713_v49 }
 0xc35   : > { %7373 = vmatpush3.bf16.msra.mxu1 %v7713_v49 }
 0xc36   : > { %7374 = vmatprep.subr.bf16.mxu1 %v7716_v6 }
 0xc39   : > { %7375 = vmatpush3.bf16.msra.mxu1 %v7716_v6 }
 0xc3a   : > { %7376 = vmatprep.subr.bf16.mxu1 %v7719_v50 }
 0xc3d   : > { %7377 = vmatpush3.bf16.msra.mxu1 %v7719_v50 }
 0xc3e   : > { %7402 = vmatprep.subr.bf16.mxu1 %v10802_v2 }
 0xcf3   : > { %v4220_v44 = vpop.f32.mrb[88].mxu1 }
 0xcf4   : > { %v4221_v63 = vadd.f32 %v4220_v44, %v4137_v55  ;;  %v7360_v11 = vpop.f32.mrb[89].mxu1 }
 0xcf5   : > { %v4223_v53 = vpop.f32.mrb[90].mxu1 }
 0xcf6   : > { %v6273_v8 = vmul.f32 -1.442695, %v4221_v63  ;;  %v7361_v4 = vpop.f32.mrb[91].mxu1 }
 0xcf8   : > { %7973 = vpow2.f32 %v6273_v8 }
 0xd02   : > { %v7974_v46 = vpop.eup %7973 }
 0xd03   : > { %v4229_v34 = vadd.f32 1.0, %v7974_v46 }
 0xd05   : > { %7975 = vrcp.f32 %v4229_v34 }
 0xd0f   : > { %v7976_v16 = vpop.eup %7975 }
 0xd10   : > { %v4235_v47 = vrot.slane %v7976_v16, %v9309_v21 }
 0xd12   : > { %v4236_v32 = vmul.f32 %v4235_v47, %v10184_v35  ;;  %v4237_v40 = vmul.f32 %v4235_v47, %v10181_v56  ;;  %v4238_v45 = vmul.f32 %v4235_v47, %v10186_v17  ;;  %v4239_v33 = vmul.f32 %v4235_v47, %v10191_v19 }
 0xd13   : > { %v4240_v29 = vmul.f32 %v4235_v47, %v10193_v51 }
 0xd14   : > { %4241 = vst [vmem:[#allocation3] sm:$0xff] %v4236_v32  ;;  %4242 = vst [vmem:[#allocation3 + $0x8] sm:$0xff] %v4237_v40 }
 0xd15   : > { %4243 = vst [vmem:[#allocation3 + $0x10] sm:$0xff] %v4238_v45  ;;  %4244 = vst [vmem:[#allocation3 + $0x18] sm:$0xff] %v4239_v33 }
 0xd16   : > { %4245 = vst [vmem:[#allocation3 + $0x20] sm:$0x7f] %v4240_v29 }
 0xd1b   : > { %v4249_v12 = vld [vmem:[#allocation3 + $0x1] ss:$2 sm:$0xff]  ;;  %v4246_v25 = vld [vmem:[#allocation3] ss:$2 sm:$0xff] }
 0xd1c   : > { %v4250_v18 = vld [vmem:[#allocation3 + $0x11] ss:$2 sm:$0xff]  ;;  %v4253_v28 = vld [vmem:[#allocation3 + $0x2] ss:$2 sm:$0xff] }
 0xd1d   : > { %v4259_v42 = vpack.c.bf16 %v4250_v18, %v4249_v12  ;;  %v4255_v62 = vld [vmem:[#allocation3 + $0x12] ss:$2 sm:$0xff]  ;;  %v4257_v52 = vld [vmem:[#allocation3 + $0x22] ss:$2 sm:$0x7] }
 0xd1e   : > { %v4247_v35 = vld [vmem:[#allocation3 + $0x10] ss:$2 sm:$0xff]  ;;  %v4260_v14 = vpack.c.bf16 %v4255_v62, %v4253_v28  ;;  %v4251_v17 = vld [vmem:[#allocation3 + $0x21] ss:$2 sm:$0x7]  ;;  %v4263_v19 = vpack.c.bf16 %v4257_v52, %v4257_v52 }
 0xd1f   : > { %v4258_v56 = vpack.c.bf16 %v4247_v35, %v4246_v25  ;;  %4494 = vmatprep.mubr.bf16.mxu0 %v4259_v42  ;;  %v4262_v15 = vpack.c.bf16 %v4251_v17, %v4251_v17  ;;  %v4248_v51 = vld [vmem:[#allocation3 + $0x20] ss:$2 sm:$0x7] }
 0xd20   : > { %7378 = vmatprep.mubr.bf16.mxu1 %v4260_v14  ;;  %v4261_v43 = vpack.c.bf16 %v4248_v51, %v4248_v51 }
 0xd21   : > { %4495 = vmatmul.mubr.bf16.vlgmr.msra.gmra.mrb[104].mxu0 %v4258_v56  ;;  %7379 = vmatmul.mubr.bf16.vlgmr.msra.gmra.mrb[92].mxu1 %v4263_v19 }
 0xd22   : > { %4502 = vmatprep.mubr.bf16.mxu0 %v4262_v15  ;;  %7418 = vmatprep.mubr.msk.bf16.mxu1 %vm8010_vm1, %v10802_v2 }
 0xd23   : > { %7383 = vmatpush3.bf16.msra.mxu0 %v7721_v1  ;;  %7403 = vmatpush3.bf16.msra.mxu1 %v7729_v54 }
 0xd24   : > { %7384 = vmatprep.subr.bf16.mxu0 %v10802_v2  ;;  %7404 = vmatprep.subr.bf16.mxu1 %v10802_v2 }
 0xd27   : > { %7385 = vmatpush3.bf16.msra.mxu0 %v7722_v41  ;;  %7405 = vmatpush3.bf16.msra.mxu1 %v7730_v60 }
 0xd28   : > { %7386 = vmatprep.subr.bf16.mxu0 %v10802_v2  ;;  %7406 = vmatprep.subr.bf16.mxu1 %v10802_v2 }
 0xd29   : > { %4503 = vmatmul.mubr.bf16.gmra.mrb[108].mxu0 %v4261_v43 }
 0xd2a   : > { %7398 = vmatprep.mubr.msk.bf16.mxu0 %vm8010_vm1, %v10802_v2 }
 0xd2b   : > { %7387 = vmatpush3.bf16.msra.mxu0 %v7723_v20  ;;  %7407 = vmatpush3.bf16.msra.mxu1 %v7731_v57 }
 0xd2c   : > { %7388 = vmatprep.subr.bf16.mxu0 %v10802_v2  ;;  %7408 = vmatprep.subr.bf16.mxu1 %v10802_v2 }
 0xd2f   : > { %7389 = vmatpush3.bf16.msra.mxu0 %v7724_v26  ;;  %7409 = vmatpush3.bf16.msra.mxu1 %v7732_v9 }
 0xd30   : > { %7390 = vmatprep.subr.bf16.mxu0 %v10802_v2  ;;  %7410 = vmatprep.subr.bf16.mxu1 %v10802_v2 }
 0xd33   : > { %7391 = vmatpush3.bf16.msra.mxu0 %v7725_v5  ;;  %7411 = vmatpush3.bf16.msra.mxu1 %v7733_v59  ;;  %v7735_v59 = vld [vmem:[%s10689_s6 + $0x130] sm:$0xff]  }
 0xd34   : > { %7392 = vmatprep.subr.bf16.mxu0 %v10802_v2  ;;  %7412 = vmatprep.subr.bf16.mxu1 %v10802_v2 }
 0xd37   : > { %7393 = vmatpush3.bf16.msra.mxu0 %v7726_v0  ;;  %7413 = vmatpush3.bf16.msra.mxu1 %v7734_v22  ;;  %v7736_v22 = vld [vmem:[%s10689_s6 + $0x138] sm:$0xff]  }
 0xd38   : > { %7394 = vmatprep.subr.bf16.mxu0 %v10802_v2  ;;  %7414 = vmatprep.subr.bf16.mxu1 %v10802_v2 }
 0xd3b   : > { %7395 = vmatpush3.bf16.msra.mxu0 %v7727_v31  ;;  %7415 = vmatpush3.bf16.msra.mxu1 %v7735_v59 }
 0xd3c   : > { %7396 = vmatprep.subr.bf16.mxu0 %v10802_v2  ;;  %7416 = vmatprep.subr.bf16.mxu1 %v10802_v2 }
 0xd3f   : > { %7397 = vmatpush3.bf16.msra.mxu0 %v7728_v27  ;;  %7417 = vmatpush3.bf16.msra.mxu1 %v7736_v22 }
 0xd40   : > { %7422 = vmatprep.subr.bf16.mxu1 %v10802_v2 }
 0xdf4   : > { %v6917_v37 = vpop.f32.mrb[104].mxu0  ;;  %v7380_v38 = vpop.f32.mrb[92].mxu1 }
 0xdf5   : > { %v6918_v7 = vpop.f32.mrb[105].mxu0  ;;  %v4544_v61 = vpop.f32.mrb[93].mxu1 }
 0xdf6   : > { %v6919_v23 = vadd.f32 %v6918_v7, %v6917_v37  ;;  %v6920_v3 = vpop.f32.mrb[106].mxu0  ;;  %v7381_v24 = vpop.f32.mrb[94].mxu1  ;;  %v4614_v37 = vld [vmem:[%s10688_s5 + $0x4] sm:$0x1] }
 0xdf7   : > { %v6921_v36 = vpop.f32.mrb[107].mxu0  ;;  %v4547_v58 = vpop.f32.mrb[95].mxu1 }
 0xdf8   : > { %v4497_v49 = vadd.f32 %v6919_v23, %v6322_v30  ;;  %v6922_v13 = vadd.f32 %v6921_v36, %v6920_v3  ;;  %v7737_v36 = vld [vmem:[%s10684_s1 + $0x400] sm:$0xff]  }
 0xdf9   : > { %6957 = vmatprep.subr.bf16.mxu0 %v7737_v36 }
 0xdfa   : > { %v4545_v6 = vadd.f32 %v4544_v61, %v4497_v49  ;;  %v4500_v39 = vadd.f32 %v6922_v13, %v6322_v30  ;;  %v7738_v49 = vld [vmem:[%s10684_s1 + $0x3c0] sm:$0xff]   ;;  %v7739_v13 = vld [vmem:[%s10684_s1 + $0x408] sm:$0xff]  }
 0xdfc   : > { %v4558_v48 = vmul.f32 %v4545_v6, %v4545_v6  ;;  %v4548_v50 = vadd.f32 %v4547_v58, %v4500_v39  ;;  %v6923_v10 = vpop.f32.mrb[108].mxu0  ;;  %v7740_v58 = vld [vmem:[%s10684_s1 + $0x3c8] sm:$0xff]   ;;  %v7742_v39 = vld [vmem:[%s10684_s1 + $0x3d0] sm:$0xff]  }
 0xdfd   : > { %v6924_v55 = vpop.f32.mrb[109].mxu0 }
 0xdfe   : > { %v4561_v44 = vmul.f32 %v4558_v48, %v4545_v6  ;;  %v4559_v63 = vmul.f32 %v4548_v50, %v4548_v50  ;;  %v6925_v11 = vadd.f32 %v6924_v55, %v6923_v10  ;;  %v6926_v53 = vpop.f32.mrb[110].mxu0  ;;  %v7743_v48 = vld [vmem:[%s10684_s1 + $0x418] sm:$0xff]   ;;  %v7745_v10 = vld [vmem:[%s10684_s1 + $0x420] sm:$0xff]  }
 0xdff   : > { %v6927_v8 = vpop.f32.mrb[111].mxu0  ;;  %v7746_v55 = vld [vmem:[%s10684_s1 + $0x3e0] sm:$0xff]   ;;  %v7750_v53 = vld [vmem:[%s10684_s1 + $0x3f0] sm:$0xff]  }
 0xe00   : > { %v4564_v4 = vmul.f32 0.044715, %v4561_v44  ;;  %v4562_v46 = vmul.f32 %v4559_v63, %v4548_v50  ;;  %v4505_v34 = vadd.f32 %v6925_v11, %v6322_v30  ;;  %v7747_v44 = vld [vmem:[%s10684_s1 + $0x428] sm:$0xff]   ;;  %v7749_v11 = vld [vmem:[%s10684_s1 + $0x430] sm:$0xff]   ;;  %v7751_v8 = vld [vmem:[%s10684_s1 + $0x438] sm:$0xff]  }
 0xe01   : > { %v7748_v63 = vld [vmem:[%s10684_s1 + $0x3e8] sm:$0xff]  }
 0xe02   : > { %v4567_v16 = vadd.f32 %v4564_v4, %v4545_v6  ;;  %v4565_v47 = vmul.f32 0.044715, %v4562_v46  ;;  %v4553_v32 = vadd.f32 %v7380_v38, %v4505_v34  ;;  %v7752_v4 = vld [vmem:[%s10684_s1 + $0x3f8] sm:$0xff]   ;;  %v4722_v46 = vld [vmem:[%s10690_s7 + $0x4] sm:$0x1] }
 0xe04   : > { %v4570_v40 = vmul.f32 0.7978846, %v4567_v16  ;;  %v4568_v45 = vadd.f32 %v4565_v47, %v4548_v50  ;;  %v4560_v33 = vmul.f32 %v4553_v32, %v4553_v32 }
 0xe06   : > { %v4571_v29 = vmul.f32 0.7978846, %v4568_v45  ;;  %v4563_v12 = vmul.f32 %v4560_v33, %v4553_v32  ;;  %7977 = vtanh.f32 %v4570_v40 }
 0xe08   : > { %7979 = vtanh.f32 %v4571_v29  ;;  %v4566_v18 = vmul.f32 0.044715, %v4563_v12 }
 0xe0a   : > { %v4569_v28 = vadd.f32 %v4566_v18, %v4553_v32 }
 0xe0c   : > { %v4572_v42 = vmul.f32 0.7978846, %v4569_v28 }
 0xe0e   : > { %7981 = vtanh.f32 %v4572_v42 }
 0xe10   : > { %v7978_v62 = vpop.eup %7977 }
 0xe11   : > { %v4576_v14 = vadd.f32 1.0, %v7978_v62 }
 0xe12   : > { %v7980_v25 = vpop.eup %7979 }
 0xe13   : > { %v4577_v35 = vadd.f32 1.0, %v7980_v25  ;;  %v4579_v17 = vmul.f32 0.5, %v4576_v14 }
 0xe15   : > { %v4580_v56 = vmul.f32 0.5, %v4577_v35  ;;  %v10355_v43 = vmul.f32 %v4579_v17, %v4545_v6  ;;  %v7741_v6 = vld [vmem:[%s10684_s1 + $0x410] sm:$0xff]  }
 0xe17   : > { %v10353_v15 = vmul.f32 %v4580_v56, %v4548_v50  ;;  %v7744_v50 = vld [vmem:[%s10684_s1 + $0x3d8] sm:$0xff]  }
 0xe18   : > { %v7982_v52 = vpop.eup %7981 }
 0xe19   : > { %v4578_v19 = vadd.f32 1.0, %v7982_v52  ;;  %v4585_v41 = vadd.f32 %v10353_v15, %v10355_v43 }
 0xe1b   : > { %v4581_v51 = vmul.f32 0.5, %v4578_v19  ;;  %v7753_v19 = vld [vmem:[%s10687_s4 + $0x140] sm:$0xff]  }
 0xe1d   : > { %v10357_v1 = vmul.f32 %v4581_v51, %v4553_v32  ;;  %v7755_v51 = vld [vmem:[%s10687_s4 + $0x150] sm:$0xff]  }
 0xe1f   : > { %v4587_v20 = vsel %vm4586_vm2, %v10357_v1, 0.0 }
 0xe20   : > { %v4588_v26 = vadd.f32 %v4587_v20, %v4585_v41  ;;  %v7758_v41 = vld [vmem:[%s10687_s4 + $0x168] sm:$0xff]   ;;  %v7761_v20 = vld [vmem:[%s10689_s6 + $0x140] sm:$0xff]  }
 0xe22   : > { %v4589_v5 = vrot.slane %v4588_v26, 4 }
 0xe24   : > { %v4590_v54 = vadd.f32 %v4589_v5, %v4588_v26  ;;  %v7762_v26 = vld [vmem:[%s10689_s6 + $0x148] sm:$0xff]   ;;  %v7759_v5 = vld [vmem:[%s10687_s4 + $0x170] sm:$0xff]  }
 0xe26   : > { %v4591_v0 = vrot.slane %v4590_v54, 2 }
 0xe28   : > { %v4592_v60 = vadd.f32 %v4591_v0, %v4590_v54  ;;  %v7763_v54 = vld [vmem:[%s10689_s6 + $0x150] sm:$0xff]   ;;  %v7760_v0 = vld [vmem:[%s10687_s4 + $0x178] sm:$0xff]  }
 0xe2a   : > { %v4593_v31 = vrot.slane %v4592_v60, 1 }
 0xe2c   : > { %v4594_v57 = vadd.f32 %v4593_v31, %v4592_v60  ;;  %v7764_v60 = vld [vmem:[%s10689_s6 + $0x158] sm:$0xff]   ;;  %v7765_v31 = vld [vmem:[%s10689_s6 + $0x160] sm:$0xff]  }
 0xe2e   : > { %v4595_v27 = vmul.f32 0.05263158, %v4594_v57  ;;  %v7766_v57 = vld [vmem:[%s10689_s6 + $0x168] sm:$0xff]  }
 0xe30   : > { %v4596_v9 = vpack.c.bf16 %v4595_v27, %v4595_v27 }
 0xe32   : > { %7399 = vmatmul.mubr.bf16.vlgmr.msra.gmra.mrb[112].mxu0 %v4596_v9  ;;  %v6428_v9 = vld [vmem:[%s10685_s2 + $0x5] ss:$0 sm:$0xff] }
 0xe33   : > { %6958 = vmatpush3.bf16.msra.mxu0 %v7738_v49 }
 0xe34   : > { %6959 = vmatprep.subr.bf16.mxu0 %v7739_v13 }
 0xe37   : > { %6960 = vmatpush3.bf16.msra.mxu0 %v7740_v58 }
 0xe38   : > { %6961 = vmatprep.subr.bf16.mxu0 %v7741_v6 }
 0xe3b   : > { %6962 = vmatpush3.bf16.msra.mxu0 %v7742_v39 }
 0xe3c   : > { %6963 = vmatprep.subr.bf16.mxu0 %v7743_v48 }
 0xe3f   : > { %6964 = vmatpush3.bf16.msra.mxu0 %v7744_v50 }
 0xe40   : > { %6965 = vmatprep.subr.bf16.mxu0 %v7745_v10 }
 0xe43   : > { %6966 = vmatpush3.bf16.msra.mxu0 %v7746_v55 }
 0xe44   : > { %6967 = vmatprep.subr.bf16.mxu0 %v7747_v44 }
 0xe47   : > { %6968 = vmatpush3.bf16.msra.mxu0 %v7748_v63 }
 0xe48   : > { %6969 = vmatprep.subr.bf16.mxu0 %v7749_v11 }
 0xe4b   : > { %6970 = vmatpush3.bf16.msra.mxu0 %v7750_v53 }
 0xe4c   : > { %6971 = vmatprep.subr.bf16.mxu0 %v7751_v8 }
 0xe4f   : > { %6972 = vmatpush3.bf16.msra.mxu0 %v7752_v4 }
 0xe50   : > { %7442 = vmatprep.subr.bf16.mxu0 %v10802_v2 }
 0xf05   : > { %v4697_v38 = vpop.f32.mrb[112].mxu0 }
 0xf06   : > { %v4698_v7 = vadd.f32 %v4697_v38, %v4614_v37  ;;  %v7400_v30 = vpop.f32.mrb[113].mxu0 }
 0xf07   : > { %v4700_v23 = vpop.f32.mrb[114].mxu0 }
 0xf08   : > { %v4703_v61 = vmax.f32 %v4698_v7, 0.0  ;;  %v7401_v3 = vpop.f32.mrb[115].mxu0 }
 0xf0a   : > { %v4704_v24 = vpack.c.bf16 %v4703_v61, %v4703_v61 }
 0xf0c   : > { %7419 = vmatmul.mubr.bf16.vlgmr.msra.gmra.mrb[96].mxu1 %v4704_v24 }
 0xf0d   : > { %7438 = vmatprep.mubr.msk.bf16.mxu1 %vm8010_vm1, %v10802_v2  ;;  %7423 = vmatpush3.bf16.msra.mxu1 %v7753_v19  ;;  %v7770_v19 = vld [vmem:[%s10684_s1 + $0x480] sm:$0xff]  }
 0xf0e   : > { %7424 = vmatprep.subr.bf16.mxu1 %v10802_v2 }
 0xfdf   : > { %v4805_v34 = vpop.f32.mrb[96].mxu1 }
 0xfe0   : > { %v4806_v16 = vadd.f32 %v4805_v34, %v4722_v46  ;;  %v7420_v47 = vpop.f32.mrb[97].mxu1 }
 0xfe1   : > { %v4808_v32 = vpop.f32.mrb[98].mxu1 }
 0xfe2   : > { %v6395_v40 = vmul.f32 -1.442695, %v4806_v16  ;;  %v7421_v45 = vpop.f32.mrb[99].mxu1 }
 0xfe4   : > { %7983 = vpow2.f32 %v6395_v40 }
 0xfee   : > { %v7984_v33 = vpop.eup %7983 }
 0xfef   : > { %v4814_v29 = vadd.f32 1.0, %v7984_v33 }
 0xff1   : > { %7985 = vrcp.f32 %v4814_v29 }
 0xffb   : > { %v7986_v12 = vpop.eup %7985 }
 0xffc   : > { %v4820_v18 = vrot.slane %v7986_v12, %v9309_v21  ;;  %v7767_v12 = vld [vmem:[%s10689_s6 + $0x170] sm:$0xff]  }
 0xffe   : > { %v4821_v28 = vmul.f32 %v4820_v18, %v10355_v43  ;;  %v4822_v42 = vmul.f32 %v4820_v18, %v10353_v15  ;;  %v4823_v62 = vmul.f32 %v4820_v18, %v10357_v1  ;;  %v7754_v15 = vld [vmem:[%s10687_s4 + $0x148] sm:$0xff]   ;;  %v7756_v43 = vld [vmem:[%s10687_s4 + $0x158] sm:$0xff]   ;;  %v7757_v1 = vld [vmem:[%s10687_s4 + $0x160] sm:$0xff]  }
 0xfff   : > { %7425 = vmatpush3.bf16.msra.mxu1 %v7754_v15  ;;  %v7768_v18 = vld [vmem:[%s10689_s6 + $0x178] sm:$0xff]   ;;  %v7771_v15 = vld [vmem:[%s10684_s1 + $0x4c8] sm:$0xff]  }
0x1000   : > { %4824 = vst [vmem:[#allocation2] sm:$0xff] %v4821_v28  ;;  %4825 = vst [vmem:[#allocation2 + $0x8] sm:$0xff] %v4822_v42  ;;  %7426 = vmatprep.subr.bf16.mxu1 %v10802_v2  ;;  %v5054_v28 = vld [vmem:[%s10688_s5 + $0x5] sm:$0x1] }
0x1001   : > { %4826 = vst [vmem:[#allocation2 + $0x10] sm:$0x7] %v4823_v62 }
0x1003   : > { %7427 = vmatpush3.bf16.msra.mxu1 %v7755_v51  ;;  %v7772_v51 = vld [vmem:[%s10684_s1 + $0x488] sm:$0xff]  }
0x1004   : > { %7428 = vmatprep.subr.bf16.mxu1 %v10802_v2 }
0x1007   : > { %v4829_v25 = vld [vmem:[#allocation2 + $0x1] ss:$2 sm:$0xff]  ;;  %v4827_v56 = vld [vmem:[#allocation2] ss:$2 sm:$0xff]  ;;  %7429 = vmatpush3.bf16.msra.mxu1 %v7756_v43  ;;  %v7773_v43 = vld [vmem:[%s10684_s1 + $0x4d0] sm:$0xff]  }
0x1008   : > { %v4830_v35 = vld [vmem:[#allocation2 + $0x11] ss:$2 sm:$0x1]  ;;  %v4828_v52 = vld [vmem:[#allocation2 + $0x10] ss:$2 sm:$0x1]  ;;  %7430 = vmatprep.subr.bf16.mxu1 %v10802_v2 }
0x1009   : > { %v4832_v14 = vpack.c.bf16 %v4830_v35, %v4829_v25  ;;  %v4831_v17 = vpack.c.bf16 %v4828_v52, %v4827_v56 }
0x100b   : > { %4999 = vmatprep.mubr.bf16.mxu0 %v4832_v14  ;;  %7431 = vmatpush3.bf16.msra.mxu1 %v7757_v1  ;;  %v7774_v1 = vld [vmem:[%s10684_s1 + $0x490] sm:$0xff]  }
0x100c   : > { %5000 = vmatmul.mubr.bf16.vlgmr.msra.gmra.mrb[116].mxu0 %v4831_v17  ;;  %7432 = vmatprep.subr.bf16.mxu1 %v10802_v2  ;;  %v7769_v17 = vld [vmem:[%s10684_s1 + $0x4c0] sm:$0xff]  }
0x100d   : > { %7458 = vmatprep.mubr.msk.bf16.mxu0 %vm8010_vm1, %v10802_v2  ;;  %7443 = vmatpush3.bf16.msra.mxu0 %v7761_v20  ;;  %v7776_v20 = vld [vmem:[%s10684_s1 + $0x498] sm:$0xff]  }
0x100e   : > { %7444 = vmatprep.subr.bf16.mxu0 %v10802_v2 }
0x100f   : > { %7433 = vmatpush3.bf16.msra.mxu1 %v7758_v41  ;;  %v7775_v41 = vld [vmem:[%s10684_s1 + $0x4d8] sm:$0xff]  }
0x1010   : > { %7434 = vmatprep.subr.bf16.mxu1 %v10802_v2 }
0x1011   : > { %7445 = vmatpush3.bf16.msra.mxu0 %v7762_v26  ;;  %v7777_v26 = vld [vmem:[%s10684_s1 + $0x4e0] sm:$0xff]  }
0x1012   : > { %7446 = vmatprep.subr.bf16.mxu0 %v10802_v2 }
0x1013   : > { %7435 = vmatpush3.bf16.msra.mxu1 %v7759_v5  ;;  %v7778_v5 = vld [vmem:[%s10684_s1 + $0x4a0] sm:$0xff]  }
0x1014   : > { %7436 = vmatprep.subr.bf16.mxu1 %v10802_v2 }
0x1015   : > { %7447 = vmatpush3.bf16.msra.mxu0 %v7763_v54  ;;  %v7779_v54 = vld [vmem:[%s10684_s1 + $0x4e8] sm:$0xff]  }
0x1016   : > { %7448 = vmatprep.subr.bf16.mxu0 %v10802_v2 }
0x1017   : > { %7437 = vmatpush3.bf16.msra.mxu1 %v7760_v0  ;;  %v7780_v0 = vld [vmem:[%s10684_s1 + $0x4a8] sm:$0xff]  }
0x1018   : > { %6997 = vmatprep.subr.bf16.mxu1 %v7769_v17 }
0x1019   : > { %7449 = vmatpush3.bf16.msra.mxu0 %v7764_v60  ;;  %v7781_v60 = vld [vmem:[%s10684_s1 + $0x4f0] sm:$0xff]  }
0x101a   : > { %7450 = vmatprep.subr.bf16.mxu0 %v10802_v2 }
0x101d   : > { %7451 = vmatpush3.bf16.msra.mxu0 %v7765_v31  ;;  %v7782_v31 = vld [vmem:[%s10684_s1 + $0x4b0] sm:$0xff]  }
0x101e   : > { %7452 = vmatprep.subr.bf16.mxu0 %v10802_v2 }
0x1021   : > { %7453 = vmatpush3.bf16.msra.mxu0 %v7766_v57  ;;  %v7783_v57 = vld [vmem:[%s10684_s1 + $0x4f8] sm:$0xff]  }
0x1022   : > { %7454 = vmatprep.subr.bf16.mxu0 %v10802_v2 }
0x1025   : > { %7455 = vmatpush3.bf16.msra.mxu0 %v7767_v12 }
0x1026   : > { %7456 = vmatprep.subr.bf16.mxu0 %v10802_v2 }
0x1029   : > { %7457 = vmatpush3.bf16.msra.mxu0 %v7768_v18 }
0x102a   : > { %7462 = vmatprep.subr.bf16.mxu0 %v10802_v2 }
0x10df   : > { %v6973_v27 = vpop.f32.mrb[116].mxu0 }
0x10e0   : > { %v6974_v59 = vpop.f32.mrb[117].mxu0 }
0x10e1   : > { %v6975_v22 = vadd.f32 %v6974_v59, %v6973_v27  ;;  %v6976_v37 = vpop.f32.mrb[118].mxu0  ;;  %v7784_v27 = vld [vmem:[%s10684_s1 + $0x4b8] sm:$0xff]  }
0x10e2   : > { %v6977_v38 = vpop.f32.mrb[119].mxu0 }
0x10e3   : > { %v5002_v7 = vadd.f32 %v6975_v22, %v6428_v9  ;;  %v6978_v30 = vadd.f32 %v6977_v38, %v6976_v37 }
0x10e5   : > { %v5008_v23 = vmul.f32 %v5002_v7, %v5002_v7  ;;  %v5005_v61 = vadd.f32 %v6978_v30, %v6428_v9  ;;  %v5162_v9 = vld [vmem:[%s10690_s7 + $0x5] sm:$0x1] }
0x10e7   : > { %v5010_v3 = vmul.f32 %v5008_v23, %v5002_v7  ;;  %v5009_v24 = vmul.f32 %v5005_v61, %v5005_v61 }
0x10e9   : > { %v5012_v36 = vmul.f32 0.044715, %v5010_v3  ;;  %v5011_v49 = vmul.f32 %v5009_v24, %v5005_v61 }
0x10eb   : > { %v5014_v13 = vadd.f32 %v5012_v36, %v5002_v7  ;;  %v5013_v58 = vmul.f32 0.044715, %v5011_v49 }
0x10ed   : > { %v5016_v6 = vmul.f32 0.7978846, %v5014_v13  ;;  %v5015_v39 = vadd.f32 %v5013_v58, %v5005_v61 }
0x10ef   : > { %7987 = vtanh.f32 %v5016_v6  ;;  %v5017_v48 = vmul.f32 0.7978846, %v5015_v39 }
0x10f1   : > { %7989 = vtanh.f32 %v5017_v48  ;;  %v7785_v48 = vld [vmem:[%s10687_s4 + $0x180] sm:$0xff]  }
0x10f9   : > { %v7988_v50 = vpop.eup %7987 }
0x10fa   : > { %v5020_v10 = vadd.f32 1.0, %v7988_v50  ;;  %v7786_v50 = vld [vmem:[%s10687_s4 + $0x188] sm:$0xff]  }
0x10fb   : > { %v7990_v55 = vpop.eup %7989 }
0x10fc   : > { %v5021_v44 = vadd.f32 1.0, %v7990_v55  ;;  %v5022_v63 = vmul.f32 0.5, %v5020_v10  ;;  %v7787_v10 = vld [vmem:[%s10687_s4 + $0x190] sm:$0xff]   ;;  %v7788_v55 = vld [vmem:[%s10687_s4 + $0x198] sm:$0xff]  }
0x10fe   : > { %v5023_v11 = vmul.f32 0.5, %v5021_v44  ;;  %v10493_v8 = vmul.f32 %v5022_v63, %v5002_v7  ;;  %v7789_v44 = vld [vmem:[%s10687_s4 + $0x1a0] sm:$0xff]  }
0x10ff   : > { %v7793_v63 = vld [vmem:[%s10689_s6 + $0x180] sm:$0xff]  }
0x1100   : > { %v10491_v53 = vmul.f32 %v5023_v11, %v5005_v61  ;;  %v7790_v11 = vld [vmem:[%s10687_s4 + $0x1a8] sm:$0xff]  }
0x1102   : > { %v5027_v4 = vsel %vm5026_vm3, %v10491_v53, 0.0 }
0x1103   : > { %v5028_v46 = vadd.f32 %v5027_v4, %v10493_v8  ;;  %v7795_v4 = vld [vmem:[%s10689_s6 + $0x190] sm:$0xff]  }
0x1105   : > { %v5029_v34 = vrot.slane %v5028_v46, 4 }
0x1107   : > { %v5030_v16 = vadd.f32 %v5029_v34, %v5028_v46  ;;  %v7792_v46 = vld [vmem:[%s10687_s4 + $0x1b8] sm:$0xff]  }
0x1108   : > { %v7796_v34 = vld [vmem:[%s10689_s6 + $0x198] sm:$0xff]  }
0x1109   : > { %v5031_v47 = vrot.slane %v5030_v16, 2 }
0x110b   : > { %v5032_v32 = vadd.f32 %v5031_v47, %v5030_v16  ;;  %v7797_v16 = vld [vmem:[%s10689_s6 + $0x1a0] sm:$0xff]   ;;  %v7798_v47 = vld [vmem:[%s10689_s6 + $0x1a8] sm:$0xff]  }
0x110d   : > { %v5033_v40 = vrot.slane %v5032_v32, 1 }
0x110f   : > { %v5034_v45 = vadd.f32 %v5033_v40, %v5032_v32  ;;  %v6526_v40 = vld [vmem:[%s10685_s2 + $0x6] ss:$0 sm:$0xff] }
0x1111   : > { %v5035_v33 = vmul.f32 0.11111111, %v5034_v45 }
0x1113   : > { %v5036_v29 = vpack.c.bf16 %v5035_v33, %v5035_v33 }
0x1115   : > { %7439 = vmatmul.mubr.bf16.vlgmr.msra.gmra.mrb[100].mxu1 %v5036_v29 }
0x1116   : > { %6998 = vmatpush3.bf16.msra.mxu1 %v7770_v19 }
0x1117   : > { %6999 = vmatprep.subr.bf16.mxu1 %v7771_v15 }
0x111a   : > { %7000 = vmatpush3.bf16.msra.mxu1 %v7772_v51 }
0x111b   : > { %7001 = vmatprep.subr.bf16.mxu1 %v7773_v43 }
0x111e   : > { %7002 = vmatpush3.bf16.msra.mxu1 %v7774_v1 }
0x111f   : > { %7003 = vmatprep.subr.bf16.mxu1 %v7775_v41 }
0x1122   : > { %7004 = vmatpush3.bf16.msra.mxu1 %v7776_v20 }
0x1123   : > { %7005 = vmatprep.subr.bf16.mxu1 %v7777_v26 }
0x1126   : > { %7006 = vmatpush3.bf16.msra.mxu1 %v7778_v5 }
0x1127   : > { %7007 = vmatprep.subr.bf16.mxu1 %v7779_v54  ;;  %v7799_v54 = vld [vmem:[%s10689_s6 + $0x1b0] sm:$0xff]  }
0x112a   : > { %7008 = vmatpush3.bf16.msra.mxu1 %v7780_v0  ;;  %v7800_v0 = vld [vmem:[%s10689_s6 + $0x1b8] sm:$0xff]  }
0x112b   : > { %7009 = vmatprep.subr.bf16.mxu1 %v7781_v60  ;;  %v5479_v60 = vld [vmem:[%s10688_s5 + $0x6] sm:$0x1] }
0x112e   : > { %7010 = vmatpush3.bf16.msra.mxu1 %v7782_v31 }
0x112f   : > { %7011 = vmatprep.subr.bf16.mxu1 %v7783_v57 }
0x1132   : > { %7012 = vmatpush3.bf16.msra.mxu1 %v7784_v27 }
0x1133   : > { %7482 = vmatprep.subr.bf16.mxu1 %v10802_v2 }
0x11e8   : > { %v5137_v42 = vpop.f32.mrb[100].mxu1 }
0x11e9   : > { %v5138_v62 = vadd.f32 %v5137_v42, %v5054_v28  ;;  %v7440_v25 = vpop.f32.mrb[101].mxu1 }
0x11ea   : > { %v5140_v35 = vpop.f32.mrb[102].mxu1 }
0x11eb   : > { %v5143_v14 = vmax.f32 %v5138_v62, 0.0  ;;  %v7441_v56 = vpop.f32.mrb[103].mxu1 }
0x11ed   : > { %v5144_v52 = vpack.c.bf16 %v5143_v14, %v5143_v14 }
0x11ef   : > { %7459 = vmatmul.mubr.bf16.vlgmr.msra.gmra.mrb[120].mxu0 %v5144_v52 }
0x11f0   : > { %7478 = vmatprep.mubr.msk.bf16.mxu0 %vm8010_vm1, %v10802_v2  ;;  %7463 = vmatpush3.bf16.msra.mxu0 %v7785_v48 }
0x11f1   : > { %7464 = vmatprep.subr.bf16.mxu0 %v10802_v2 }
0x11f4   : > { %7465 = vmatpush3.bf16.msra.mxu0 %v7786_v50 }
0x11f5   : > { %7466 = vmatprep.subr.bf16.mxu0 %v10802_v2 }
0x11f8   : > { %7467 = vmatpush3.bf16.msra.mxu0 %v7787_v10 }
0x11f9   : > { %7468 = vmatprep.subr.bf16.mxu0 %v10802_v2 }
0x11fc   : > { %7469 = vmatpush3.bf16.msra.mxu0 %v7788_v55 }
0x11fd   : > { %7470 = vmatprep.subr.bf16.mxu0 %v10802_v2 }
0x1200   : > { %7471 = vmatpush3.bf16.msra.mxu0 %v7789_v44 }
0x1201   : > { %7472 = vmatprep.subr.bf16.mxu0 %v10802_v2 }
0x1204   : > { %7473 = vmatpush3.bf16.msra.mxu0 %v7790_v11 }
0x1205   : > { %7474 = vmatprep.subr.bf16.mxu0 %v10802_v2 }
0x12c2   : > { %v5245_v59 = vpop.f32.mrb[120].mxu0 }
0x12c3   : > { %v5246_v22 = vadd.f32 %v5245_v59, %v5162_v9  ;;  %v7460_v37 = vpop.f32.mrb[121].mxu0 }
0x12c4   : > { %v5248_v38 = vpop.f32.mrb[122].mxu0 }
0x12c5   : > { %v6493_v7 = vmul.f32 -1.442695, %v5246_v22  ;;  %v7461_v30 = vpop.f32.mrb[123].mxu0  ;;  %v7801_v38 = vld [vmem:[%s10691_s8] sm:$0xff]  }
0x12c6   : > { %v7803_v30 = vld [vmem:[%s10691_s8 + $0x10] sm:$0xff]  }
0x12c7   : > { %7991 = vpow2.f32 %v6493_v7  ;;  %v7802_v7 = vld [vmem:[%s10691_s8 + $0x8] sm:$0xff]  }
0x12d1   : > { %v7992_v23 = vpop.eup %7991 }
0x12d2   : > { %v5254_v61 = vadd.f32 1.0, %v7992_v23  ;;  %v7804_v23 = vld [vmem:[%s10691_s8 + $0x18] sm:$0xff]  }
0x12d4   : > { %7993 = vrcp.f32 %v5254_v61  ;;  %v7805_v61 = vld [vmem:[%s10691_s8 + $0x20] sm:$0xff]  }
0x12de   : > { %v7994_v3 = vpop.eup %7993 }
0x12df   : > { %v5260_v24 = vrot.slane %v7994_v3, %v9309_v21  ;;  %v7806_v3 = vld [vmem:[%s10691_s8 + $0x28] sm:$0xff]  }
0x12e1   : > { %v5261_v36 = vmul.f32 %v5260_v24, %v10493_v8  ;;  %v5262_v49 = vmul.f32 %v5260_v24, %v10491_v53  ;;  %v7794_v53 = vld [vmem:[%s10689_s6 + $0x188] sm:$0xff]   ;;  %v7791_v8 = vld [vmem:[%s10687_s4 + $0x1b0] sm:$0xff]  }
0x12e2   : > { %7475 = vmatpush3.bf16.msra.mxu0 %v7791_v8  ;;  %v7807_v24 = vld [vmem:[%s10691_s8 + $0x30] sm:$0xff]  }
0x12e3   : > { %5264 = vst [vmem:[#allocation3 + $0x8] sm:$0x1] %v5262_v49  ;;  %5263 = vst [vmem:[#allocation3] sm:$0xff] %v5261_v36  ;;  %7476 = vmatprep.subr.bf16.mxu0 %v10802_v2  ;;  %v7808_v36 = vld [vmem:[%s10691_s8 + $0x38] sm:$0xff]   ;;  %v5587_v49 = vld [vmem:[%s10690_s7 + $0x6] sm:$0x1] }
0x12e6   : > { %7477 = vmatpush3.bf16.msra.mxu0 %v7792_v46 }
0x12e7   : > { %7502 = vmatprep.subr.bf16.mxu0 %v10802_v2 }
0x12ea   : > { %v5266_v13 = vld [vmem:[#allocation3 + $0x1] ss:$2 sm:$0xf]  ;;  %v5265_v58 = vld [vmem:[#allocation3] ss:$2 sm:$0xf] }
0x12eb   : > { %v5268_v6 = vpack.c.bf16 %v5266_v13, %v5266_v13  ;;  %v5267_v39 = vpack.c.bf16 %v5265_v58, %v5265_v58 }
0x12ed   : > { %5435 = vmatprep.mubr.bf16.mxu1 %v5268_v6 }
0x12ee   : > { %5436 = vmatmul.mubr.bf16.vlgmr.msra.gmra.mrb[104].mxu1 %v5267_v39 }
0x12ef   : > { %7498 = vmatprep.mubr.msk.bf16.mxu1 %vm8010_vm1, %v10802_v2  ;;  %7483 = vmatpush3.bf16.msra.mxu1 %v7793_v63 }
0x12f0   : > { %7484 = vmatprep.subr.bf16.mxu1 %v10802_v2 }
0x12f3   : > { %7485 = vmatpush3.bf16.msra.mxu1 %v7794_v53  ;;  %v6592_v53 = vld [vmem:[%s10692_s9] ss:$0 sm:$0xff] }
0x12f4   : > { %7486 = vmatprep.subr.bf16.mxu1 %v10802_v2 }
0x12f7   : > { %7487 = vmatpush3.bf16.msra.mxu1 %v7795_v4 }
0x12f8   : > { %7488 = vmatprep.subr.bf16.mxu1 %v10802_v2 }
0x12fb   : > { %7489 = vmatpush3.bf16.msra.mxu1 %v7796_v34 }
0x12fc   : > { %7490 = vmatprep.subr.bf16.mxu1 %v10802_v2 }
0x12ff   : > { %7491 = vmatpush3.bf16.msra.mxu1 %v7797_v16 }
0x1300   : > { %7492 = vmatprep.subr.bf16.mxu1 %v10802_v2 }
0x1303   : > { %7493 = vmatpush3.bf16.msra.mxu1 %v7798_v47 }
0x1304   : > { %7494 = vmatprep.subr.bf16.mxu1 %v10802_v2 }
0x1307   : > { %7495 = vmatpush3.bf16.msra.mxu1 %v7799_v54 }
0x1308   : > { %7496 = vmatprep.subr.bf16.mxu1 %v10802_v2 }
0x130b   : > { %7497 = vmatpush3.bf16.msra.mxu1 %v7800_v0 }
0x13c1   : > { %v7013_v32 = vpop.f32.mrb[104].mxu1 }
0x13c2   : > { %v7014_v45 = vpop.f32.mrb[105].mxu1 }
0x13c3   : > { %v7015_v33 = vadd.f32 %v7014_v45, %v7013_v32  ;;  %v7016_v29 = vpop.f32.mrb[106].mxu1 }
0x13c4   : > { %v7017_v12 = vpop.f32.mrb[107].mxu1 }
0x13c5   : > { %v5438_v18 = vadd.f32 %v7015_v33, %v6526_v40 }
0x13c7   : > { %v5443_v28 = vmul.f32 %v5438_v18, %v5438_v18 }
0x13c9   : > { %v5444_v42 = vmul.f32 %v5443_v28, %v5438_v18 }
0x13cb   : > { %v5445_v62 = vmul.f32 0.044715, %v5444_v42 }
0x13cd   : > { %v5446_v25 = vadd.f32 %v5445_v62, %v5438_v18 }
0x13cf   : > { %v5447_v35 = vmul.f32 0.7978846, %v5446_v25 }
0x13d1   : > { %7995 = vtanh.f32 %v5447_v35 }
0x13db   : > { %v7996_v14 = vpop.eup %7995 }
0x13dc   : > { %v5449_v56 = vadd.f32 1.0, %v7996_v14 }
0x13de   : > { %v5450_v52 = vmul.f32 0.5, %v5449_v56 }
0x13e0   : > { %v5451_v17 = vmul.f32 %v5450_v52, %v5438_v18 }
0x13e2   : > { %v5453_v19 = vsel %vm5452_vm4, %v5451_v17, 0.0 }
0x13e3   : > { %v5454_v15 = vrot.slane %v5453_v19, 4 }
0x13e5   : > { %v5455_v51 = vadd.f32 %v5454_v15, %v5453_v19 }
0x13e7   : > { %v5456_v43 = vrot.slane %v5455_v51, 2 }
0x13e9   : > { %v5457_v1 = vadd.f32 %v5456_v43, %v5455_v51 }
0x13eb   : > { %v5458_v41 = vrot.slane %v5457_v1, 1 }
0x13ed   : > { %v5459_v20 = vadd.f32 %v5458_v41, %v5457_v1 }
0x13ef   : > { %v5460_v26 = vmul.f32 0.25, %v5459_v20 }
0x13f1   : > { %v5461_v5 = vpack.c.bf16 %v5460_v26, %v5460_v26 }
0x13f3   : > { %7479 = vmatmul.mubr.bf16.vlgmr.msra.gmra.mrb[124].mxu0 %v5461_v5 }
0x13f4   : > { %7518 = vmatprep.mubr.msk.bf16.mxu0 %vm8010_vm1, %v10802_v2  ;;  %7503 = vmatpush3.bf16.msra.mxu0 %v7801_v38 }
0x13f5   : > { %7504 = vmatprep.subr.bf16.mxu0 %v10802_v2 }
0x13f8   : > { %7505 = vmatpush3.bf16.msra.mxu0 %v7802_v7 }
0x13f9   : > { %7506 = vmatprep.subr.bf16.mxu0 %v10802_v2 }
0x13fc   : > { %7507 = vmatpush3.bf16.msra.mxu0 %v7803_v30 }
0x13fd   : > { %7508 = vmatprep.subr.bf16.mxu0 %v10802_v2 }
0x1400   : > { %7509 = vmatpush3.bf16.msra.mxu0 %v7804_v23 }
0x1401   : > { %7510 = vmatprep.subr.bf16.mxu0 %v10802_v2 }
0x1404   : > { %7511 = vmatpush3.bf16.msra.mxu0 %v7805_v61 }
0x1405   : > { %7512 = vmatprep.subr.bf16.mxu0 %v10802_v2 }
0x1408   : > { %7513 = vmatpush3.bf16.msra.mxu0 %v7806_v3 }
0x1409   : > { %7514 = vmatprep.subr.bf16.mxu0 %v10802_v2 }
0x140c   : > { %7515 = vmatpush3.bf16.msra.mxu0 %v7807_v24 }
0x140d   : > { %7516 = vmatprep.subr.bf16.mxu0 %v10802_v2 }
0x1410   : > { %7517 = vmatpush3.bf16.msra.mxu0 %v7808_v36 }
0x14c6   : > { %v5562_v31 = vpop.f32.mrb[124].mxu0 }
0x14c7   : > { %v5563_v57 = vadd.f32 %v5562_v31, %v5479_v60  ;;  %v7480_v27 = vpop.f32.mrb[125].mxu0 }
0x14c8   : > { %v5565_v9 = vpop.f32.mrb[126].mxu0 }
0x14c9   : > { %v5568_v59 = vmax.f32 %v5563_v57, 0.0  ;;  %v7481_v22 = vpop.f32.mrb[127].mxu0 }
0x14cb   : > { %v5569_v37 = vpack.c.bf16 %v5568_v59, %v5568_v59 }
0x14cd   : > { %7499 = vmatmul.mubr.bf16.vlgmr.msra.gmra.mrb[108].mxu1 %v5569_v37 }
0x15a0   : > { %v5670_v13 = vpop.f32.mrb[108].mxu1 }
0x15a1   : > { %v5671_v58 = vadd.f32 %v5670_v13, %v5587_v49  ;;  %v7500_v6 = vpop.f32.mrb[109].mxu1 }
0x15a2   : > { %v5673_v39 = vpop.f32.mrb[110].mxu1 }
0x15a3   : > { %v6591_v48 = vmul.f32 -1.442695, %v5671_v58  ;;  %v7501_v50 = vpop.f32.mrb[111].mxu1 }
0x15a5   : > { %7997 = vpow2.f32 %v6591_v48 }
0x15af   : > { %v7998_v10 = vpop.eup %7997 }
0x15b0   : > { %v5679_v55 = vadd.f32 1.0, %v7998_v10 }
0x15b2   : > { %7999 = vrcp.f32 %v5679_v55 }
0x15bc   : > { %v8000_v44 = vpop.eup %7999 }
0x15bd   : > { %v5685_v63 = vrot.slane %v8000_v44, %v9309_v21 }
0x15bf   : > { %v5686_v2 = vmul.f32 %v5685_v63, %v5451_v17 }
0x15c1   : > { %v5687_v11 = vpack.c.bf16 %v5686_v2, %v5686_v2 }
0x15c3   : > { %7519 = vmatmul.mubr.bf16.vlgmr.msra.gmra.mrb[128].mxu0 %v5687_v11 }
0x1696   : > { %v5793_v8 = vpop.f32.mrb[128].mxu0 }
0x1697   : > { %v5794_v4 = vadd.f32 %v6592_v53, %v5793_v8  ;;  %v7520_v46 = vpop.f32.mrb[129].mxu0 }
0x1698   : > { %v5796_v34 = vpop.f32.mrb[130].mxu0 }
0x1699   : > { %5799 = vst [vmem:[%s357_s24] sm:$0xf] %v5794_v4  ;;  %v7521_v16 = vpop.f32.mrb[131].mxu0 }
0x169a PF: > { %s20_s13 = sadd.s32 1, %s8007_s13  }
0x169b   : > { %p17_p4 = scmp.ge.s32.totalorder %s20_s13, 4  }
0x169d   :  { %19 = sbr.rel (!%p17_p4) target bundleno = 1 (0x1), region = 204 }

</bundles_post_ra>
